<compile_context>
chip_gen: v5e
topology: v5e:2x2
jax: 0.10.0
libtpu: 0.0.40
codegen_flags: <defaults>
</compile_context>

<pallas_src>
import functools

import jax
import jax.numpy as jnp
from jax.experimental import pallas as pl
from jax.experimental.pallas import tpu as pltpu


# ----------------------------------------------------------------------------
# Fused kernel: sim -> k-NN mask -> masked log-softmax -> per-row loss
# ----------------------------------------------------------------------------
def _nncon_fused_kernel(fa_blk_ref, faT_ref, ft_blk_ref, ftT_ref, out_ref,
                        *, temperature, base_temperature, k):
    tm = fa_blk_ref.shape[0]          # anchor rows in this block
    B = faT_ref.shape[1]              # total batch (contrast axis, full)
    row0 = pl.program_id(0) * tm      # global row offset of this block

    # MXU-native [M,K] x [K,N] contraction (contrast operand pre-transposed).
    dn = (((1,), (0,)), ((), ()))

    # ---- k-NN mask from feat_t_g similarities (k picks per row) ----
    # bf16 operands, f32 accumulation.  Default MXU precision is bf16-class;
    # neighbor selection can differ from an f32/HIGHEST reference only on
    # near-exact ties (negligible for normalized embeddings).
    sim = jax.lax.dot_general(ft_blk_ref[...], ftT_ref[...], dn,
                              preferred_element_type=jnp.float32)   # [tm, B]

    neg_inf = jnp.float32(-jnp.inf)

    def knn_body(_, carry):
        remaining, mask = carry
        row_max = jnp.max(remaining, axis=1, keepdims=True)   # single XLU reduce
        sel = remaining == row_max                             # (ties: all marked)
        return (jnp.where(sel, neg_inf, remaining),
                jnp.logical_or(mask, sel))

    _, mask = jax.lax.fori_loop(
        0, k, knn_body,
        (sim, jnp.zeros((tm, B), jnp.bool_)),
        unroll=True)

    # ---- supervised-contrastive loss body ----
    dot = jax.lax.dot_general(fa_blk_ref[...], faT_ref[...], dn,
                              preferred_element_type=jnp.float32)   # [tm, B]
    dot = dot * jnp.float32(1.0 / temperature)
    logits = dot - jnp.max(dot, axis=1, keepdims=True)              # row-max stab.

    col_i = jax.lax.broadcasted_iota(jnp.int32, (tm, B), 1)
    row_i = jax.lax.broadcasted_iota(jnp.int32, (tm, B), 0) + row0
    not_diag = col_i != row_i                                       # drop self
    pos = jnp.logical_and(mask, not_diag)                           # positives

    exp_logits = jnp.where(not_diag, jnp.exp(logits), 0.0)
    log_denom = jnp.log(jnp.sum(exp_logits, axis=1))                # (tm,)

    num = jnp.sum(jnp.where(pos, logits, 0.0), axis=1)              # (tm,)
    msum = jnp.sum(pos.astype(jnp.float32), axis=1)                 # (tm,)
    safe_msum = jnp.where(msum == 0.0, 1.0, msum)

    # sum(pos * (logits - log_denom)) == num - msum * log_denom  (no log_prob temp)
    loss_rows = (-(temperature / base_temperature)) * (
        (num - msum * log_denom) / safe_msum)

    out_ref[0, :] = loss_rows.astype(out_ref.dtype)                 # lane-dense store


# ----------------------------------------------------------------------------
# Wrapper (mirrors NNConLoss.forward with contrast_count == anchor_count == 1)
# ----------------------------------------------------------------------------
@functools.partial(jax.jit,
                   static_argnames=("temperature", "base_temperature", "k",
                                    "block_rows"))
def nncon_loss(features, feat_t_g, temperature=0.07, base_temperature=0.07,
               k=5, block_rows=128):
    if features.ndim != 2:
        raise ValueError("`features` needs to be [B, D]")
    B, D = features.shape

    # Keep the output blocks lane-dense (last dim a multiple of 128) so stores
    # are unmasked vst; fall back to a single block otherwise.
    if block_rows % 128 == 0 and B % block_rows == 0:
        tm = block_rows
    else:
        tm = B

    # bf16 operands (f32 MXU accumulation in-kernel); contrast operands are
    # transposed once here so the kernel sees a lane-dense [D, B] RHS.
    fa = features.astype(jnp.bfloat16)          # [B, D] anchor rows
    ft = feat_t_g.astype(jnp.bfloat16)
    faT = fa.T                                  # [D, B] contrast (lane-dense)
    ftT = ft.T

    kernel = functools.partial(
        _nncon_fused_kernel,
        temperature=float(temperature),
        base_temperature=float(base_temperature),
        k=int(k),
    )

    row_loss = pl.pallas_call(
        kernel,
        out_shape=jax.ShapeDtypeStruct((1, B), jnp.float32),
        grid=(B // tm,),
        in_specs=[
            pl.BlockSpec((tm, D), lambda i: (i, 0)),   # anchor rows      [M, K]
            pl.BlockSpec((D, B), lambda i: (0, 0)),    # contrast (resident) [K, N]
            pl.BlockSpec((tm, D), lambda i: (i, 0)),   # feat_t_g rows    [M, K]
            pl.BlockSpec((D, B), lambda i: (0, 0)),    # feat_t_g (resident) [K, N]
        ],
        out_specs=pl.BlockSpec((1, tm), lambda i: (0, i)),
        compiler_params=pltpu.CompilerParams(
            dimension_semantics=("parallel",)),        # v7x: row blocks on 2 TCs
    )(fa, faT, ft, ftT)

    # Final mean over B scalars left in XLA (negligible; keeps the row-block
    # axis "parallel" for the megacore split).
    return jnp.mean(row_loss)


# ----------------------------------------------------------------------------
# Pure-JAX reference (direct transcription of the PyTorch module) for checking
# ----------------------------------------------------------------------------
def _reference_loss(features, feat_t_g, temperature, base_temperature, k):
    B = features.shape[0]
    hi = jax.lax.Precision.HIGHEST
    sim = jnp.dot(feat_t_g, feat_t_g.T, precision=hi)
    _, idx = jax.lax.top_k(sim, k)
    mask = jnp.zeros((B, B), jnp.float32).at[jnp.arange(B)[:, None], idx].set(1.0)

    dot = jnp.dot(features, features.T, precision=hi) / temperature
    logits = dot - jnp.max(dot, axis=1, keepdims=True)
    logits_mask = 1.0 - jnp.eye(B, dtype=jnp.float32)
    mask = mask * logits_mask
    exp_logits = jnp.exp(logits) * logits_mask
    log_prob = logits - jnp.log(jnp.sum(exp_logits, axis=1, keepdims=True))
    msum = jnp.sum(mask, axis=1)
    mean_log_prob_pos = jnp.sum(mask * log_prob, axis=1) / jnp.where(msum == 0.0,
                                                                     1.0, msum)
    return jnp.mean(-(temperature / base_temperature) * mean_log_prob_pos)


# ----------------------------------------------------------------------------
if __name__ == "__main__":
    # The reference module hardcodes a 256x256 mask => batch == 256.
    B, D = 256, 32
    key = jax.random.PRNGKey(0)
    k1, k2 = jax.random.split(key)
    features = jax.random.normal(k1, (B, D), dtype=jnp.float32)
    feat_t_g = jax.random.normal(k2, (B, D), dtype=jnp.float32)
    # Contrastive losses expect L2-normalized embeddings; un-normalized random
    # vectors at T=0.07 underflow every off-diagonal exp() -> inf loss (the
    # PyTorch reference behaves identically on such inputs).
    features = features / jnp.linalg.norm(features, axis=1, keepdims=True)
    feat_t_g = feat_t_g / jnp.linalg.norm(feat_t_g, axis=1, keepdims=True)

    loss = nncon_loss(features, feat_t_g, temperature=0.07,
                      base_temperature=0.07, k=5)
    loss = jax.block_until_ready(loss)

    ref = _reference_loss(features, feat_t_g, 0.07, 0.07, 5)
    assert loss.shape == ()
    assert bool(jnp.isfinite(loss)), loss
    assert bool(jnp.allclose(loss, ref, rtol=5e-2, atol=5e-2)), (loss, ref)
    print("KERNEL_OK")
</pallas_src>

<mosaic_0001>
module attributes {stable_mosaic.version = 11 : i64} {
  func.func @_nncon_fused_kernel(%arg0: i32, %arg1: memref<128x32xbf16, #tpu.memory_space<vmem>>, %arg2: memref<32x256xbf16, #tpu.memory_space<vmem>>, %arg3: memref<128x32xbf16, #tpu.memory_space<vmem>>, %arg4: memref<32x256xbf16, #tpu.memory_space<vmem>>, %arg5: memref<1x128xf32, #tpu.memory_space<vmem>>) attributes {dimension_semantics = [#tpu.dimension_semantics<parallel>], iteration_bounds = array<i64: 2>, scalar_prefetch = 0 : i64, scratch_operands = 0 : i64, tpu.core_type = #tpu.core_type<tc>, window_params = [{transform_indices = @transform_0, window_bounds = array<i64: 128, 32>}, {pipeline_mode = #tpu.pipeline_mode<synchronous>, transform_indices = @transform_1, window_bounds = array<i64: 32, 256>}, {transform_indices = @transform_2, window_bounds = array<i64: 128, 32>}, {pipeline_mode = #tpu.pipeline_mode<synchronous>, transform_indices = @transform_3, window_bounds = array<i64: 32, 256>}, {transform_indices = @transform_4, window_bounds = array<i64: 1, 128>}]} {
    %c128_i32 = arith.constant 128 : i32
    %0 = arith.muli %arg0, %c128_i32 : i32
    %c0 = arith.constant 0 : index
    %c0_0 = arith.constant 0 : index
    %1 = vector.load %arg3[%c0, %c0_0] : memref<128x32xbf16, #tpu.memory_space<vmem>>, vector<128x32xbf16>
    %c0_1 = arith.constant 0 : index
    %c0_2 = arith.constant 0 : index
    %2 = vector.load %arg4[%c0_1, %c0_2] : memref<32x256xbf16, #tpu.memory_space<vmem>>, vector<32x256xbf16>
    %cst = arith.constant dense<0.000000e+00> : vector<128x256xf32>
    %3 = tpu.matmul %1, %2, %cst {dimension_numbers = #tpu.dot_dimension_numbers<[1], [0], [0], [1], [0, 0, 1, 1], [], []>} : vector<128x32xbf16>, vector<32x256xbf16>, vector<128x256xf32> -> vector<128x256xf32>
    %false = arith.constant false
    %4 = vector.broadcast %false : i1 to vector<128x256xi1>
    %cst_3 = arith.constant 0xFF800000 : f32
    %c0_i32 = arith.constant 0 : i32
    %cst_4 = arith.constant dense<0xFF800000> : vector<128xf32>
    %5 = vector.multi_reduction <maximumf>, %3, %cst_4 [1] : vector<128x256xf32> to vector<128xf32>
    %6 = vector.shape_cast %5 : vector<128xf32> to vector<128x1xf32>
    %7 = vector.broadcast %6 : vector<128x1xf32> to vector<128x256xf32>
    %8 = arith.cmpf oeq, %3, %7 : vector<128x256xf32>
    %9 = vector.broadcast %cst_3 : f32 to vector<128x256xf32>
    %10 = arith.select %8, %9, %3 : vector<128x256xi1>, vector<128x256xf32>
    %11 = arith.ori %4, %8 : vector<128x256xi1>
    %c1_i32 = arith.constant 1 : i32
    %cst_5 = arith.constant dense<0xFF800000> : vector<128xf32>
    %12 = vector.multi_reduction <maximumf>, %10, %cst_5 [1] : vector<128x256xf32> to vector<128xf32>
    %13 = vector.shape_cast %12 : vector<128xf32> to vector<128x1xf32>
    %14 = vector.broadcast %13 : vector<128x1xf32> to vector<128x256xf32>
    %15 = arith.cmpf oeq, %10, %14 : vector<128x256xf32>
    %16 = vector.broadcast %cst_3 : f32 to vector<128x256xf32>
    %17 = arith.select %15, %16, %10 : vector<128x256xi1>, vector<128x256xf32>
    %18 = arith.ori %11, %15 : vector<128x256xi1>
    %c2_i32 = arith.constant 2 : i32
    %cst_6 = arith.constant dense<0xFF800000> : vector<128xf32>
    %19 = vector.multi_reduction <maximumf>, %17, %cst_6 [1] : vector<128x256xf32> to vector<128xf32>
    %20 = vector.shape_cast %19 : vector<128xf32> to vector<128x1xf32>
    %21 = vector.broadcast %20 : vector<128x1xf32> to vector<128x256xf32>
    %22 = arith.cmpf oeq, %17, %21 : vector<128x256xf32>
    %23 = vector.broadcast %cst_3 : f32 to vector<128x256xf32>
    %24 = arith.select %22, %23, %17 : vector<128x256xi1>, vector<128x256xf32>
    %25 = arith.ori %18, %22 : vector<128x256xi1>
    %c3_i32 = arith.constant 3 : i32
    %cst_7 = arith.constant dense<0xFF800000> : vector<128xf32>
    %26 = vector.multi_reduction <maximumf>, %24, %cst_7 [1] : vector<128x256xf32> to vector<128xf32>
    %27 = vector.shape_cast %26 : vector<128xf32> to vector<128x1xf32>
    %28 = vector.broadcast %27 : vector<128x1xf32> to vector<128x256xf32>
    %29 = arith.cmpf oeq, %24, %28 : vector<128x256xf32>
    %30 = vector.broadcast %cst_3 : f32 to vector<128x256xf32>
    %31 = arith.select %29, %30, %24 : vector<128x256xi1>, vector<128x256xf32>
    %32 = arith.ori %25, %29 : vector<128x256xi1>
    %c4_i32 = arith.constant 4 : i32
    %cst_8 = arith.constant dense<0xFF800000> : vector<128xf32>
    %33 = vector.multi_reduction <maximumf>, %31, %cst_8 [1] : vector<128x256xf32> to vector<128xf32>
    %34 = vector.shape_cast %33 : vector<128xf32> to vector<128x1xf32>
    %35 = vector.broadcast %34 : vector<128x1xf32> to vector<128x256xf32>
    %36 = arith.cmpf oeq, %31, %35 : vector<128x256xf32>
    %37 = vector.broadcast %cst_3 : f32 to vector<128x256xf32>
    %38 = arith.select %36, %37, %31 : vector<128x256xi1>, vector<128x256xf32>
    %39 = arith.ori %32, %36 : vector<128x256xi1>
    %c0_9 = arith.constant 0 : index
    %c0_10 = arith.constant 0 : index
    %40 = vector.load %arg1[%c0_9, %c0_10] : memref<128x32xbf16, #tpu.memory_space<vmem>>, vector<128x32xbf16>
    %c0_11 = arith.constant 0 : index
    %c0_12 = arith.constant 0 : index
    %41 = vector.load %arg2[%c0_11, %c0_12] : memref<32x256xbf16, #tpu.memory_space<vmem>>, vector<32x256xbf16>
    %cst_13 = arith.constant dense<0.000000e+00> : vector<128x256xf32>
    %42 = tpu.matmul %40, %41, %cst_13 {dimension_numbers = #tpu.dot_dimension_numbers<[1], [0], [0], [1], [0, 0, 1, 1], [], []>} : vector<128x32xbf16>, vector<32x256xbf16>, vector<128x256xf32> -> vector<128x256xf32>
    %cst_14 = arith.constant 14.2857141 : f32
    %43 = vector.broadcast %cst_14 : f32 to vector<128x256xf32>
    %44 = arith.mulf %42, %43 : vector<128x256xf32>
    %cst_15 = arith.constant dense<0xFF800000> : vector<128xf32>
    %45 = vector.multi_reduction <maximumf>, %44, %cst_15 [1] : vector<128x256xf32> to vector<128xf32>
    %46 = vector.shape_cast %45 : vector<128xf32> to vector<128x1xf32>
    %47 = vector.broadcast %46 : vector<128x1xf32> to vector<128x256xf32>
    %48 = arith.subf %44, %47 : vector<128x256xf32>
    %49 = tpu.iota {dimensions = array<i32: 1>} : vector<128x256xi32>
    %50 = tpu.iota {dimensions = array<i32: 0>} : vector<128x256xi32>
    %51 = vector.broadcast %0 : i32 to vector<128x256xi32>
    %52 = arith.addi %50, %51 : vector<128x256xi32>
    %53 = arith.cmpi ne, %49, %52 : vector<128x256xi32>
    %54 = arith.andi %39, %53 : vector<128x256xi1>
    %55 = math.exp %48 : vector<128x256xf32>
    %cst_16 = arith.constant 0.000000e+00 : f32
    %56 = vector.broadcast %cst_16 : f32 to vector<128x256xf32>
    %57 = arith.select %53, %55, %56 : vector<128x256xi1>, vector<128x256xf32>
    %cst_17 = arith.constant dense<0.000000e+00> : vector<128xf32>
    %58 = vector.multi_reduction <add>, %57, %cst_17 [1] : vector<128x256xf32> to vector<128xf32>
    %59 = math.log %58 : vector<128xf32>
    %cst_18 = arith.constant 0.000000e+00 : f32
    %60 = vector.broadcast %cst_18 : f32 to vector<128x256xf32>
    %61 = arith.select %54, %48, %60 : vector<128x256xi1>, vector<128x256xf32>
    %cst_19 = arith.constant dense<0.000000e+00> : vector<128xf32>
    %62 = vector.multi_reduction <add>, %61, %cst_19 [1] : vector<128x256xf32> to vector<128xf32>
    %63 = arith.extui %54 : vector<128x256xi1> to vector<128x256xi32>
    %64 = arith.sitofp %63 : vector<128x256xi32> to vector<128x256xf32>
    %cst_20 = arith.constant dense<0.000000e+00> : vector<128xf32>
    %65 = vector.multi_reduction <add>, %64, %cst_20 [1] : vector<128x256xf32> to vector<128xf32>
    %cst_21 = arith.constant 0.000000e+00 : f32
    %66 = vector.broadcast %cst_21 : f32 to vector<128xf32>
    %67 = arith.cmpf oeq, %65, %66 : vector<128xf32>
    %cst_22 = arith.constant 1.000000e+00 : f32
    %68 = vector.broadcast %cst_22 : f32 to vector<128xf32>
    %69 = arith.select %67, %68, %65 : vector<128xi1>, vector<128xf32>
    %70 = arith.mulf %65, %59 : vector<128xf32>
    %71 = arith.subf %62, %70 : vector<128xf32>
    %72 = arith.divf %71, %69 : vector<128xf32>
    %cst_23 = arith.constant -1.000000e+00 : f32
    %73 = vector.broadcast %cst_23 : f32 to vector<128xf32>
    %74 = arith.mulf %73, %72 : vector<128xf32>
    %c0_24 = arith.constant 0 : index
    %c0_25 = arith.constant 0 : index
    %75 = vector.load %arg5[%c0_24, %c0_25] : memref<1x128xf32, #tpu.memory_space<vmem>>, vector<1x128xf32>
    %76 = vector.shape_cast %75 : vector<1x128xf32> to vector<128xf32>
    %77 = vector.shape_cast %74 : vector<128xf32> to vector<1x128xf32>
    tpu.vector_store %arg5[%c0_24, %c0_25], %77 {strides = array<i32>} : memref<1x128xf32, #tpu.memory_space<vmem>>, vector<1x128xf32>,
    return
  }
  func.func @transform_0(%arg0: i32) -> (i32, i32) {
    %c0_i32 = arith.constant 0 : i32
    %c0_i32_0 = arith.constant 0 : i32
    return %arg0, %c0_i32 : i32, i32
  }
  func.func @transform_1(%arg0: i32) -> (i32, i32) {
    %c0_i32 = arith.constant 0 : i32
    %c0_i32_0 = arith.constant 0 : i32
    %c0_i32_1 = arith.constant 0 : i32
    return %c0_i32, %c0_i32_0 : i32, i32
  }
  func.func @transform_2(%arg0: i32) -> (i32, i32) {
    %c0_i32 = arith.constant 0 : i32
    %c0_i32_0 = arith.constant 0 : i32
    return %arg0, %c0_i32 : i32, i32
  }
  func.func @transform_3(%arg0: i32) -> (i32, i32) {
    %c0_i32 = arith.constant 0 : i32
    %c0_i32_0 = arith.constant 0 : i32
    %c0_i32_1 = arith.constant 0 : i32
    return %c0_i32, %c0_i32_0 : i32, i32
  }
  func.func @transform_4(%arg0: i32) -> (i32, i32) {
    %c0_i32 = arith.constant 0 : i32
    %c0_i32_0 = arith.constant 0 : i32
    return %c0_i32, %arg0 : i32, i32
  }
}

</mosaic_0001>

<bundles_post_ra>
// kernel: nncon_loss.1
= control target key start
LH: loop header
LB: loop body
LE: loop exit
PB: predicated region body
PF: predicated region fallthrough
CT: control target
= control target key end

     0   :  { %s2687_s15 = smov 0   ;;  %s5454_s0 = inlined_call_operand.vmem [shape: bf16[256,32], index: 0, kind: input, shape index: {}]   ;;  %s5455_s1 = inlined_call_operand.vmem [shape: bf16[32,256], index: 1, kind: input, shape index: {}]   ;;  %s5456_s2 = inlined_call_operand.vmem [shape: bf16[256,32], index: 2, kind: input, shape index: {}]   ;;  %s5457_s3 = inlined_call_operand.vmem [shape: bf16[32,256], index: 3, kind: input, shape index: {}]   ;;  %s5458_s4 = inlined_call_operand.vmem [shape: f32[1,256], index: 4, kind: output, shape index: {}]  }
   0x1 LB: > { %s2693_s16 = sadd.s32 4294967295, %s2659_s15   ;;  %p2324_p0 = scmp.ge.s32.totalorder %s2659_s15, 1  ;;  %s2659_s15 = sphi %s2687_s15, %s14_s15  }
   0x2   : > { %p174_p1 = scmp.lt.s32.totalorder %s2659_s15, 3 }
   0x4   : > { %p175_p2 = pnand %p2324_p0, %p174_p1 }
   0x6   : > { %178 = sbr.rel (%p175_p2) target bundleno = 1019 (0x3fb), region = 36 }
   0xb   : > { %v2372_v0 = vld [vmem:[%s5457_s3 + $0x10] sm:$0xf]  ;;  %v2503_v1 = vld [vmem:[%s5457_s3 + $0x14] sm:$0xf0]  ;;  %v2502_v2 = vld [vmem:[%s5457_s3 + $0x14] sm:$0xf] }
   0xc   : > { %v2373_v3 = vor.u32 %v2503_v1, %v2372_v0  ;;  %v2374_v4 = vld [vmem:[%s5457_s3 + $0x18] sm:$0xf0]  ;;  %v2436_v5 = vld [vmem:[%s5455_s1 + $0x10] sm:$0xf]  ;;  %v2515_v6 = vld [vmem:[%s5455_s1 + $0x14] sm:$0xf0] }
   0xd   : > { %v2377_v7 = vor.u32 %v2502_v2, %v2374_v4  ;;  %v2437_v8 = vor.u32 %v2515_v6, %v2436_v5  ;;  %v2514_v9 = vld [vmem:[%s5455_s1 + $0x14] sm:$0xf]  ;;  %v2438_v10 = vld [vmem:[%s5455_s1 + $0x18] sm:$0xf0]  ;;  %v2364_v11 = vld [vmem:[%s5457_s3] sm:$0xf] }
   0xe   : > { %331 = vmatpush.bf16.msra.mxu0 %v2373_v3  ;;  %v2441_v12 = vor.u32 %v2514_v9, %v2438_v10  ;;  %v2501_v13 = vld [vmem:[%s5457_s3 + $0x4] sm:$0xf0]  ;;  %v2500_v14 = vld [vmem:[%s5457_s3 + $0x4] sm:$0xf]  ;;  %v2366_v15 = vld [vmem:[%s5457_s3 + $0x8] sm:$0xf0] }
   0xf   : > { %380 = vmatpush.bf16.msra.mxu1 %v2377_v7  ;;  %1189 = vmatpush.bf16.msra.mxu2 %v2437_v8  ;;  %v2365_v16 = vor.u32 %v2501_v13, %v2364_v11  ;;  %v2369_v17 = vor.u32 %v2500_v14, %v2366_v15  ;;  %v2428_v18 = vld [vmem:[%s5455_s1] sm:$0xf]  ;;  %v2513_v19 = vld [vmem:[%s5455_s1 + $0x4] sm:$0xf0]  ;;  %v2512_v20 = vld [vmem:[%s5455_s1 + $0x4] sm:$0xf] }
  0x10   : > { %1238 = vmatpush.bf16.msra.mxu3 %v2441_v12  ;;  %v2429_v21 = vor.u32 %v2513_v19, %v2428_v18  ;;  %v2430_v22 = vld [vmem:[%s5455_s1 + $0x8] sm:$0xf0]  ;;  %s2325_s25 = sshll.u32 %s2693_s16, 4  ;;  %vm300_vm0 = vcmask 261120   ;;  %s2329_s7 = sshll.u32 %s2693_s16, 7 }
  0x11   : > { %v2433_v23 = vor.u32 %v2512_v20, %v2430_v22  ;;  %p204_p3 = scmp.lt.s32.totalorder %s2325_s25, 31  ;;  %p215_p4 = scmp.lt.s32.totalorder %s2693_s16, 1 }
  0x12   : > { %332 = vmatpush.bf16.msra.mxu0 %v2365_v16 }
  0x13   : > { %381 = vmatpush.bf16.msra.mxu1 %v2369_v17  ;;  %1190 = vmatpush.bf16.msra.mxu2 %v2429_v21  ;;  %s6375_s25 = smov (!%p204_p3, %s2325_s25), 31  ;;  %s6377_s16 = smov (!%p215_p4, %s2693_s16), 1 }
  0x14   : > { %1239 = vmatpush.bf16.msra.mxu3 %v2433_v23  ;;  %s2326_s26 = sshll.u32 %s6375_s25, 2  ;;  %s217_s10 = scalar_lea.vmem %s5458_s4, %s6377_s16 }
  0x15   : > { %s2749_s29 = scalar_lea.vmem %s5456_s2, %s2326_s26  ;;  %s2754_s6 = scalar_lea.vmem %s5454_s0, %s2326_s26 }
  0x16   : > { %v2492_v24 = vld [vmem:[%s2749_s29] sm:$0xff]  ;;  %v2493_v26 = vld [vmem:[%s2749_s29 + $0x8] sm:$0xff]  ;;  %v2494_v28 = vld [vmem:[%s2749_s29 + $0x10] sm:$0xff] }
  0x17   : > { %v2504_v25 = vld [vmem:[%s2754_s6] sm:$0xff]  ;;  %2378 = vmatmul.msk.bf16.vlgmr.msra.gmra.mxu0 %vm300_vm0, %v2492_v24  ;;  %2386 = vmatmul.msk.bf16.vlgmr.msra.gmra.mxu1 %vm300_vm0, %v2492_v24  ;;  %v2505_v27 = vld [vmem:[%s2754_s6 + $0x8] sm:$0xff]  ;;  %v2506_v29 = vld [vmem:[%s2754_s6 + $0x10] sm:$0xff] }
  0x18   : > { %2442 = vmatmul.msk.bf16.vlgmr.msra.gmra.mxu2 %vm300_vm0, %v2504_v25  ;;  %2450 = vmatmul.msk.bf16.vlgmr.msra.gmra.mxu3 %vm300_vm0, %v2504_v25  ;;  %v2495_v30 = vld [vmem:[%s2749_s29 + $0x18] sm:$0xff]  ;;  %v2496_v32 = vld [vmem:[%s2749_s29 + $0x20] sm:$0xff]  ;;  %v2497_v34 = vld [vmem:[%s2749_s29 + $0x28] sm:$0xff] }
  0x19   : > { %v2507_v31 = vld [vmem:[%s2754_s6 + $0x18] sm:$0xff]  ;;  %v2508_v33 = vld [vmem:[%s2754_s6 + $0x20] sm:$0xff]  ;;  %v2509_v35 = vld [vmem:[%s2754_s6 + $0x28] sm:$0xff] }
  0x1a   : > { %v2498_v36 = vld [vmem:[%s2749_s29 + $0x30] sm:$0xff]  ;;  %v2499_v38 = vld [vmem:[%s2749_s29 + $0x38] sm:$0xff] }
  0x1b   : > { %v2510_v37 = vld [vmem:[%s2754_s6 + $0x30] sm:$0xff]  ;;  %v2511_v39 = vld [vmem:[%s2754_s6 + $0x38] sm:$0xff] }
  0x27   : > { %2379 = vmatmul.msk.bf16.gmra.mxu0 %vm300_vm0, %v2493_v26  ;;  %2387 = vmatmul.msk.bf16.gmra.mxu1 %vm300_vm0, %v2493_v26 }
  0x28   : > { %2443 = vmatmul.msk.bf16.gmra.mxu2 %vm300_vm0, %v2505_v27  ;;  %2451 = vmatmul.msk.bf16.gmra.mxu3 %vm300_vm0, %v2505_v27 }
  0x37   : > { %2380 = vmatmul.msk.bf16.gmra.mxu0 %vm300_vm0, %v2494_v28  ;;  %2388 = vmatmul.msk.bf16.gmra.mxu1 %vm300_vm0, %v2494_v28 }
  0x38   : > { %2444 = vmatmul.msk.bf16.gmra.mxu2 %vm300_vm0, %v2506_v29  ;;  %2452 = vmatmul.msk.bf16.gmra.mxu3 %vm300_vm0, %v2506_v29 }
  0x47   : > { %2381 = vmatmul.msk.bf16.gmra.mxu0 %vm300_vm0, %v2495_v30  ;;  %2389 = vmatmul.msk.bf16.gmra.mxu1 %vm300_vm0, %v2495_v30 }
  0x48   : > { %2445 = vmatmul.msk.bf16.gmra.mxu2 %vm300_vm0, %v2507_v31  ;;  %2453 = vmatmul.msk.bf16.gmra.mxu3 %vm300_vm0, %v2507_v31 }
  0x57   : > { %2382 = vmatmul.msk.bf16.gmra.mxu0 %vm300_vm0, %v2496_v32  ;;  %2390 = vmatmul.msk.bf16.gmra.mxu1 %vm300_vm0, %v2496_v32 }
  0x58   : > { %2446 = vmatmul.msk.bf16.gmra.mxu2 %vm300_vm0, %v2508_v33  ;;  %2454 = vmatmul.msk.bf16.gmra.mxu3 %vm300_vm0, %v2508_v33 }
  0x67   : > { %2383 = vmatmul.msk.bf16.gmra.mxu0 %vm300_vm0, %v2497_v34  ;;  %2391 = vmatmul.msk.bf16.gmra.mxu1 %vm300_vm0, %v2497_v34 }
  0x68   : > { %2447 = vmatmul.msk.bf16.gmra.mxu2 %vm300_vm0, %v2509_v35  ;;  %2455 = vmatmul.msk.bf16.gmra.mxu3 %vm300_vm0, %v2509_v35 }
  0x77   : > { %2384 = vmatmul.msk.bf16.gmra.mxu0 %vm300_vm0, %v2498_v36  ;;  %2392 = vmatmul.msk.bf16.gmra.mxu1 %vm300_vm0, %v2498_v36 }
  0x78   : > { %2448 = vmatmul.msk.bf16.gmra.mxu2 %vm300_vm0, %v2510_v37  ;;  %2456 = vmatmul.msk.bf16.gmra.mxu3 %vm300_vm0, %v2510_v37 }
  0x87   : > { %2385 = vmatmul.msk.bf16.gmra.mxu0 %vm300_vm0, %v2499_v38  ;;  %2393 = vmatmul.msk.bf16.gmra.mxu1 %vm300_vm0, %v2499_v38 }
  0x88   : > { %2449 = vmatmul.msk.bf16.gmra.mxu2 %vm300_vm0, %v2511_v39  ;;  %2457 = vmatmul.msk.bf16.gmra.mxu3 %vm300_vm0, %v2511_v39 }
  0x94   : > { %v2804_v40 = vpop.f32.mrf.mxu0  ;;  %v2806_v41 = vpop.f32.mrf.mxu1 }
  0x95   : > { %5753 = vst [vmem:[#allocation2_spill] sm:$0xff] %v2804_v40  ;;  %v423_v42 = vmax.f32 %v2804_v40, %v2806_v41 }
  0x96   : > { %5754 = vst [vmem:[#allocation3_spill] sm:$0xff] %v2806_v41 }
  0x97   : > { %424 = vmax.xlane.f32.xlu0 %v423_v42 }
  0x9b   : > { %v1192_v43 = vpop.f32.mrf.mxu2  ;;  %v1241_v44 = vpop.f32.mrf.mxu3 }
  0x9c   : > { %v2810_v45 = vmul.f32 14.285714, %v1192_v43  ;;  %v2812_v46 = vmul.f32 14.285714, %v1241_v44  ;;  %v2814_v47 = vpop.f32.mrf.mxu0  ;;  %v2816_v48 = vpop.f32.mrf.mxu1 }
  0x9d   : > { %5755 = vst [vmem:[#allocation4_spill] sm:$0xff] %v2814_v47  ;;  %v426_v49 = vmax.f32 %v2814_v47, %v2816_v48 }
  0x9e   : > { %5756 = vst [vmem:[#allocation5_spill] sm:$0xff] %v2816_v48  ;;  %v1313_v50 = vmax.f32 %v2810_v45, %v2812_v46 }
  0x9f   : > { %427 = vmax.xlane.f32.xlu0 %v426_v49 }
  0xa0   : > { %1314 = vmax.xlane.f32.xlu2 %v1313_v50 }
  0xa3   : > { %v1194_v51 = vpop.f32.mrf.mxu2  ;;  %v1243_v52 = vpop.f32.mrf.mxu3 }
  0xa4   : > { %v2822_v53 = vmul.f32 14.285714, %v1194_v51  ;;  %v2824_v54 = vmul.f32 14.285714, %v1243_v52  ;;  %v2826_v55 = vpop.f32.mrf.mxu0  ;;  %v2828_v56 = vpop.f32.mrf.mxu1 }
  0xa5   : > { %5757 = vst [vmem:[#allocation6_spill] sm:$0xff] %v2826_v55  ;;  %v429_v57 = vmax.f32 %v2826_v55, %v2828_v56 }
  0xa6   : > { %v1316_v58 = vmax.f32 %v2822_v53, %v2824_v54 }
  0xa7   : > { %430 = vmax.xlane.f32.xlu1 %v429_v57 }
  0xa8   : > { %1317 = vmax.xlane.f32.xlu0 %v1316_v58 }
  0xab   : > { %v1197_v59 = vpop.f32.mrf.mxu2  ;;  %v1246_v60 = vpop.f32.mrf.mxu3 }
  0xac   : > { %v2834_v61 = vpop.f32.mrf.mxu0  ;;  %v2836_v62 = vpop.f32.mrf.mxu1  ;;  %v2840_v0 = vmul.f32 14.285714, %v1197_v59  ;;  %v2842_v1 = vmul.f32 14.285714, %v1246_v60 }
  0xad   : > { %5758 = vst [vmem:[#allocation7_spill] sm:$0xff] %v2836_v62  ;;  %v432_v63 = vmax.f32 %v2834_v61, %v2836_v62 }
  0xae   : > { %v1319_v7 = vmax.f32 %v2840_v0, %v2842_v1 }
  0xaf   : > { %433 = vmax.xlane.f32.xlu1 %v432_v63 }
  0xb3   : > { %v1199_v2 = vpop.f32.mrf.mxu2  ;;  %v1248_v3 = vpop.f32.mrf.mxu3 }
  0xb4   : > { %v2844_v4 = vpop.f32.mrf.mxu0  ;;  %v2846_v5 = vpop.f32.mrf.mxu1  ;;  %v2852_v8 = vmul.f32 14.285714, %v1199_v2  ;;  %v2854_v9 = vmul.f32 14.285714, %v1248_v3 }
  0xb5   : > { %5759 = vst [vmem:[#allocation8_spill] sm:$0xff] %v2844_v4  ;;  %v435_v6 = vmax.f32 %v2844_v4, %v2846_v5 }
  0xb6   : > { %5760 = vst [vmem:[#allocation9_spill] sm:$0xff] %v2846_v5  ;;  %v1322_v16 = vmax.f32 %v2852_v8, %v2854_v9 }
  0xb7   : > { %436 = vmax.xlane.f32.xlu2 %v435_v6  ;;  %1320 = vmax.xlane.f32.xlu1 %v1319_v7 }
  0xbb   : > { %v1202_v10 = vpop.f32.mrf.mxu2  ;;  %v1251_v11 = vpop.f32.mrf.mxu3 }
  0xbc   : > { %v2856_v12 = vmul.f32 14.285714, %v1202_v10  ;;  %v2858_v13 = vmul.f32 14.285714, %v1251_v11  ;;  %v2860_v14 = vpop.f32.mrf.mxu0  ;;  %v2862_v15 = vpop.f32.mrf.mxu1 }
  0xbd   : > { %v438_v24 = vmax.f32 %v2860_v14, %v2862_v15 }
  0xbe   : > { %v1325_v17 = vmax.f32 %v2856_v12, %v2858_v13 }
  0xbf   : > { %1323 = vmax.xlane.f32.xlu2 %v1322_v16 }
  0xc0   : > { %1326 = vmax.xlane.f32.xlu0 %v1325_v17 }
  0xc3   : > { %v1204_v18 = vpop.f32.mrf.mxu2  ;;  %v1253_v19 = vpop.f32.mrf.mxu3 }
  0xc4   : > { %v2868_v20 = vmul.f32 14.285714, %v1204_v18  ;;  %v2870_v21 = vmul.f32 14.285714, %v1253_v19  ;;  %v2872_v22 = vpop.f32.mrf.mxu0  ;;  %v2874_v23 = vpop.f32.mrf.mxu1 }
  0xc5   : > { %5761 = vst [vmem:[#allocation10_spill] sm:$0xff] %v2874_v23  ;;  %v441_v25 = vmax.f32 %v2872_v22, %v2874_v23 }
  0xc6   : > { %v1328_v26 = vmax.f32 %v2868_v20, %v2870_v21 }
  0xc7   : > { %439 = vmax.xlane.f32.xlu2 %v438_v24 }
  0xc8   : > { %442 = vmax.xlane.f32.xlu0 %v441_v25  ;;  %1329 = vmax.xlane.f32.xlu1 %v1328_v26 }
  0xcb   : > { %v1207_v27 = vpop.f32.mrf.mxu2  ;;  %v1256_v28 = vpop.f32.mrf.mxu3 }
  0xcc   : > { %v2882_v29 = vmul.f32 14.285714, %v1207_v27  ;;  %v2884_v30 = vmul.f32 14.285714, %v1256_v28  ;;  %v2886_v31 = vpop.f32.mrf.mxu0  ;;  %v2888_v32 = vpop.f32.mrf.mxu1 }
  0xcd   : > { %5762 = vst [vmem:[#allocation11_spill] sm:$0xff] %v2886_v31  ;;  %v444_v33 = vmax.f32 %v2886_v31, %v2888_v32 }
  0xce   : > { %5763 = vst [vmem:[#allocation12_spill] sm:$0xff] %v2888_v32  ;;  %v1331_v34 = vmax.f32 %v2882_v29, %v2884_v30 }
  0xd0   : > { %445 = vmax.xlane.f32.xlu1 %v444_v33  ;;  %1332 = vmax.xlane.f32.xlu2 %v1331_v34 }
  0xd3   : > { %v1209_v35 = vpop.f32.mrf.mxu2  ;;  %v1258_v36 = vpop.f32.mrf.mxu3 }
  0xd4   : > { %v2894_v37 = vmul.f32 14.285714, %v1209_v35  ;;  %v2896_v38 = vmul.f32 14.285714, %v1258_v36  ;;  %v2898_v39 = vpop.f32.mrf.mxu0  ;;  %v2900_v42 = vpop.f32.mrf.mxu1 }
  0xd5   : > { %5764 = vst [vmem:[#allocation13_spill] sm:$0xff] %v2898_v39  ;;  %v447_v43 = vmax.f32 %v2898_v39, %v2900_v42 }
  0xd6   : > { %5765 = vst [vmem:[#allocation14_spill] sm:$0xff] %v2900_v42  ;;  %v1334_v44 = vmax.f32 %v2894_v37, %v2896_v38 }
  0xd8   : > { %448 = vmax.xlane.f32.xlu2 %v447_v43  ;;  %1335 = vmax.xlane.f32.xlu0 %v1334_v44 }
  0xdb   : > { %v1212_v49 = vpop.f32.mrf.mxu2  ;;  %v1261_v50 = vpop.f32.mrf.mxu3 }
  0xdc   : > { %v2906_v51 = vmul.f32 14.285714, %v1212_v49  ;;  %v2908_v52 = vmul.f32 14.285714, %v1261_v50  ;;  %v2910_v57 = vpop.f32.mrf.mxu0  ;;  %v2912_v58 = vpop.f32.mrf.mxu1 }
  0xdd   : > { %5766 = vst [vmem:[#allocation15_spill] sm:$0xff] %v2910_v57  ;;  %v450_v59 = vmax.f32 %v2910_v57, %v2912_v58 }
  0xde   : > { %5767 = vst [vmem:[#allocation16_spill] sm:$0xff] %v2912_v58  ;;  %v1337_v60 = vmax.f32 %v2906_v51, %v2908_v52 }
  0xe0   : > { %451 = vmax.xlane.f32.xlu0 %v450_v59  ;;  %1338 = vmax.xlane.f32.xlu1 %v1337_v60 }
  0xe3   : > { %v1214_v63 = vpop.f32.mrf.mxu2  ;;  %v1263_v2 = vpop.f32.mrf.mxu3 }
  0xe4   : > { %v2918_v3 = vmul.f32 14.285714, %v1214_v63  ;;  %v2920_v6 = vmul.f32 14.285714, %v1263_v2  ;;  %v2922_v7 = vpop.f32.mrf.mxu0  ;;  %v2924_v10 = vpop.f32.mrf.mxu1 }
  0xe5   : > { %5768 = vst [vmem:[#allocation17_spill] sm:$0xff] %v2922_v7  ;;  %v453_v11 = vmax.f32 %v2922_v7, %v2924_v10 }
  0xe6   : > { %5769 = vst [vmem:[#allocation18_spill] sm:$0xff] %v2924_v10  ;;  %v1340_v16 = vmax.f32 %v2918_v3, %v2920_v6 }
  0xe8   : > { %454 = vmax.xlane.f32.xlu1 %v453_v11  ;;  %1341 = vmax.xlane.f32.xlu2 %v1340_v16 }
  0xeb   : > { %v1217_v17 = vpop.f32.mrf.mxu2  ;;  %v1266_v18 = vpop.f32.mrf.mxu3 }
  0xec   : > { %v2930_v19 = vmul.f32 14.285714, %v1217_v17  ;;  %v2932_v24 = vmul.f32 14.285714, %v1266_v18  ;;  %v2934_v25 = vpop.f32.mrf.mxu0  ;;  %v2936_v26 = vpop.f32.mrf.mxu1 }
  0xed   : > { %5770 = vst [vmem:[#allocation19_spill] sm:$0xff] %v2934_v25  ;;  %v456_v27 = vmax.f32 %v2934_v25, %v2936_v26 }
  0xee   : > { %5771 = vst [vmem:[#allocation20_spill] sm:$0xff] %v2936_v26  ;;  %v1343_v28 = vmax.f32 %v2930_v19, %v2932_v24 }
  0xf0   : > { %457 = vmax.xlane.f32.xlu2 %v456_v27  ;;  %1344 = vmax.xlane.f32.xlu0 %v1343_v28 }
  0xf3   : > { %v1219_v33 = vpop.f32.mrf.mxu2  ;;  %v1268_v34 = vpop.f32.mrf.mxu3 }
  0xf4   : > { %v2942_v35 = vmul.f32 14.285714, %v1219_v33  ;;  %v2944_v36 = vmul.f32 14.285714, %v1268_v34  ;;  %v2946_v43 = vpop.f32.mrf.mxu0  ;;  %v2948_v44 = vpop.f32.mrf.mxu1 }
  0xf5   : > { %5772 = vst [vmem:[#allocation21_spill] sm:$0xff] %v2946_v43  ;;  %v459_v49 = vmax.f32 %v2946_v43, %v2948_v44 }
  0xf6   : > { %5773 = vst [vmem:[#allocation22_spill] sm:$0xff] %v2948_v44  ;;  %v1346_v50 = vmax.f32 %v2942_v35, %v2944_v36 }
  0xf8   : > { %460 = vmax.xlane.f32.xlu0 %v459_v49  ;;  %1347 = vmax.xlane.f32.xlu1 %v1346_v50 }
  0xfb   : > { %v1222_v59 = vpop.f32.mrf.mxu2  ;;  %v1271_v60 = vpop.f32.mrf.mxu3 }
  0xfc   : > { %v2954_v63 = vmul.f32 14.285714, %v1222_v59  ;;  %v2956_v2 = vmul.f32 14.285714, %v1271_v60  ;;  %v2958_v11 = vpop.f32.mrf.mxu0  ;;  %v2960_v16 = vpop.f32.mrf.mxu1 }
  0xfd   : > { %5775 = vst [vmem:[#allocation24_spill] sm:$0xff] %v2958_v11  ;;  %v462_v17 = vmax.f32 %v2958_v11, %v2960_v16 }
  0xfe   : > { %5774 = vst [vmem:[#allocation23_spill] sm:$0xff] %v2956_v2  ;;  %v1349_v18 = vmax.f32 %v2954_v63, %v2956_v2 }
  0xff   : > { %5776 = vst [vmem:[#allocation25_spill] sm:$0xff] %v2960_v16 }
 0x100   : > { %463 = vmax.xlane.f32.xlu1 %v462_v17  ;;  %1350 = vmax.xlane.f32.xlu2 %v1349_v18 }
 0x103   : > { %v1224_v27 = vpop.f32.mrf.mxu2  ;;  %v1273_v28 = vpop.f32.mrf.mxu3 }
 0x104   : > { %v2966_v33 = vmul.f32 14.285714, %v1224_v27  ;;  %v2968_v34 = vmul.f32 14.285714, %v1273_v28  ;;  %v2970_v49 = vpop.f32.mrf.mxu0  ;;  %v2972_v50 = vpop.f32.mrf.mxu1 }
 0x105   : > { %5779 = vst [vmem:[#allocation28_spill] sm:$0xff] %v2970_v49  ;;  %v465_v59 = vmax.f32 %v2970_v49, %v2972_v50 }
 0x106   : > { %5777 = vst [vmem:[#allocation26_spill] sm:$0xff] %v2966_v33  ;;  %v1352_v60 = vmax.f32 %v2966_v33, %v2968_v34 }
 0x107   : > { %5778 = vst [vmem:[#allocation27_spill] sm:$0xff] %v2968_v34 }
 0x108   : > { %5780 = vst [vmem:[#allocation29_spill] sm:$0xff] %v2972_v50  ;;  %466 = vmax.xlane.f32.xlu2 %v465_v59  ;;  %1353 = vmax.xlane.f32.xlu0 %v1352_v60 }
 0x10a   : > { %v2978_v17 = vpop.xlane.xlu0 %424 }
 0x10b   : > { %5781 = vst [vmem:[#allocation30_spill] sm:$0xff] %v2978_v17  ;;  %vm471_vm1 = vcmp.eq.f32.partialorder %v2804_v40, %v2978_v17  ;;  %vm472_vm2 = vcmp.eq.f32.partialorder %v2806_v41, %v2978_v17  ;;  %v1276_v18 = vpop.f32.mrf.mxu3  ;;  %v1227_v27 = vpop.f32.mrf.mxu2 }
 0x10c   : > { %v2988_v28 = vsel %vm471_vm1, -inf, %v2804_v40  ;;  %v2994_v59 = vsel %vm472_vm2, -inf, %v2806_v41  ;;  %v2996_v60 = vpop.f32.mrf.mxu0  ;;  %v2998_v34 = vpop.f32.mrf.mxu1  ;;  %v3004_v49 = vmul.f32 14.285714, %v1276_v18  ;;  %v3006_v40 = vmul.f32 14.285714, %v1227_v27 }
 0x10d   : > { %5782 = vst [vmem:[#allocation31_spill] sm:$0xff] %v2988_v28  ;;  %v535_v33 = vmax.f32 %v2988_v28, %v2994_v59  ;;  %v468_v50 = vmax.f32 %v2996_v60, %v2998_v34  ;;  %v1393_v41 = vlaneseq }
 0x10e   : > { %5783 = vst [vmem:[#allocation32_spill] sm:$0xff] %v2994_v59 }
 0x10f   : > { %5784 = vst [vmem:[#allocation33_spill] sm:$0xff] %v2996_v60  ;;  %536 = vmax.xlane.f32.xlu1 %v535_v33  ;;  %v3039_v2 = vand.u32 127, %v1393_v41 }
 0x110   : > { %5785 = vst [vmem:[#allocation34_spill] sm:$0xff] %v2998_v34  ;;  %469 = vmax.xlane.f32.xlu0 %v468_v50  ;;  %v1355_v34 = vmax.f32 %v3006_v40, %v3004_v49 }
 0x111   : > { %5786 = vst [vmem:[#allocation35_spill] sm:$0xff] %v3004_v49 }
 0x112   : > { %5787 = vst [vmem:[#allocation36_spill] sm:$0xff] %v3006_v40  ;;  %v3008_v17 = vpop.xlane.xlu0 %427 }
 0x113   : > { %5788 = vst [vmem:[#allocation37_spill] sm:$0xff] %v3008_v17  ;;  %vm473_vm3 = vcmp.eq.f32.partialorder %v2814_v47, %v3008_v17  ;;  %vm474_vm4 = vcmp.eq.f32.partialorder %v2816_v48, %v3008_v17  ;;  %v1315_v59 = vpop.xlane.xlu2 %1314  ;;  %v1278_v60 = vpop.f32.mrf.mxu3 }
 0x114   : > { %v3020_v33 = vsel %vm473_vm3, -inf, %v2814_v47  ;;  %v3026_v50 = vsel %vm474_vm4, -inf, %v2816_v48  ;;  %v3029_v18 = vsub.f32 %v2810_v45, %v1315_v59  ;;  %v3032_v27 = vsub.f32 %v2812_v46, %v1315_v59  ;;  %v1229_v49 = vpop.f32.mrf.mxu2  ;;  %5792 = vst [vmem:[#allocation41_spill] sm:$0xff] %v3039_v2 }
 0x115   : > { %5789 = vst [vmem:[#allocation38_spill] sm:$0xff] %v3026_v50  ;;  %v538_v40 = vmax.f32 %v3020_v33, %v3026_v50  ;;  %v3041_v48 = vmul.f32 14.285714, %v1278_v60  ;;  %v3043_v45 = vmul.f32 14.285714, %v1229_v49  ;;  %v3045_v46 = vshrl.u32 %v1393_v41, 7 }
 0x116   : > { %5790 = vst [vmem:[#allocation39_spill] sm:$0xff] %v3029_v18  ;;  %v1494_v47 = vmul.f32 1.442695, %v3029_v18  ;;  %v1496_v28 = vmul.f32 1.442695, %v3032_v27  ;;  %v3047_v59 = vstv %s2329_s7  ;;  %v3052_v18 = vadd.s32 128, %v3039_v2 }
 0x117   : > { %5791 = vst [vmem:[#allocation40_spill] sm:$0xff] %v3032_v27  ;;  %539 = vmax.xlane.f32.xlu2 %v538_v40  ;;  %1356 = vmax.xlane.f32.xlu1 %v1355_v34  ;;  %v1358_v41 = vmax.f32 %v3043_v45, %v3041_v48 }
 0x118   : > { %5793 = vst [vmem:[#allocation42_spill] sm:$0xff] %v3041_v48  ;;  %2525 = vpow2.f32 %v1494_v47  ;;  %v3062_v47 = vadd.s32 %v3047_v59, %v3045_v46 }
 0x119   : > { %5794 = vst [vmem:[#allocation43_spill] sm:$0xff] %v3043_v45  ;;  %2527 = vpow2.f32 %v1496_v28 }
 0x11a   : > { %v3049_v17 = vpop.xlane.xlu1 %430  ;;  %5795 = vst [vmem:[#allocation44_spill] sm:$0xff] %v3052_v18  ;;  %vm5518_vm7 = vcmp.ne.s32.totalorder %v3039_v2, %v3062_v47  ;;  %vm5513_vm8 = vcmp.ne.s32.totalorder %v3052_v18, %v3062_v47 }
 0x11b   : > { %vm475_vm5 = vcmp.eq.f32.partialorder %v2826_v55, %v3049_v17  ;;  %vm5728_vm6 = vcmp.eq.f32.partialorder %v2828_v56, %v3049_v17  ;;  %v1318_v40 = vpop.xlane.xlu0 %1317  ;;  %5796 = vst [vmem:[#allocation45_spill] sm:$0xff] %v3062_v47 }
 0x11c   : > { %v3068_v34 = vsel %vm475_vm5, -inf, %v2826_v55  ;;  %v3074_v49 = vsel %vm5728_vm6, -inf, %v2828_v56  ;;  %v3077_v28 = vsub.f32 %v2822_v53, %v1318_v40  ;;  %v3080_v60 = vsub.f32 %v2824_v54, %v1318_v40 }
 0x11d   : > { %v541_v27 = vmax.f32 %v3068_v34, %v3074_v49  ;;  %v1398_v53 = vadd.s32 8, %v3045_v46 }
 0x11e   : > { %5797 = vst [vmem:[#allocation46_spill] sm:$0xff] %v3077_v28  ;;  %v2526_v48 = vpop.eup %2525  ;;  %v1498_v45 = vmul.f32 1.442695, %v3077_v28  ;;  %v1500_v55 = vmul.f32 1.442695, %v3080_v60 }
 0x11f   : > { %5798 = vst [vmem:[#allocation47_spill] sm:$0xff] %v3080_v60  ;;  %v2528_v50 = vpop.eup %2527  ;;  %542 = vmax.xlane.f32.xlu0 %v541_v27  ;;  %1359 = vmax.xlane.f32.xlu2 %v1358_v41  ;;  %v1558_v40 = vsel %vm5518_vm7, %v2526_v48, 0.0  ;;  %v3104_v41 = vadd.s32 %v3047_v59, %v1398_v53 }
 0x120   : > { %2529 = vpow2.f32 %v1498_v45  ;;  %v1559_v27 = vsel %vm5513_vm8, %v2528_v50, 0.0 }
 0x121   : > { %2531 = vpow2.f32 %v1500_v55  ;;  %5800 = vst [vmem:[#allocation49_spill] sm:$0xff] %v3104_v41  ;;  %v1590_v50 = vadd.f32 %v1559_v27, %v1558_v40  ;;  %vm5510_vm11 = vcmp.ne.s32.totalorder %v3039_v2, %v3104_v41  ;;  %vm5508_vm12 = vcmp.ne.s32.totalorder %v3052_v18, %v3104_v41 }
 0x122   : > { %v3091_v54 = vpop.xlane.xlu1 %433 }
 0x123   : > { %5799 = vst [vmem:[#allocation48_spill] sm:$0xff] %v3091_v54  ;;  %vm5647_vm9 = vcmp.eq.f32.partialorder %v2834_v61, %v3091_v54  ;;  %vm5645_vm10 = vcmp.eq.f32.partialorder %v2836_v62, %v3091_v54 }
 0x124   : > { %v3110_v55 = vsel %vm5647_vm9, -inf, %v2834_v61  ;;  %v3116_v48 = vsel %vm5645_vm10, -inf, %v2836_v62 }
 0x125   : > { %v544_v45 = vmax.f32 %v3110_v55, %v3116_v48 }
 0x126   : > { %v2530_v60 = vpop.eup %2529 }
 0x127   : > { %v2532_v28 = vpop.eup %2531  ;;  %1591 = vadd.xlane.f32.xlu0 %v1590_v50  ;;  %545 = vmax.xlane.f32.xlu1 %v544_v45  ;;  %v1560_v40 = vsel %vm5510_vm11, %v2530_v60, 0.0  ;;  %v1399_v50 = vadd.s32 16, %v3045_v46 }
 0x128   : > { %v1561_v27 = vsel %vm5508_vm12, %v2532_v28, 0.0 }
 0x129   : > { %v1593_v54 = vadd.f32 %v1561_v27, %v1560_v40 }
 0x12a   : > { %v3124_v53 = vpop.xlane.xlu2 %436  ;;  %v1321_v47 = vpop.xlane.xlu1 %1320 }
 0x12b   : > { %5801 = vst [vmem:[#allocation50_spill] sm:$0xff] %v3124_v53  ;;  %vm5639_vm13 = vcmp.eq.f32.partialorder %v2844_v4, %v3124_v53  ;;  %vm5638_vm14 = vcmp.eq.f32.partialorder %v2846_v5, %v3124_v53  ;;  %v3138_v45 = vsub.f32 %v2840_v0, %v1321_v47  ;;  %v3141_v62 = vsub.f32 %v2842_v1, %v1321_v47 }
 0x12c   : > { %v3147_v60 = vsel %vm5639_vm13, -inf, %v2844_v4  ;;  %v3153_v28 = vsel %vm5638_vm14, -inf, %v2846_v5  ;;  %v3160_v47 = vadd.s32 %v3047_v59, %v1399_v50 }
 0x12d   : > { %5802 = vst [vmem:[#allocation51_spill] sm:$0xff] %v3138_v45  ;;  %v1502_v41 = vmul.f32 1.442695, %v3138_v45  ;;  %v1504_v0 = vmul.f32 1.442695, %v3141_v62  ;;  %v547_v1 = vmax.f32 %v3147_v60, %v3153_v28 }
 0x12e   : > { %5803 = vst [vmem:[#allocation52_spill] sm:$0xff] %v3141_v62  ;;  %vm5507_vm15 = vcmp.ne.s32.totalorder %v3039_v2, %v3160_v47  ;;  %vm5509_vm0 = vcmp.ne.s32.totalorder %v3052_v18, %v3160_v47 }
 0x12f   : > { %2533 = vpow2.f32 %v1502_v41  ;;  %1594 = vadd.xlane.f32.xlu1 %v1593_v54  ;;  %548 = vmax.xlane.f32.xlu2 %v547_v1  ;;  %5804 = vst [vmem:[#allocation53_spill] sm:$0xff] %v3160_v47 }
 0x130   : > { %2535 = vpow2.f32 %v1504_v0  ;;  %v1401_v0 = vadd.s32 32, %v3045_v46 }
 0x132   : > { %v1324_v4 = vpop.xlane.xlu2 %1323 }
 0x133   : > { %v3163_v53 = vsub.f32 %v2852_v8, %v1324_v4  ;;  %v3166_v5 = vsub.f32 %v2854_v9, %v1324_v4  ;;  %v1327_v45 = vpop.xlane.xlu0 %1326 }
 0x134   : > { %v3171_v40 = vsub.f32 %v2856_v12, %v1327_v45  ;;  %v3174_v54 = vsub.f32 %v2858_v13, %v1327_v45  ;;  %v1400_v13 = vadd.s32 24, %v3045_v46 }
 0x135   : > { %5805 = vst [vmem:[#allocation54_spill] sm:$0xff] %v3163_v53  ;;  %v2534_v41 = vpop.eup %2533  ;;  %v1506_v8 = vmul.f32 1.442695, %v3163_v53  ;;  %v1508_v27 = vmul.f32 1.442695, %v3166_v5 }
 0x136   : > { %5806 = vst [vmem:[#allocation55_spill] sm:$0xff] %v3166_v5  ;;  %v2536_v4 = vpop.eup %2535  ;;  %v1510_v9 = vmul.f32 1.442695, %v3171_v40  ;;  %v1512_v50 = vmul.f32 1.442695, %v3174_v54  ;;  %v1562_v12 = vsel %vm5507_vm15, %v2534_v41, 0.0 }
 0x137   : > { %5807 = vst [vmem:[#allocation56_spill] sm:$0xff] %v3171_v40  ;;  %2537 = vpow2.f32 %v1506_v8  ;;  %v1563_v45 = vsel %vm5509_vm0, %v2536_v4, 0.0 }
 0x138   : > { %5808 = vst [vmem:[#allocation57_spill] sm:$0xff] %v3174_v54  ;;  %2539 = vpow2.f32 %v1508_v27  ;;  %v1596_v1 = vadd.f32 %v1563_v45, %v1562_v12  ;;  %v3193_v54 = vadd.s32 %v3047_v59, %v1400_v13  ;;  %v3202_v27 = vadd.s32 %v3047_v59, %v1401_v0 }
 0x139   : > { %2541 = vpow2.f32 %v1510_v9 }
 0x13a   : > { %2543 = vpow2.f32 %v1512_v50  ;;  %1597 = vadd.xlane.f32.xlu2 %v1596_v1  ;;  %v3190_v40 = vpop.xlane.xlu2 %439  ;;  %5809 = vst [vmem:[#allocation58_spill] sm:$0xff] %v3193_v54  ;;  %vm5523_vm8 = vcmp.ne.s32.totalorder %v3039_v2, %v3193_v54  ;;  %vm5524_vm7 = vcmp.ne.s32.totalorder %v3052_v18, %v3193_v54 }
 0x13b   : > { %vm5625_vm15 = vcmp.eq.f32.partialorder %v2860_v14, %v3190_v40  ;;  %vm5607_vm12 = vcmp.eq.f32.partialorder %v2862_v15, %v3190_v40  ;;  %v3199_v41 = vpop.xlane.xlu0 %442  ;;  %v1330_v8 = vpop.xlane.xlu1 %1329  ;;  %5811 = vst [vmem:[#allocation60_spill] sm:$0xff] %v3202_v27 }
 0x13c   : > { %5810 = vst [vmem:[#allocation59_spill] sm:$0xff] %v3199_v41  ;;  %v3208_v4 = vsel %vm5625_vm15, -inf, %v2860_v14  ;;  %v3214_v9 = vsel %vm5607_vm12, -inf, %v2862_v15  ;;  %vm5520_vm0 = vcmp.eq.f32.partialorder %v2872_v22, %v3199_v41  ;;  %vm5519_vm11 = vcmp.eq.f32.partialorder %v2874_v23, %v3199_v41 }
 0x13d   : > { %v2538_v50 = vpop.eup %2537  ;;  %v3224_v12 = vsel %vm5520_vm0, -inf, %v2872_v22  ;;  %v3230_v13 = vsel %vm5519_vm11, -inf, %v2874_v23  ;;  %v3233_v45 = vsub.f32 %v2868_v20, %v1330_v8  ;;  %v3236_v0 = vsub.f32 %v2870_v21, %v1330_v8 }
 0x13e   : > { %v2540_v1 = vpop.eup %2539  ;;  %v550_v5 = vmax.f32 %v3208_v4, %v3214_v9  ;;  %v553_v53 = vmax.f32 %v3224_v12, %v3230_v13  ;;  %v1402_v20 = vadd.s32 40, %v3045_v46  ;;  %vm5533_vm11 = vcmp.ne.s32.totalorder %v3039_v2, %v3202_v27 }
 0x13f   : > { %5812 = vst [vmem:[#allocation61_spill] sm:$0xff] %v3233_v45  ;;  %v2542_v62 = vpop.eup %2541  ;;  %v1514_v47 = vmul.f32 1.442695, %v3233_v45  ;;  %v1516_v23 = vmul.f32 1.442695, %v3236_v0  ;;  %vm5532_vm0 = vcmp.ne.s32.totalorder %v3052_v18, %v3202_v27  ;;  %v1564_v8 = vsel %vm5523_vm8, %v2538_v50, 0.0 }
 0x140   : > { %5813 = vst [vmem:[#allocation62_spill] sm:$0xff] %v3236_v0  ;;  %v2544_v21 = vpop.eup %2543  ;;  %551 = vmax.xlane.f32.xlu0 %v550_v5  ;;  %554 = vmax.xlane.f32.xlu1 %v553_v53  ;;  %v1565_v0 = vsel %vm5524_vm7, %v2540_v1, 0.0  ;;  %v1566_v53 = vsel %vm5533_vm11, %v2542_v62, 0.0  ;;  %v1403_v41 = vadd.s32 48, %v3045_v46 }
 0x141   : > { %2545 = vpow2.f32 %v1514_v47  ;;  %v1567_v47 = vsel %vm5532_vm0, %v2544_v21, 0.0  ;;  %v1599_v21 = vadd.f32 %v1565_v0, %v1564_v8 }
 0x142   : > { %2547 = vpow2.f32 %v1516_v23  ;;  %v3268_v23 = vadd.s32 %v3047_v59, %v1402_v20  ;;  %v1602_v54 = vadd.f32 %v1567_v47, %v1566_v53  ;;  %v3310_v47 = vadd.s32 %v3047_v59, %v1403_v41 }
 0x143   : > { %v3259_v45 = vpop.xlane.xlu1 %445  ;;  %v1333_v5 = vpop.xlane.xlu2 %1332 }
 0x144   : > { %5814 = vst [vmem:[#allocation63_spill] sm:$0xff] %v3259_v45  ;;  %vm5535_vm8 = vcmp.eq.f32.partialorder %v2886_v31, %v3259_v45  ;;  %vm5534_vm7 = vcmp.eq.f32.partialorder %v2888_v32, %v3259_v45  ;;  %v3275_v50 = vsub.f32 %v2882_v29, %v1333_v5  ;;  %v3278_v1 = vsub.f32 %v2884_v30, %v1333_v5 }
 0x145   : > { %5815 = vst [vmem:[#allocation64_spill] sm:$0xff] %v3268_v23  ;;  %v3284_v62 = vsel %vm5535_vm8, -inf, %v2886_v31  ;;  %v3290_v20 = vsel %vm5534_vm7, -inf, %v2888_v32  ;;  %vm5538_vm0 = vcmp.ne.s32.totalorder %v3039_v2, %v3268_v23  ;;  %vm5537_vm11 = vcmp.ne.s32.totalorder %v3052_v18, %v3268_v23 }
 0x146   : > { %5816 = vst [vmem:[#allocation65_spill] sm:$0xff] %v3275_v50  ;;  %v1518_v27 = vmul.f32 1.442695, %v3275_v50  ;;  %v1520_v29 = vmul.f32 1.442695, %v3278_v1  ;;  %v556_v30 = vmax.f32 %v3284_v62, %v3290_v20  ;;  %v1405_v23 = vadd.s32 64, %v3045_v46 }
 0x147   : > { %5817 = vst [vmem:[#allocation66_spill] sm:$0xff] %v3278_v1  ;;  %v2546_v5 = vpop.eup %2545 }
 0x148   : > { %5818 = vst [vmem:[#allocation67_spill] sm:$0xff] %v3290_v20  ;;  %v2548_v31 = vpop.eup %2547  ;;  %1600 = vadd.xlane.f32.xlu0 %v1599_v21  ;;  %1603 = vadd.xlane.f32.xlu1 %v1602_v54  ;;  %2549 = vpow2.f32 %v1518_v27  ;;  %v1568_v53 = vsel %vm5538_vm0, %v2546_v5, 0.0  ;;  %vm5546_vm0 = vcmp.ne.s32.totalorder %v3052_v18, %v3310_v47 }
 0x149   : > { %557 = vmax.xlane.f32.xlu2 %v556_v30  ;;  %2551 = vpow2.f32 %v1520_v29  ;;  %v1569_v54 = vsel %vm5537_vm11, %v2548_v31, 0.0  ;;  %5820 = vst [vmem:[#allocation69_spill] sm:$0xff] %v3310_v47  ;;  %vm5547_vm11 = vcmp.ne.s32.totalorder %v3039_v2, %v3310_v47 }
 0x14a   : > { %v1605_v5 = vadd.f32 %v1569_v54, %v1568_v53 }
 0x14b   : > { %v3301_v0 = vpop.xlane.xlu2 %448  ;;  %v1336_v8 = vpop.xlane.xlu0 %1335 }
 0x14c   : > { %5819 = vst [vmem:[#allocation68_spill] sm:$0xff] %v3301_v0  ;;  %vm5542_vm7 = vcmp.eq.f32.partialorder %v2898_v39, %v3301_v0  ;;  %vm5541_vm8 = vcmp.eq.f32.partialorder %v2900_v42, %v3301_v0  ;;  %v3317_v27 = vsub.f32 %v2894_v37, %v1336_v8  ;;  %v3320_v21 = vsub.f32 %v2896_v38, %v1336_v8 }
 0x14d   : > { %v3326_v31 = vsel %vm5542_vm7, -inf, %v2898_v39  ;;  %v3332_v41 = vsel %vm5541_vm8, -inf, %v2900_v42  ;;  %v1404_v8 = vadd.s32 56, %v3045_v46 }
 0x14e   : > { %5821 = vst [vmem:[#allocation70_spill] sm:$0xff] %v3317_v27  ;;  %v1522_v29 = vmul.f32 1.442695, %v3317_v27  ;;  %v1524_v37 = vmul.f32 1.442695, %v3320_v21  ;;  %v559_v38 = vmax.f32 %v3326_v31, %v3332_v41  ;;  %v2550_v30 = vpop.eup %2549 }
 0x14f   : > { %5822 = vst [vmem:[#allocation71_spill] sm:$0xff] %v3320_v21  ;;  %v2552_v1 = vpop.eup %2551  ;;  %v1570_v53 = vsel %vm5547_vm11, %v2550_v30, 0.0 }
 0x150   : > { %5823 = vst [vmem:[#allocation72_spill] sm:$0xff] %v3332_v41  ;;  %560 = vmax.xlane.f32.xlu0 %v559_v38  ;;  %2553 = vpow2.f32 %v1522_v29  ;;  %v1571_v54 = vsel %vm5546_vm0, %v2552_v1, 0.0  ;;  %v3352_v38 = vadd.s32 %v3047_v59, %v1404_v8 }
 0x151   : > { %1606 = vadd.xlane.f32.xlu2 %v1605_v5  ;;  %2555 = vpow2.f32 %v1524_v37  ;;  %v1608_v8 = vadd.f32 %v1571_v54, %v1570_v53 }
 0x152   : > { %5825 = vst [vmem:[#allocation74_spill] sm:$0xff] %v3352_v38  ;;  %vm5557_vm0 = vcmp.ne.s32.totalorder %v3039_v2, %v3352_v38  ;;  %vm5556_vm11 = vcmp.ne.s32.totalorder %v3052_v18, %v3352_v38  ;;  %v1406_v38 = vadd.s32 72, %v3045_v46 }
 0x153   : > { %v3343_v27 = vpop.xlane.xlu0 %451  ;;  %v1339_v21 = vpop.xlane.xlu1 %1338 }
 0x154   : > { %5824 = vst [vmem:[#allocation73_spill] sm:$0xff] %v3343_v27  ;;  %vm5550_vm8 = vcmp.eq.f32.partialorder %v2910_v57, %v3343_v27  ;;  %vm5549_vm7 = vcmp.eq.f32.partialorder %v2912_v58, %v3343_v27  ;;  %v3359_v29 = vsub.f32 %v2906_v51, %v1339_v21  ;;  %v3362_v37 = vsub.f32 %v2908_v52, %v1339_v21 }
 0x155   : > { %v3368_v1 = vsel %vm5550_vm8, -inf, %v2910_v57  ;;  %v3374_v30 = vsel %vm5549_vm7, -inf, %v2912_v58  ;;  %v5871_v58 = vld [vmem:[#allocation35_spill] sm:$0xff] }
 0x156   : > { %5826 = vst [vmem:[#allocation75_spill] sm:$0xff] %v3359_v29  ;;  %v1526_v5 = vmul.f32 1.442695, %v3359_v29  ;;  %v1528_v51 = vmul.f32 1.442695, %v3362_v37  ;;  %v562_v52 = vmax.f32 %v3368_v1, %v3374_v30  ;;  %v2554_v21 = vpop.eup %2553 }
 0x157   : > { %5827 = vst [vmem:[#allocation76_spill] sm:$0xff] %v3362_v37  ;;  %v2556_v50 = vpop.eup %2555  ;;  %v1572_v54 = vsel %vm5557_vm0, %v2554_v21, 0.0 }
 0x158   : > { %5828 = vst [vmem:[#allocation77_spill] sm:$0xff] %v3374_v30  ;;  %1609 = vadd.xlane.f32.xlu0 %v1608_v8  ;;  %563 = vmax.xlane.f32.xlu1 %v562_v52  ;;  %2557 = vpow2.f32 %v1526_v5  ;;  %v1573_v8 = vsel %vm5556_vm11, %v2556_v50, 0.0  ;;  %v3394_v52 = vadd.s32 %v3047_v59, %v1405_v23 }
 0x159   : > { %2559 = vpow2.f32 %v1528_v51  ;;  %v1611_v37 = vadd.f32 %v1573_v8, %v1572_v54 }
 0x15a   : > { %5830 = vst [vmem:[#allocation79_spill] sm:$0xff] %v3394_v52  ;;  %vm5566_vm11 = vcmp.ne.s32.totalorder %v3039_v2, %v3394_v52  ;;  %vm5565_vm0 = vcmp.ne.s32.totalorder %v3052_v18, %v3394_v52  ;;  %v1407_v52 = vadd.s32 80, %v3045_v46 }
 0x15b   : > { %v3385_v29 = vpop.xlane.xlu1 %454  ;;  %v1342_v53 = vpop.xlane.xlu2 %1341 }
 0x15c   : > { %5829 = vst [vmem:[#allocation78_spill] sm:$0xff] %v3385_v29  ;;  %vm5560_vm7 = vcmp.eq.f32.partialorder %v2922_v7, %v3385_v29  ;;  %vm5559_vm8 = vcmp.eq.f32.partialorder %v2924_v10, %v3385_v29  ;;  %v3401_v5 = vsub.f32 %v2918_v3, %v1342_v53  ;;  %v3404_v51 = vsub.f32 %v2920_v6, %v1342_v53 }
 0x15d   : > { %v3410_v50 = vsel %vm5560_vm7, -inf, %v2922_v7  ;;  %v3416_v23 = vsel %vm5559_vm8, -inf, %v2924_v10 }
 0x15e   : > { %5831 = vst [vmem:[#allocation80_spill] sm:$0xff] %v3401_v5  ;;  %v1530_v21 = vmul.f32 1.442695, %v3401_v5  ;;  %v1532_v3 = vmul.f32 1.442695, %v3404_v51  ;;  %v565_v6 = vmax.f32 %v3410_v50, %v3416_v23  ;;  %v2558_v53 = vpop.eup %2557 }
 0x15f   : > { %5832 = vst [vmem:[#allocation81_spill] sm:$0xff] %v3404_v51  ;;  %v2560_v47 = vpop.eup %2559  ;;  %v1574_v8 = vsel %vm5566_vm11, %v2558_v53, 0.0 }
 0x160   : > { %5833 = vst [vmem:[#allocation82_spill] sm:$0xff] %v3416_v23  ;;  %1612 = vadd.xlane.f32.xlu1 %v1611_v37  ;;  %566 = vmax.xlane.f32.xlu2 %v565_v6  ;;  %2561 = vpow2.f32 %v1530_v21  ;;  %v1575_v37 = vsel %vm5565_vm0, %v2560_v47, 0.0  ;;  %v3436_v6 = vadd.s32 %v3047_v59, %v1406_v38 }
 0x161   : > { %2563 = vpow2.f32 %v1532_v3 }
 0x162   : > { %5835 = vst [vmem:[#allocation84_spill] sm:$0xff] %v3436_v6  ;;  %vm5575_vm0 = vcmp.ne.s32.totalorder %v3039_v2, %v3436_v6  ;;  %vm5574_vm11 = vcmp.ne.s32.totalorder %v3052_v18, %v3436_v6  ;;  %v1408_v6 = vadd.s32 88, %v3045_v46 }
 0x163   : > { %v3427_v5 = vpop.xlane.xlu2 %457  ;;  %v1345_v54 = vpop.xlane.xlu0 %1344 }
 0x164   : > { %5834 = vst [vmem:[#allocation83_spill] sm:$0xff] %v3427_v5  ;;  %vm5570_vm8 = vcmp.eq.f32.partialorder %v2934_v25, %v3427_v5  ;;  %vm5569_vm7 = vcmp.eq.f32.partialorder %v2936_v26, %v3427_v5  ;;  %v3443_v21 = vsub.f32 %v2930_v19, %v1345_v54  ;;  %v3446_v3 = vsub.f32 %v2932_v24, %v1345_v54 }
 0x165   : > { %v3452_v47 = vsel %vm5570_vm8, -inf, %v2934_v25  ;;  %v3458_v38 = vsel %vm5569_vm7, -inf, %v2936_v26  ;;  %v1614_v54 = vadd.f32 %v1575_v37, %v1574_v8 }
 0x166   : > { %5836 = vst [vmem:[#allocation85_spill] sm:$0xff] %v3443_v21  ;;  %v1534_v53 = vmul.f32 1.442695, %v3443_v21  ;;  %v1536_v19 = vmul.f32 1.442695, %v3446_v3  ;;  %v568_v24 = vmax.f32 %v3452_v47, %v3458_v38  ;;  %v2562_v51 = vpop.eup %2561 }
 0x167   : > { %5837 = vst [vmem:[#allocation86_spill] sm:$0xff] %v3446_v3  ;;  %v2564_v10 = vpop.eup %2563  ;;  %v1576_v8 = vsel %vm5575_vm0, %v2562_v51, 0.0 }
 0x168   : > { %5838 = vst [vmem:[#allocation87_spill] sm:$0xff] %v3458_v38  ;;  %569 = vmax.xlane.f32.xlu0 %v568_v24  ;;  %1615 = vadd.xlane.f32.xlu2 %v1614_v54  ;;  %2565 = vpow2.f32 %v1534_v53  ;;  %v1577_v37 = vsel %vm5574_vm11, %v2564_v10, 0.0  ;;  %v3478_v24 = vadd.s32 %v3047_v59, %v1407_v52 }
 0x169   : > { %2567 = vpow2.f32 %v1536_v19  ;;  %v1617_v54 = vadd.f32 %v1577_v37, %v1576_v8 }
 0x16a   : > { %5840 = vst [vmem:[#allocation89_spill] sm:$0xff] %v3478_v24  ;;  %vm5586_vm11 = vcmp.ne.s32.totalorder %v3039_v2, %v3478_v24  ;;  %vm5585_vm0 = vcmp.ne.s32.totalorder %v3052_v18, %v3478_v24 }
 0x16b   : > { %v3469_v21 = vpop.xlane.xlu0 %460  ;;  %v1348_v3 = vpop.xlane.xlu1 %1347 }
 0x16c   : > { %5839 = vst [vmem:[#allocation88_spill] sm:$0xff] %v3469_v21  ;;  %vm5578_vm7 = vcmp.eq.f32.partialorder %v2946_v43, %v3469_v21  ;;  %vm5577_vm8 = vcmp.eq.f32.partialorder %v2948_v44, %v3469_v21  ;;  %v3485_v53 = vsub.f32 %v2942_v35, %v1348_v3  ;;  %v3488_v19 = vsub.f32 %v2944_v36, %v1348_v3 }
 0x16d   : > { %v3494_v10 = vsel %vm5578_vm7, -inf, %v2946_v43  ;;  %v3500_v52 = vsel %vm5577_vm8, -inf, %v2948_v44  ;;  %v1409_v44 = vadd.s32 96, %v3045_v46 }
 0x16e   : > { %5841 = vst [vmem:[#allocation90_spill] sm:$0xff] %v3485_v53  ;;  %v1538_v51 = vmul.f32 1.442695, %v3485_v53  ;;  %v1540_v35 = vmul.f32 1.442695, %v3488_v19  ;;  %v571_v36 = vmax.f32 %v3494_v10, %v3500_v52  ;;  %v2566_v3 = vpop.eup %2565 }
 0x16f   : > { %5842 = vst [vmem:[#allocation91_spill] sm:$0xff] %v3488_v19  ;;  %v2568_v26 = vpop.eup %2567  ;;  %v1578_v37 = vsel %vm5586_vm11, %v2566_v3, 0.0 }
 0x170   : > { %5843 = vst [vmem:[#allocation92_spill] sm:$0xff] %v3500_v52  ;;  %1618 = vadd.xlane.f32.xlu0 %v1617_v54  ;;  %572 = vmax.xlane.f32.xlu1 %v571_v36  ;;  %2569 = vpow2.f32 %v1538_v51  ;;  %v1579_v54 = vsel %vm5585_vm0, %v2568_v26, 0.0  ;;  %v3520_v36 = vadd.s32 %v3047_v59, %v1408_v6 }
 0x171   : > { %2571 = vpow2.f32 %v1540_v35  ;;  %v5847_v35 = vld [vmem:[#allocation23_spill] sm:$0xff]  ;;  %v1620_v24 = vadd.f32 %v1579_v54, %v1578_v37 }
 0x172   : > { %5845 = vst [vmem:[#allocation94_spill] sm:$0xff] %v3520_v36  ;;  %vm5601_vm0 = vcmp.ne.s32.totalorder %v3039_v2, %v3520_v36  ;;  %vm5600_vm11 = vcmp.ne.s32.totalorder %v3052_v18, %v3520_v36 }
 0x173   : > { %v3511_v53 = vpop.xlane.xlu1 %463  ;;  %v1351_v8 = vpop.xlane.xlu2 %1350 }
 0x174   : > { %5844 = vst [vmem:[#allocation93_spill] sm:$0xff] %v3511_v53  ;;  %vm5590_vm8 = vcmp.eq.f32.partialorder %v2958_v11, %v3511_v53  ;;  %vm5589_vm7 = vcmp.eq.f32.partialorder %v2960_v16, %v3511_v53  ;;  %v3527_v51 = vsub.f32 %v2954_v63, %v1351_v8  ;;  %v3530_v19 = vsub.f32 %v5847_v35, %v1351_v8  ;;  %v5856_v53 = vld [vmem:[#allocation27_spill] sm:$0xff] }
 0x175   : > { %v3536_v26 = vsel %vm5590_vm8, -inf, %v2958_v11  ;;  %v3542_v6 = vsel %vm5589_vm7, -inf, %v2960_v16 }
 0x176   : > { %5846 = vst [vmem:[#allocation95_spill] sm:$0xff] %v3527_v51  ;;  %v1542_v3 = vmul.f32 1.442695, %v3527_v51  ;;  %v1544_v63 = vmul.f32 1.442695, %v3530_v19  ;;  %v574_v8 = vmax.f32 %v3536_v26, %v3542_v6  ;;  %v2570_v35 = vpop.eup %2569 }
 0x177   : > { %5848 = vst [vmem:[#allocation23_spill] sm:$0xff] %v3530_v19  ;;  %v2572_v21 = vpop.eup %2571  ;;  %v1580_v54 = vsel %vm5601_vm0, %v2570_v35, 0.0  ;;  %v5852_v19 = vld [vmem:[#allocation28_spill] sm:$0xff]  ;;  %v1410_v35 = vadd.s32 104, %v3045_v46 }
 0x178   : > { %5849 = vst [vmem:[#allocation96_spill] sm:$0xff] %v3542_v6  ;;  %1621 = vadd.xlane.f32.xlu1 %v1620_v24  ;;  %575 = vmax.xlane.f32.xlu2 %v574_v8  ;;  %2573 = vpow2.f32 %v1542_v3  ;;  %v1581_v24 = vsel %vm5600_vm11, %v2572_v21, 0.0  ;;  %v3562_v8 = vadd.s32 %v3047_v59, %v1409_v44  ;;  %v5853_v3 = vld [vmem:[#allocation29_spill] sm:$0xff] }
 0x179   : > { %2575 = vpow2.f32 %v1544_v63  ;;  %v5854_v63 = vld [vmem:[#allocation26_spill] sm:$0xff] }
 0x17a   : > { %5851 = vst [vmem:[#allocation98_spill] sm:$0xff] %v3562_v8  ;;  %vm5608_vm11 = vcmp.ne.s32.totalorder %v3039_v2, %v3562_v8  ;;  %vm5618_vm0 = vcmp.ne.s32.totalorder %v3052_v18, %v3562_v8 }
 0x17b   : > { %v3553_v51 = vpop.xlane.xlu2 %466  ;;  %v1354_v37 = vpop.xlane.xlu0 %1353 }
 0x17c   : > { %5850 = vst [vmem:[#allocation97_spill] sm:$0xff] %v3553_v51  ;;  %vm5606_vm7 = vcmp.eq.f32.partialorder %v5852_v19, %v3553_v51  ;;  %vm5605_vm8 = vcmp.eq.f32.partialorder %v5853_v3, %v3553_v51  ;;  %v3569_v16 = vsub.f32 %v5854_v63, %v1354_v37  ;;  %v3572_v11 = vsub.f32 %v5856_v53, %v1354_v37 }
 0x17d   : > { %v3578_v21 = vsel %vm5606_vm7, -inf, %v5852_v19  ;;  %v3584_v44 = vsel %vm5605_vm8, -inf, %v5853_v3  ;;  %v1623_v37 = vadd.f32 %v1581_v24, %v1580_v54  ;;  %v5862_v54 = vld [vmem:[#allocation32_spill] sm:$0xff] }
 0x17e   : > { %5855 = vst [vmem:[#allocation26_spill] sm:$0xff] %v3569_v16  ;;  %v1546_v63 = vmul.f32 1.442695, %v3569_v16  ;;  %v1548_v36 = vmul.f32 1.442695, %v3572_v11  ;;  %v577_v53 = vmax.f32 %v3578_v21, %v3584_v44  ;;  %v2574_v43 = vpop.eup %2573  ;;  %v5861_v16 = vld [vmem:[#allocation31_spill] sm:$0xff] }
 0x17f   : > { %5857 = vst [vmem:[#allocation27_spill] sm:$0xff] %v3572_v11  ;;  %v2576_v5 = vpop.eup %2575  ;;  %v3598_v11 = vadd.s32 %v3047_v59, %v1410_v35 }
 0x180   : > { %5858 = vst [vmem:[#allocation99_spill] sm:$0xff] %v3578_v21  ;;  %2577 = vpow2.f32 %v1546_v63  ;;  %578 = vmax.xlane.f32.xlu0 %v577_v53  ;;  %1624 = vadd.xlane.f32.xlu2 %v1623_v37  ;;  %v1582_v63 = vsel %vm5608_vm11, %v2574_v43, 0.0  ;;  %v5864_v37 = vld [vmem:[#allocation33_spill] sm:$0xff]  ;;  %v5865_v43 = vld [vmem:[#allocation34_spill] sm:$0xff] }
 0x181   : > { %5859 = vst [vmem:[#allocation100_spill] sm:$0xff] %v3584_v44  ;;  %2579 = vpow2.f32 %v1548_v36  ;;  %v1583_v36 = vsel %vm5618_vm0, %v2576_v5, 0.0  ;;  %vm5637_vm0 = vcmp.ne.s32.totalorder %v3039_v2, %v3598_v11 }
 0x182   : > { %v3595_v3 = vpop.xlane.xlu1 %536  ;;  %5860 = vst [vmem:[#allocation101_spill] sm:$0xff] %v3598_v11  ;;  %v1626_v25 = vadd.f32 %v1583_v36, %v1582_v63 }
 0x183   : > { %vm583_vm8 = vcmp.eq.f32.partialorder %v5861_v16, %v3595_v3  ;;  %vm584_vm7 = vcmp.eq.f32.partialorder %v5862_v54, %v3595_v3  ;;  %v3604_v24 = vpop.xlane.xlu0 %469 }
 0x184   : > { %5863 = vst [vmem:[#allocation31_spill] sm:$0xff] %v3604_v24  ;;  %v3616_v35 = vsel %vm583_vm8, -inf, %v5861_v16  ;;  %v3622_v53 = vsel %vm584_vm7, -inf, %v5862_v54  ;;  %vm5619_vm12 = vcmp.eq.f32.partialorder %v5864_v37, %v3604_v24  ;;  %vm5624_vm11 = vcmp.eq.f32.partialorder %v5865_v43, %v3604_v24 }
 0x185   : > { %v3632_v5 = vsel %vm5619_vm12, -inf, %v5864_v37  ;;  %v3638_v8 = vsel %vm5624_vm11, -inf, %v5865_v43  ;;  %v679_v51 = vmax.f32 %v3616_v35, %v3622_v53  ;;  %vm5635_vm12 = vcmp.ne.s32.totalorder %v3052_v18, %v3598_v11 }
 0x186   : > { %5866 = vst [vmem:[#allocation32_spill] sm:$0xff] %v3632_v5  ;;  %v2578_v19 = vpop.eup %2577  ;;  %v580_v29 = vmax.f32 %v3632_v5, %v3638_v8  ;;  %v1411_v37 = vadd.s32 112, %v3045_v46  ;;  %v5939_v16 = vmov 0 }
 0x187   : > { %5867 = vst [vmem:[#allocation102_spill] sm:$0xff] %v3638_v8  ;;  %v2580_v7 = vpop.eup %2579  ;;  %v1584_v63 = vsel %vm5637_vm0, %v2578_v19, 0.0 }
 0x188   : > { %1627 = vadd.xlane.f32.xlu0 %v1626_v25  ;;  %581 = vmax.xlane.f32.xlu1 %v580_v29  ;;  %v1585_v36 = vsel %vm5635_vm12, %v2580_v7, 0.0  ;;  %v5868_v25 = vld [vmem:[#allocation38_spill] sm:$0xff]  ;;  %v5869_v29 = vld [vmem:[#allocation36_spill] sm:$0xff]  ;;  %v3684_v57 = vadd.s32 %v3047_v59, %v1411_v37  ;;  %v5874_v37 = vld [vmem:[#allocation43_spill] sm:$0xff] }
 0x189   : > { %680 = vmax.xlane.f32.xlu2 %v679_v51 }
 0x18a   : > { %v3648_v43 = vpop.xlane.xlu2 %539  ;;  %v1357_v24 = vpop.xlane.xlu1 %1356  ;;  %5873 = vst [vmem:[#allocation35_spill] sm:$0xff] %v3684_v57  ;;  %vm5646_vm12 = vcmp.ne.s32.totalorder %v3039_v2, %v3684_v57  ;;  %vm5648_vm13 = vcmp.ne.s32.totalorder %v3052_v18, %v3684_v57 }
 0x18b   : > { %vm585_vm11 = vcmp.eq.f32.partialorder %v3020_v33, %v3648_v43  ;;  %vm586_vm15 = vcmp.eq.f32.partialorder %v5868_v25, %v3648_v43  ;;  %v3662_v51 = vsub.f32 %v5869_v29, %v1357_v24  ;;  %v3665_v27 = vsub.f32 %v5871_v58, %v1357_v24 }
 0x18c   : > { %v3671_v19 = vsel %vm585_vm11, -inf, %v3020_v33  ;;  %v3677_v7 = vsel %vm586_vm15, -inf, %v5868_v25  ;;  %v1629_v24 = vadd.f32 %v1585_v36, %v1584_v63 }
 0x18d   : > { %5870 = vst [vmem:[#allocation38_spill] sm:$0xff] %v3662_v51  ;;  %v1550_v11 = vmul.f32 1.442695, %v3662_v51  ;;  %v1552_v29 = vmul.f32 1.442695, %v3665_v27  ;;  %v682_v58 = vmax.f32 %v3671_v19, %v3677_v7  ;;  %v1412_v51 = vadd.s32 120, %v3045_v46 }
 0x18e   : > { %5872 = vst [vmem:[#allocation36_spill] sm:$0xff] %v3665_v27 }
 0x18f   : > { %2581 = vpow2.f32 %v1550_v11  ;;  %v5876_v11 = vld [vmem:[#allocation42_spill] sm:$0xff]  ;;  %v3726_v32 = vadd.s32 %v3047_v59, %v1412_v51 }
 0x190   : > { %2583 = vpow2.f32 %v1552_v29  ;;  %683 = vmax.xlane.f32.xlu0 %v682_v58  ;;  %1630 = vadd.xlane.f32.xlu1 %v1629_v24 }
 0x191   : > { %5878 = vst [vmem:[#allocation103_spill] sm:$0xff] %v3726_v32  ;;  %vm5654_vm9 = vcmp.ne.s32.totalorder %v3039_v2, %v3726_v32 }
 0x192   : > { %v3686_v42 = vpop.xlane.xlu0 %542  ;;  %v1360_v0 = vpop.xlane.xlu2 %1359 }
 0x193   : > { %vm587_vm0 = vcmp.eq.f32.partialorder %v3068_v34, %v3686_v42  ;;  %vm588_vm14 = vcmp.eq.f32.partialorder %v3074_v49, %v3686_v42  ;;  %v3696_v63 = vsub.f32 %v5874_v37, %v1360_v0  ;;  %v3699_v36 = vsub.f32 %v5876_v11, %v1360_v0 }
 0x194   : > { %v3705_v29 = vsel %vm587_vm0, -inf, %v3068_v34  ;;  %v3711_v46 = vsel %vm588_vm14, -inf, %v3074_v49 }
 0x195   : > { %5875 = vst [vmem:[#allocation43_spill] sm:$0xff] %v3696_v63  ;;  %v2582_v58 = vpop.eup %2581  ;;  %v1554_v24 = vmul.f32 1.442695, %v3696_v63  ;;  %v1556_v0 = vmul.f32 1.442695, %v3699_v36  ;;  %v685_v37 = vmax.f32 %v3705_v29, %v3711_v46 }
 0x196   : > { %5877 = vst [vmem:[#allocation42_spill] sm:$0xff] %v3699_v36  ;;  %v2584_v11 = vpop.eup %2583  ;;  %v1586_v27 = vsel %vm5646_vm12, %v2582_v58, 0.0 }
 0x197   : > { %2585 = vpow2.f32 %v1554_v24  ;;  %v1587_v39 = vsel %vm5648_vm13, %v2584_v11, 0.0  ;;  %vm5653_vm13 = vcmp.ne.s32.totalorder %v3052_v18, %v3726_v32 }
 0x198   : > { %2587 = vpow2.f32 %v1556_v0  ;;  %686 = vmax.xlane.f32.xlu1 %v685_v37  ;;  %v1632_v63 = vadd.f32 %v1587_v39, %v1586_v27 }
 0x19a   : > { %1633 = vadd.xlane.f32.xlu2 %v1632_v63  ;;  %v3728_v36 = vpop.xlane.xlu1 %545 }
 0x19b   : > { %vm5650_vm10 = vcmp.eq.f32.partialorder %v3110_v55, %v3728_v36  ;;  %vm5649_vm12 = vcmp.eq.f32.partialorder %v3116_v48, %v3728_v36 }
 0x19c   : > { %v3742_v39 = vsel %vm5650_vm10, -inf, %v3110_v55  ;;  %v3748_v27 = vsel %vm5649_vm12, -inf, %v3116_v48 }
 0x19d   : > { %v2586_v59 = vpop.eup %2585  ;;  %v688_v24 = vmax.f32 %v3742_v39, %v3748_v27 }
 0x19e   : > { %v2588_v51 = vpop.eup %2587  ;;  %v1588_v63 = vsel %vm5654_vm9, %v2586_v59, 0.0 }
 0x19f   : > { %v1589_v58 = vsel %vm5653_vm13, %v2588_v51, 0.0 }
 0x1a0   : > { %v1635_v0 = vadd.f32 %v1589_v58, %v1588_v63  ;;  %v3778_v63 = vpop.xlane.xlu0 %1591 }
 0x1a1   : > { %5879 = vst [vmem:[#allocation104_spill] sm:$0xff] %v3778_v63 }
 0x1a2   : > { %689 = vmax.xlane.f32.xlu2 %v688_v24  ;;  %1636 = vadd.xlane.f32.xlu0 %v1635_v0  ;;  %v3758_v37 = vpop.xlane.xlu2 %548  ;;  %v3780_v58 = vpop.xlane.xlu1 %1594 }
 0x1a3   : > { %vm5656_vm12 = vcmp.eq.f32.partialorder %v3147_v60, %v3758_v37  ;;  %vm5655_vm10 = vcmp.eq.f32.partialorder %v3153_v28, %v3758_v37  ;;  %5880 = vst [vmem:[#allocation105_spill] sm:$0xff] %v3780_v58 }
 0x1a4   : > { %v3768_v11 = vsel %vm5656_vm12, -inf, %v3147_v60  ;;  %v3774_v59 = vsel %vm5655_vm10, -inf, %v3153_v28 }
 0x1a5   : > { %v691_v51 = vmax.f32 %v3768_v11, %v3774_v59 }
 0x1aa   : > { %692 = vmax.xlane.f32.xlu0 %v691_v51 }
 0x1ad   : > { %v3786_v32 = vpop.xlane.xlu2 %1597 }
 0x1ae   : > { %5881 = vst [vmem:[#allocation106_spill] sm:$0xff] %v3786_v32 }
 0x1b3   : > { %v3782_v24 = vpop.xlane.xlu0 %551  ;;  %v3784_v0 = vpop.xlane.xlu1 %554 }
 0x1b4   : > { %vm5727_vm13 = vcmp.eq.f32.partialorder %v3208_v4, %v3782_v24  ;;  %vm5666_vm9 = vcmp.eq.f32.partialorder %v3214_v9, %v3782_v24  ;;  %vm5665_vm10 = vcmp.eq.f32.partialorder %v3224_v12, %v3784_v0  ;;  %vm5671_vm12 = vcmp.eq.f32.partialorder %v3230_v13, %v3784_v0 }
 0x1b5   : > { %v3800_v51 = vsel %vm5727_vm13, -inf, %v3208_v4  ;;  %v3806_v32 = vsel %vm5666_vm9, -inf, %v3214_v9  ;;  %v3812_v58 = vsel %vm5665_vm10, -inf, %v3224_v12  ;;  %v3818_v63 = vsel %vm5671_vm12, -inf, %v3230_v13 }
 0x1b6   : > { %5882 = vst [vmem:[#allocation107_spill] sm:$0xff] %v3806_v32  ;;  %v694_v57 = vmax.f32 %v3800_v51, %v3806_v32  ;;  %v697_v18 = vmax.f32 %v3812_v58, %v3818_v63 }
 0x1b7   : > { %5883 = vst [vmem:[#allocation108_spill] sm:$0xff] %v3818_v63 }
 0x1b8   : > { %695 = vmax.xlane.f32.xlu1 %v694_v57  ;;  %698 = vmax.xlane.f32.xlu2 %v697_v18 }
 0x1bb   : > { %v3824_v2 = vpop.xlane.xlu0 %1600 }
 0x1bc   : > { %5884 = vst [vmem:[#allocation109_spill] sm:$0xff] %v3824_v2  ;;  %v3826_v45 = vpop.xlane.xlu2 %557  ;;  %v3846_v2 = vpop.xlane.xlu1 %1603 }
 0x1bd   : > { %vm5672_vm10 = vcmp.eq.f32.partialorder %v3284_v62, %v3826_v45  ;;  %vm5678_vm9 = vcmp.eq.f32.partialorder %v3290_v20, %v3826_v45  ;;  %5887 = vst [vmem:[#allocation112_spill] sm:$0xff] %v3846_v2 }
 0x1be   : > { %v3836_v32 = vsel %vm5672_vm10, -inf, %v3284_v62  ;;  %v3842_v57 = vsel %vm5678_vm9, -inf, %v3290_v20 }
 0x1bf   : > { %5885 = vst [vmem:[#allocation110_spill] sm:$0xff] %v3836_v32  ;;  %v700_v18 = vmax.f32 %v3836_v32, %v3842_v57 }
 0x1c0   : > { %5886 = vst [vmem:[#allocation111_spill] sm:$0xff] %v3842_v57 }
 0x1c1   : > { %701 = vmax.xlane.f32.xlu0 %v700_v18 }
 0x1c3   : > { %v3848_v63 = vpop.xlane.xlu0 %560 }
 0x1c4   : > { %vm5679_vm12 = vcmp.eq.f32.partialorder %v3326_v31, %v3848_v63  ;;  %vm5685_vm10 = vcmp.eq.f32.partialorder %v3332_v41, %v3848_v63  ;;  %v3868_v57 = vpop.xlane.xlu2 %1606 }
 0x1c5   : > { %v3858_v20 = vsel %vm5679_vm12, -inf, %v3326_v31  ;;  %v3864_v18 = vsel %vm5685_vm10, -inf, %v3332_v41  ;;  %5890 = vst [vmem:[#allocation115_spill] sm:$0xff] %v3868_v57 }
 0x1c6   : > { %5888 = vst [vmem:[#allocation113_spill] sm:$0xff] %v3858_v20  ;;  %v703_v2 = vmax.f32 %v3858_v20, %v3864_v18 }
 0x1c7   : > { %5889 = vst [vmem:[#allocation114_spill] sm:$0xff] %v3864_v18 }
 0x1c8   : > { %704 = vmax.xlane.f32.xlu1 %v703_v2 }
 0x1cb   : > { %v3870_v32 = vpop.xlane.xlu1 %563  ;;  %v3890_v18 = vpop.xlane.xlu0 %1609 }
 0x1cc   : > { %vm5686_vm9 = vcmp.eq.f32.partialorder %v3368_v1, %v3870_v32  ;;  %vm5692_vm12 = vcmp.eq.f32.partialorder %v3374_v30, %v3870_v32  ;;  %5893 = vst [vmem:[#allocation118_spill] sm:$0xff] %v3890_v18 }
 0x1cd   : > { %v3880_v41 = vsel %vm5686_vm9, -inf, %v3368_v1  ;;  %v3886_v2 = vsel %vm5692_vm12, -inf, %v3374_v30 }
 0x1ce   : > { %5891 = vst [vmem:[#allocation116_spill] sm:$0xff] %v3880_v41  ;;  %v706_v57 = vmax.f32 %v3880_v41, %v3886_v2 }
 0x1cf   : > { %5892 = vst [vmem:[#allocation117_spill] sm:$0xff] %v3886_v2 }
 0x1d0   : > { %707 = vmax.xlane.f32.xlu2 %v706_v57 }
 0x1d3   : > { %v3892_v20 = vpop.xlane.xlu2 %566  ;;  %v3912_v2 = vpop.xlane.xlu1 %1612 }
 0x1d4   : > { %vm5693_vm10 = vcmp.eq.f32.partialorder %v3410_v50, %v3892_v20  ;;  %vm5699_vm9 = vcmp.eq.f32.partialorder %v3416_v23, %v3892_v20  ;;  %5896 = vst [vmem:[#allocation121_spill] sm:$0xff] %v3912_v2 }
 0x1d5   : > { %v3902_v30 = vsel %vm5693_vm10, -inf, %v3410_v50  ;;  %v3908_v57 = vsel %vm5699_vm9, -inf, %v3416_v23 }
 0x1d6   : > { %5894 = vst [vmem:[#allocation119_spill] sm:$0xff] %v3902_v30  ;;  %v709_v18 = vmax.f32 %v3902_v30, %v3908_v57 }
 0x1d7   : > { %5895 = vst [vmem:[#allocation120_spill] sm:$0xff] %v3908_v57 }
 0x1d8   : > { %710 = vmax.xlane.f32.xlu0 %v709_v18 }
 0x1db   : > { %v3914_v41 = vpop.xlane.xlu0 %569  ;;  %v3934_v57 = vpop.xlane.xlu2 %1615 }
 0x1dc   : > { %vm5700_vm12 = vcmp.eq.f32.partialorder %v3452_v47, %v3914_v41  ;;  %vm5706_vm10 = vcmp.eq.f32.partialorder %v3458_v38, %v3914_v41  ;;  %5899 = vst [vmem:[#allocation124_spill] sm:$0xff] %v3934_v57 }
 0x1dd   : > { %v3924_v23 = vsel %vm5700_vm12, -inf, %v3452_v47  ;;  %v3930_v18 = vsel %vm5706_vm10, -inf, %v3458_v38 }
 0x1de   : > { %5897 = vst [vmem:[#allocation122_spill] sm:$0xff] %v3924_v23  ;;  %v712_v2 = vmax.f32 %v3924_v23, %v3930_v18 }
 0x1df   : > { %5898 = vst [vmem:[#allocation123_spill] sm:$0xff] %v3930_v18 }
 0x1e0   : > { %713 = vmax.xlane.f32.xlu1 %v712_v2 }
 0x1e3   : > { %v3936_v30 = vpop.xlane.xlu1 %572  ;;  %v3956_v18 = vpop.xlane.xlu0 %1618 }
 0x1e4   : > { %5900 = vst [vmem:[#allocation125_spill] sm:$0xff] %v3936_v30  ;;  %vm5707_vm9 = vcmp.eq.f32.partialorder %v3494_v10, %v3936_v30  ;;  %vm5716_vm12 = vcmp.eq.f32.partialorder %v3500_v52, %v3936_v30 }
 0x1e5   : > { %v3946_v38 = vsel %vm5707_vm9, -inf, %v3494_v10  ;;  %v3952_v2 = vsel %vm5716_vm12, -inf, %v3500_v52  ;;  %5903 = vst [vmem:[#allocation128_spill] sm:$0xff] %v3956_v18 }
 0x1e6   : > { %5901 = vst [vmem:[#allocation126_spill] sm:$0xff] %v3946_v38  ;;  %v715_v57 = vmax.f32 %v3946_v38, %v3952_v2 }
 0x1e7   : > { %5902 = vst [vmem:[#allocation127_spill] sm:$0xff] %v3952_v2 }
 0x1e8   : > { %716 = vmax.xlane.f32.xlu2 %v715_v57 }
 0x1eb   : > { %v3958_v23 = vpop.xlane.xlu2 %575  ;;  %v3978_v2 = vpop.xlane.xlu1 %1621 }
 0x1ec   : > { %vm5715_vm10 = vcmp.eq.f32.partialorder %v3536_v26, %v3958_v23  ;;  %vm5720_vm9 = vcmp.eq.f32.partialorder %v3542_v6, %v3958_v23  ;;  %5905 = vst [vmem:[#allocation130_spill] sm:$0xff] %v3978_v2 }
 0x1ed   : > { %v3968_v52 = vsel %vm5715_vm10, -inf, %v3536_v26  ;;  %v3974_v57 = vsel %vm5720_vm9, -inf, %v3542_v6 }
 0x1ee   : > { %5904 = vst [vmem:[#allocation129_spill] sm:$0xff] %v3974_v57  ;;  %v718_v18 = vmax.f32 %v3968_v52, %v3974_v57 }
 0x1f0   : > { %719 = vmax.xlane.f32.xlu0 %v718_v18 }
 0x1f3   : > { %v3980_v38 = vpop.xlane.xlu0 %578  ;;  %v3982_v30 = vpop.xlane.xlu2 %1624 }
 0x1f4   : > { %5906 = vst [vmem:[#allocation131_spill] sm:$0xff] %v3980_v38  ;;  %vm5721_vm10 = vcmp.eq.f32.partialorder %v3578_v21, %v3980_v38  ;;  %vm5726_vm12 = vcmp.eq.f32.partialorder %v3584_v44, %v3980_v38 }
 0x1f5   : > { %5907 = vst [vmem:[#allocation132_spill] sm:$0xff] %v3982_v30  ;;  %v3992_v6 = vsel %vm5721_vm10, -inf, %v3578_v21  ;;  %v3998_v18 = vsel %vm5726_vm12, -inf, %v3584_v44  ;;  %vm647_vm12 = vmor %vm471_vm1, %vm583_vm8 }
 0x1f6   : > { %v721_v30 = vmax.f32 %v3992_v6, %v3998_v18  ;;  %vm648_vm1 = vmor %vm472_vm2, %vm584_vm7 }
 0x1f7   : > { %vm649_vm2 = vmor %vm473_vm3, %vm585_vm11 }
 0x1f8   : > { %722 = vmax.xlane.f32.xlu1 %v721_v30 }
 0x1fb   : > { %v4002_v2 = vpop.xlane.xlu0 %1627  ;;  %v4004_v57 = vpop.xlane.xlu1 %581 }
 0x1fc   : > { %5908 = vst [vmem:[#allocation133_spill] sm:$0xff] %v4002_v2  ;;  %vm5734_vm9 = vcmp.eq.f32.partialorder %v3632_v5, %v4004_v57  ;;  %vm5733_vm10 = vcmp.eq.f32.partialorder %v3638_v8, %v4004_v57  ;;  %v681_v21 = vpop.xlane.xlu2 %680 }
 0x1fd   : > { %5909 = vst [vmem:[#allocation134_spill] sm:$0xff] %v4004_v57  ;;  %v4020_v30 = vsel %vm5734_vm9, -inf, %v3632_v5  ;;  %v4026_v2 = vsel %vm5733_vm10, -inf, %v3638_v8  ;;  %vm727_vm13 = vcmp.eq.f32.partialorder %v3616_v35, %v681_v21  ;;  %vm728_vm6 = vcmp.eq.f32.partialorder %v3622_v53, %v681_v21 }
 0x1fe   : > { %v4037_v44 = vsel %vm727_vm13, -inf, %v3616_v35  ;;  %v4040_v5 = vsel %vm728_vm6, -inf, %v3622_v53  ;;  %v724_v8 = vmax.f32 %v4020_v30, %v4026_v2  ;;  %vm4044_vm8 = vmor %vm647_vm12, %vm727_vm13  ;;  %vm5926_vm13 = vcmp.eq.f32.partialorder %v2828_v56, %v3049_v17  ;;  %v5933_v17 = vld [vmem:[#allocation48_spill] sm:$0xff] }
 0x1ff   : > { %v823_v3 = vmax.f32 %v4037_v44, %v4040_v5  ;;  %vm4050_vm10 = vmor %vm648_vm1, %vm728_vm6 }
 0x200   : > { %725 = vmax.xlane.f32.xlu2 %v724_v8  ;;  %vm650_vm6 = vmor %vm474_vm4, %vm586_vm15 }
 0x201   : > { %824 = vmax.xlane.f32.xlu0 %v823_v3  ;;  %vm651_vm4 = vmor %vm475_vm5, %vm587_vm0  ;;  %vm5934_vm0 = vcmp.eq.f32.partialorder %v2834_v61, %v5933_v17 }
 0x202   : > { %vm652_vm15 = vmor %vm5926_vm13, %vm588_vm14  ;;  %vm5932_vm14 = vcmp.eq.f32.partialorder %v3110_v55, %v3728_v36 }
 0x203   : > { %v684_v35 = vpop.xlane.xlu0 %683  ;;  %v4060_v53 = vpop.xlane.xlu1 %1630 }
 0x204   : > { %5919 = vst [vmem:[#allocation2_spill] sm:$0xff] %v4060_v53  ;;  %vm729_vm7 = vcmp.eq.f32.partialorder %v3671_v19, %v684_v35  ;;  %vm730_vm12 = vcmp.eq.f32.partialorder %v3677_v7, %v684_v35  ;;  %v6058_v53 = vld [vmem:[#allocation126_spill] sm:$0xff] }
 0x205   : > { %v4071_v33 = vsel %vm729_vm7, -inf, %v3671_v19  ;;  %v4074_v8 = vsel %vm730_vm12, -inf, %v3677_v7  ;;  %vm4076_vm3 = vmor %vm649_vm2, %vm729_vm7  ;;  %v5948_v19 = vld [vmem:[#allocation9_spill] sm:$0xff] }
 0x206   : > { %vm4080_vm11 = vmor %vm650_vm6, %vm730_vm12  ;;  %v826_v25 = vmax.f32 %v4071_v33, %v4074_v8  ;;  %vm5936_vm12 = vcmp.eq.f32.partialorder %v3116_v48, %v3728_v36  ;;  %v5941_v48 = vmov 0 }
 0x207   : > { %vm653_vm7 = vmor %vm5934_vm0, %vm5932_vm14  ;;  %vm5943_vm0 = vcmp.eq.f32.partialorder %v3147_v60, %v3758_v37 }
 0x208   : > { %827 = vmax.xlane.f32.xlu1 %v826_v25  ;;  %v5945_v25 = vld [vmem:[#allocation50_spill] sm:$0xff] }
 0x20b   : > { %v687_v7 = vpop.xlane.xlu1 %686 }
 0x20c   : > { %vm731_vm1 = vcmp.eq.f32.partialorder %v3705_v29, %v687_v7  ;;  %vm732_vm2 = vcmp.eq.f32.partialorder %v3711_v46, %v687_v7 }
 0x20d   : > { %v4101_v38 = vsel %vm731_vm1, -inf, %v3705_v29  ;;  %v4104_v34 = vsel %vm732_vm2, -inf, %v3711_v46  ;;  %vm4106_vm6 = vmor %vm651_vm4, %vm731_vm1  ;;  %v4110_v35 = vpop.xlane.xlu2 %1633  ;;  %v5937_v46 = vld [vmem:[#allocation7_spill] sm:$0xff] }
 0x20e   : > { %5929 = vst [vmem:[#allocation30_spill] sm:$0xff] %v4110_v35  ;;  %vm4112_vm5 = vmor %vm652_vm15, %vm732_vm2  ;;  %v829_v56 = vmax.f32 %v4101_v38, %v4104_v34  ;;  %vm5938_vm4 = vcmp.eq.f32.partialorder %v5937_v46, %v5933_v17  ;;  %v5974_v46 = vmov 0  ;;  %v6056_v35 = vld [vmem:[#allocation22_spill] sm:$0xff] }
 0x20f   : > { %vm654_vm13 = vmor %vm5938_vm4, %vm5936_vm12 }
 0x210   : > { %830 = vmax.xlane.f32.xlu2 %v829_v56  ;;  %v5950_v56 = vmov 0 }
 0x215   : > { %v4124_v49 = vpop.xlane.xlu0 %1636  ;;  %v690_v29 = vpop.xlane.xlu2 %689 }
 0x216   : > { %5935 = vst [vmem:[#allocation3_spill] sm:$0xff] %v4124_v49  ;;  %vm733_vm15 = vcmp.eq.f32.partialorder %v3742_v39, %v690_v29  ;;  %vm734_vm1 = vcmp.eq.f32.partialorder %v3748_v27, %v690_v29  ;;  %v6043_v49 = vld [vmem:[#allocation123_spill] sm:$0xff] }
 0x217   : > { %v4135_v55 = vsel %vm733_vm15, -inf, %v3742_v39  ;;  %v4138_v61 = vsel %vm734_vm1, -inf, %v3748_v27  ;;  %vm4140_vm2 = vmor %vm653_vm7, %vm733_vm15  ;;  %v5944_v39 = vld [vmem:[#allocation8_spill] sm:$0xff]  ;;  %vm5947_vm7 = vcmp.eq.f32.partialorder %v3153_v28, %v3758_v37  ;;  %v5952_v28 = vmov 0 }
 0x218   : > { %v5940_v16 = vsel %vm4140_vm2, 4294967295, %v5939_v16  ;;  %vm4144_vm14 = vmor %vm654_vm13, %vm734_vm1  ;;  %v832_v36 = vmax.f32 %v4135_v55, %v4138_v61  ;;  %vm5946_vm12 = vcmp.eq.f32.partialorder %v5944_v39, %v5945_v25  ;;  %vm5949_vm13 = vcmp.eq.f32.partialorder %v5948_v19, %v5945_v25  ;;  %v5979_v39 = vld [vmem:[#allocation11_spill] sm:$0xff] }
 0x219   : > { %v5942_v48 = vsel %vm4144_vm14, 4294967295, %v5941_v48  ;;  %vm655_vm4 = vmor %vm5946_vm12, %vm5943_vm0  ;;  %vm5954_vm12 = vcmp.eq.f32.partialorder %v3208_v4, %v3782_v24  ;;  %v5980_v25 = vld [vmem:[#allocation63_spill] sm:$0xff] }
 0x21a   : > { %833 = vmax.xlane.f32.xlu0 %v832_v36  ;;  %vm656_vm15 = vmor %vm5949_vm13, %vm5947_vm7  ;;  %vm5955_vm7 = vcmp.eq.f32.partialorder %v2860_v14, %v3190_v40  ;;  %v5964_v14 = vld [vmem:[#allocation10_spill] sm:$0xff]  ;;  %v5982_v19 = vld [vmem:[#allocation67_spill] sm:$0xff] }
 0x21b   : > { %vm657_vm13 = vmor %vm5955_vm7, %vm5954_vm12  ;;  %vm5963_vm12 = vcmp.eq.f32.partialorder %v3230_v13, %v3784_v0 }
 0x21d   : > { %v693_v27 = vpop.xlane.xlu0 %692 }
 0x21e   : > { %vm735_vm1 = vcmp.eq.f32.partialorder %v3768_v11, %v693_v27  ;;  %vm736_vm9 = vcmp.eq.f32.partialorder %v3774_v59, %v693_v27 }
 0x21f   : > { %v4165_v7 = vsel %vm735_vm1, -inf, %v3768_v11  ;;  %v4168_v60 = vsel %vm736_vm9, -inf, %v3774_v59  ;;  %vm4170_vm14 = vmor %vm655_vm4, %vm735_vm1  ;;  %vm5956_vm4 = vcmp.eq.f32.partialorder %v3214_v9, %v3782_v24  ;;  %vm5958_vm1 = vcmp.eq.f32.partialorder %v3224_v12, %v3784_v0  ;;  %v5959_v11 = vld [vmem:[#allocation59_spill] sm:$0xff]  ;;  %v5971_v24 = vld [vmem:[#allocation108_spill] sm:$0xff] }
 0x220   : > { %v5951_v56 = vsel %vm4170_vm14, 4294967295, %v5950_v56  ;;  %vm4174_vm0 = vmor %vm656_vm15, %vm736_vm9  ;;  %v835_v37 = vmax.f32 %v4165_v7, %v4168_v60  ;;  %vm5957_vm9 = vcmp.eq.f32.partialorder %v2862_v15, %v3190_v40  ;;  %vm5965_vm7 = vcmp.eq.f32.partialorder %v5964_v14, %v5959_v11  ;;  %v5968_v40 = vld [vmem:[#allocation107_spill] sm:$0xff] }
 0x221   : > { %v5953_v28 = vsel %vm4174_vm0, 4294967295, %v5952_v28  ;;  %vm658_vm15 = vmor %vm5957_vm9, %vm5956_vm4  ;;  %vm5960_vm0 = vcmp.eq.f32.partialorder %v2872_v22, %v5959_v11  ;;  %v5972_v0 = vmov 0  ;;  %v5986_v11 = vld [vmem:[#allocation110_spill] sm:$0xff]  ;;  %v5987_v59 = vld [vmem:[#allocation111_spill] sm:$0xff]  ;;  %v5988_v14 = vmov 0 }
 0x222   : > { %836 = vmax.xlane.f32.xlu1 %v835_v37  ;;  %vm4198_vm14 = vmor %vm5960_vm0, %vm5958_vm1  ;;  %v5984_v37 = vld [vmem:[#allocation12_spill] sm:$0xff] }
 0x223   : > { %vm4208_vm2 = vmor %vm5965_vm7, %vm5963_vm12 }
 0x22b   : > { %v696_v4 = vpop.xlane.xlu1 %695  ;;  %v699_v22 = vpop.xlane.xlu2 %698 }
 0x22c   : > { %vm737_vm4 = vcmp.eq.f32.partialorder %v3800_v51, %v696_v4  ;;  %vm738_vm9 = vcmp.eq.f32.partialorder %v5968_v40, %v696_v4  ;;  %vm739_vm1 = vcmp.eq.f32.partialorder %v3812_v58, %v699_v22  ;;  %vm740_vm12 = vcmp.eq.f32.partialorder %v5971_v24, %v699_v22  ;;  %v5994_v22 = vld [vmem:[#allocation68_spill] sm:$0xff] }
 0x22d   : > { %v4215_v9 = vsel %vm737_vm4, -inf, %v3800_v51  ;;  %v4218_v12 = vsel %vm738_vm9, -inf, %v5968_v40  ;;  %vm4220_vm0 = vmor %vm657_vm13, %vm737_vm4  ;;  %v4231_v17 = vsel %vm739_vm1, -inf, %v3812_v58  ;;  %v4234_v51 = vsel %vm740_vm12, -inf, %v5971_v24  ;;  %v5993_v40 = vld [vmem:[#allocation13_spill] sm:$0xff] }
 0x22e   : > { %vm4226_vm7 = vmor %vm658_vm15, %vm738_vm9  ;;  %v838_v29 = vmax.f32 %v4215_v9, %v4218_v12  ;;  %v841_v36 = vmax.f32 %v4231_v17, %v4234_v51  ;;  %v5976_v58 = vmov 0  ;;  %vm5978_vm4 = vcmp.eq.f32.partialorder %v3284_v62, %v3826_v45 }
 0x22f   : > { %v5973_v0 = vsel %vm4226_vm7, 4294967295, %v5972_v0  ;;  %vm4240_vm13 = vmor %vm4198_vm14, %vm739_vm1  ;;  %vm5981_vm14 = vcmp.eq.f32.partialorder %v5979_v39, %v5980_v25  ;;  %vm5983_vm1 = vcmp.eq.f32.partialorder %v5982_v19, %v3826_v45  ;;  %vm5985_vm7 = vcmp.eq.f32.partialorder %v5984_v37, %v5980_v25  ;;  %v6000_v39 = vld [vmem:[#allocation113_spill] sm:$0xff]  ;;  %v6001_v25 = vld [vmem:[#allocation114_spill] sm:$0xff] }
 0x230   : > { %v5975_v46 = vsel %vm4240_vm13, 4294967295, %v5974_v46  ;;  %vm4248_vm15 = vmor %vm4208_vm2, %vm740_vm12  ;;  %839 = vmax.xlane.f32.xlu2 %v838_v29  ;;  %842 = vmax.xlane.f32.xlu0 %v841_v36  ;;  %v5990_v45 = vmov 0  ;;  %v5996_v29 = vld [vmem:[#allocation72_spill] sm:$0xff]  ;;  %v5998_v36 = vld [vmem:[#allocation14_spill] sm:$0xff]  ;;  %v6002_v19 = vmov 0 }
 0x231   : > { %v5977_v58 = vsel %vm4248_vm15, 4294967295, %v5976_v58  ;;  %vm661_vm9 = vmor %vm5981_vm14, %vm5978_vm4  ;;  %vm5995_vm14 = vcmp.eq.f32.partialorder %v5993_v40, %v5994_v22  ;;  %v6010_v40 = vld [vmem:[#allocation77_spill] sm:$0xff] }
 0x232   : > { %vm662_vm2 = vmor %vm5985_vm7, %vm5983_vm1  ;;  %vm5992_vm7 = vcmp.eq.f32.partialorder %v3326_v31, %v3848_v63 }
 0x233   : > { %vm663_vm1 = vmor %vm5995_vm14, %vm5992_vm7  ;;  %vm6006_vm14 = vcmp.eq.f32.partialorder %v3368_v1, %v3870_v32 }
 0x234   : > { %v702_v27 = vpop.xlane.xlu0 %701 }
 0x235   : > { %vm741_vm12 = vcmp.eq.f32.partialorder %v5986_v11, %v702_v27  ;;  %vm742_vm15 = vcmp.eq.f32.partialorder %v5987_v59, %v702_v27 }
 0x236   : > { %v4267_v4 = vsel %vm741_vm12, -inf, %v5986_v11  ;;  %v4270_v62 = vsel %vm742_vm15, -inf, %v5987_v59  ;;  %vm4272_vm13 = vmor %vm661_vm9, %vm741_vm12  ;;  %vm5997_vm9 = vcmp.eq.f32.partialorder %v5996_v29, %v3848_v63  ;;  %v6004_v63 = vmov 0  ;;  %v6007_v11 = vld [vmem:[#allocation15_spill] sm:$0xff]  ;;  %v6008_v59 = vld [vmem:[#allocation73_spill] sm:$0xff] }
 0x237   : > { %v5989_v14 = vsel %vm4272_vm13, 4294967295, %v5988_v14  ;;  %vm4276_vm4 = vmor %vm662_vm2, %vm742_vm15  ;;  %v844_v15 = vmax.f32 %v4267_v4, %v4270_v62  ;;  %vm5999_vm15 = vcmp.eq.f32.partialorder %v5998_v36, %v5994_v22  ;;  %v6012_v22 = vld [vmem:[#allocation16_spill] sm:$0xff]  ;;  %v6015_v29 = vld [vmem:[#allocation117_spill] sm:$0xff] }
 0x238   : > { %v5991_v45 = vsel %vm4276_vm4, 4294967295, %v5990_v45  ;;  %vm664_vm2 = vmor %vm5999_vm15, %vm5997_vm9  ;;  %vm6009_vm9 = vcmp.eq.f32.partialorder %v6007_v11, %v6008_v59  ;;  %v6022_v11 = vld [vmem:[#allocation78_spill] sm:$0xff] }
 0x239   : > { %845 = vmax.xlane.f32.xlu1 %v844_v15  ;;  %vm665_vm15 = vmor %vm6009_vm9, %vm6006_vm14  ;;  %vm6020_vm9 = vcmp.eq.f32.partialorder %v3410_v50, %v3892_v20 }
 0x23b   : > { %v705_v24 = vpop.xlane.xlu1 %704 }
 0x23c   : > { %vm743_vm12 = vcmp.eq.f32.partialorder %v6000_v39, %v705_v24  ;;  %vm744_vm4 = vcmp.eq.f32.partialorder %v6001_v25, %v705_v24  ;;  %v6014_v24 = vld [vmem:[#allocation116_spill] sm:$0xff] }
 0x23d   : > { %v4297_v27 = vsel %vm743_vm12, -inf, %v6000_v39  ;;  %v4300_v31 = vsel %vm744_vm4, -inf, %v6001_v25  ;;  %vm4302_vm13 = vmor %vm663_vm1, %vm743_vm12  ;;  %vm6011_vm1 = vcmp.eq.f32.partialorder %v6010_v40, %v3870_v32  ;;  %v6016_v39 = vmov 0  ;;  %v6026_v40 = vld [vmem:[#allocation18_spill] sm:$0xff] }
 0x23e   : > { %v6003_v19 = vsel %vm4302_vm13, 4294967295, %v6002_v19  ;;  %vm4306_vm7 = vmor %vm664_vm2, %vm744_vm4  ;;  %v847_v37 = vmax.f32 %v4297_v27, %v4300_v31  ;;  %vm6013_vm4 = vcmp.eq.f32.partialorder %v6012_v22, %v6008_v59  ;;  %v6018_v32 = vmov 0  ;;  %v6028_v22 = vld [vmem:[#allocation119_spill] sm:$0xff] }
 0x23f   : > { %v6005_v63 = vsel %vm4306_vm7, 4294967295, %v6004_v63  ;;  %vm666_vm2 = vmor %vm6013_vm4, %vm6011_vm1 }
 0x240   : > { %848 = vmax.xlane.f32.xlu2 %v847_v37  ;;  %v6021_v37 = vld [vmem:[#allocation17_spill] sm:$0xff] }
 0x241   : > { %vm6023_vm1 = vcmp.eq.f32.partialorder %v6021_v37, %v6022_v11 }
 0x242   : > { %vm667_vm4 = vmor %vm6023_vm1, %vm6020_vm9  ;;  %vm6034_vm1 = vcmp.eq.f32.partialorder %v3452_v47, %v3914_v41 }
 0x243   : > { %v708_v15 = vpop.xlane.xlu2 %707 }
 0x244   : > { %vm745_vm12 = vcmp.eq.f32.partialorder %v6014_v24, %v708_v15  ;;  %vm746_vm7 = vcmp.eq.f32.partialorder %v6015_v29, %v708_v15  ;;  %v6024_v15 = vld [vmem:[#allocation82_spill] sm:$0xff] }
 0x245   : > { %v4327_v36 = vsel %vm745_vm12, -inf, %v6014_v24  ;;  %v4330_v1 = vsel %vm746_vm7, -inf, %v6015_v29  ;;  %vm4332_vm13 = vmor %vm665_vm15, %vm745_vm12  ;;  %vm6025_vm15 = vcmp.eq.f32.partialorder %v6024_v15, %v3892_v20  ;;  %v6029_v24 = vld [vmem:[#allocation120_spill] sm:$0xff]  ;;  %v6032_v20 = vmov 0 }
 0x246   : > { %v6017_v39 = vsel %vm4332_vm13, 4294967295, %v6016_v39  ;;  %vm4336_vm14 = vmor %vm666_vm2, %vm746_vm7  ;;  %v850_v25 = vmax.f32 %v4327_v36, %v4330_v1  ;;  %vm6027_vm7 = vcmp.eq.f32.partialorder %v6026_v40, %v6022_v11  ;;  %v6035_v11 = vld [vmem:[#allocation19_spill] sm:$0xff] }
 0x247   : > { %v6019_v32 = vsel %vm4336_vm14, 4294967295, %v6018_v32  ;;  %vm668_vm2 = vmor %vm6027_vm7, %vm6025_vm15  ;;  %v6038_v40 = vld [vmem:[#allocation87_spill] sm:$0xff] }
 0x248   : > { %851 = vmax.xlane.f32.xlu0 %v850_v25  ;;  %v6030_v25 = vmov 0 }
 0x24b   : > { %v711_v59 = vpop.xlane.xlu0 %710 }
 0x24c   : > { %vm747_vm12 = vcmp.eq.f32.partialorder %v6028_v22, %v711_v59  ;;  %vm748_vm14 = vcmp.eq.f32.partialorder %v6029_v24, %v711_v59  ;;  %v6036_v59 = vld [vmem:[#allocation83_spill] sm:$0xff] }
 0x24d   : > { %v4357_v29 = vsel %vm747_vm12, -inf, %v6028_v22  ;;  %v4360_v50 = vsel %vm748_vm14, -inf, %v6029_v24  ;;  %vm4362_vm13 = vmor %vm667_vm4, %vm747_vm12  ;;  %vm6037_vm15 = vcmp.eq.f32.partialorder %v6035_v11, %v6036_v59  ;;  %vm6039_vm4 = vcmp.eq.f32.partialorder %v6038_v40, %v3914_v41  ;;  %v6040_v22 = vld [vmem:[#allocation20_spill] sm:$0xff]  ;;  %v6042_v24 = vld [vmem:[#allocation122_spill] sm:$0xff] }
 0x24e   : > { %v6031_v25 = vsel %vm4362_vm13, 4294967295, %v6030_v25  ;;  %vm4366_vm9 = vmor %vm668_vm2, %vm748_vm14  ;;  %v853_v37 = vmax.f32 %v4357_v29, %v4360_v50  ;;  %vm6041_vm14 = vcmp.eq.f32.partialorder %v6040_v22, %v6036_v59  ;;  %v6044_v11 = vmov 0  ;;  %v6051_v40 = vld [vmem:[#allocation21_spill] sm:$0xff]  ;;  %v6052_v22 = vld [vmem:[#allocation88_spill] sm:$0xff] }
 0x24f   : > { %v6033_v20 = vsel %vm4366_vm9, 4294967295, %v6032_v20  ;;  %vm669_vm7 = vmor %vm6037_vm15, %vm6034_vm1  ;;  %v6046_v41 = vmov 0 }
 0x250   : > { %854 = vmax.xlane.f32.xlu1 %v853_v37  ;;  %vm670_vm2 = vmor %vm6041_vm14, %vm6039_vm4  ;;  %vm6053_vm4 = vcmp.eq.f32.partialorder %v6051_v40, %v6052_v22  ;;  %v6060_v40 = vmov 0 }
 0x253   : > { %v714_v15 = vpop.xlane.xlu1 %713 }
 0x254   : > { %vm749_vm12 = vcmp.eq.f32.partialorder %v6042_v24, %v714_v15  ;;  %vm750_vm9 = vcmp.eq.f32.partialorder %v6043_v49, %v714_v15  ;;  %v6049_v15 = vld [vmem:[#allocation125_spill] sm:$0xff] }
 0x255   : > { %v4387_v37 = vsel %vm749_vm12, -inf, %v6042_v24  ;;  %v4390_v47 = vsel %vm750_vm9, -inf, %v6043_v49  ;;  %vm4392_vm13 = vmor %vm669_vm7, %vm749_vm12  ;;  %vm6050_vm15 = vcmp.eq.f32.partialorder %v3494_v10, %v6049_v15  ;;  %v6054_v24 = vld [vmem:[#allocation92_spill] sm:$0xff] }
 0x256   : > { %v6045_v11 = vsel %vm4392_vm13, 4294967295, %v6044_v11  ;;  %vm4396_vm1 = vmor %vm670_vm2, %vm750_vm9  ;;  %v856_v59 = vmax.f32 %v4387_v37, %v4390_v47  ;;  %vm6055_vm7 = vcmp.eq.f32.partialorder %v6054_v24, %v6049_v15  ;;  %vm6057_vm9 = vcmp.eq.f32.partialorder %v6056_v35, %v6052_v22  ;;  %v6068_v22 = vld [vmem:[#allocation93_spill] sm:$0xff] }
 0x257   : > { %v6047_v41 = vsel %vm4396_vm1, 4294967295, %v6046_v41  ;;  %vm671_vm14 = vmor %vm6053_vm4, %vm6050_vm15  ;;  %v6063_v15 = vmov 0  ;;  %vm6066_vm4 = vcmp.eq.f32.partialorder %v3536_v26, %v3958_v23  ;;  %v6072_v24 = vld [vmem:[#allocation25_spill] sm:$0xff] }
 0x258   : > { %6048 = vst [vmem:[#allocation4_spill] sm:$0xff] %v6047_v41  ;;  %857 = vmax.xlane.f32.xlu2 %v856_v59  ;;  %vm672_vm2 = vmor %vm6057_vm9, %vm6055_vm7  ;;  %v6059_v41 = vld [vmem:[#allocation127_spill] sm:$0xff] }
 0x25b   : > { %v717_v49 = vpop.xlane.xlu2 %716 }
 0x25c   : > { %vm751_vm12 = vcmp.eq.f32.partialorder %v6058_v53, %v717_v49  ;;  %vm752_vm1 = vcmp.eq.f32.partialorder %v6059_v41, %v717_v49  ;;  %v6070_v49 = vld [vmem:[#allocation96_spill] sm:$0xff] }
 0x25d   : > { %v4417_v59 = vsel %vm751_vm12, -inf, %v6058_v53  ;;  %v4420_v10 = vsel %vm752_vm1, -inf, %v6059_v41  ;;  %vm4422_vm13 = vmor %vm671_vm14, %vm751_vm12  ;;  %v6067_v53 = vld [vmem:[#allocation24_spill] sm:$0xff]  ;;  %vm6071_vm14 = vcmp.eq.f32.partialorder %v6070_v49, %v3958_v23  ;;  %v6078_v23 = vmov 0  ;;  %v6081_v49 = vld [vmem:[#allocation99_spill] sm:$0xff] }
 0x25e   : > { %v6061_v40 = vsel %vm4422_vm13, 4294967295, %v6060_v40  ;;  %vm4426_vm15 = vmor %vm672_vm2, %vm752_vm1  ;;  %v859_v35 = vmax.f32 %v4417_v59, %v4420_v10  ;;  %vm6069_vm7 = vcmp.eq.f32.partialorder %v6067_v53, %v6068_v22  ;;  %vm6073_vm1 = vcmp.eq.f32.partialorder %v6072_v24, %v6068_v22  ;;  %v6085_v24 = vld [vmem:[#allocation97_spill] sm:$0xff] }
 0x25f   : > { %6062 = vst [vmem:[#allocation37_spill] sm:$0xff] %v6061_v40  ;;  %v6064_v15 = vsel %vm4426_vm15, 4294967295, %v6063_v15  ;;  %vm673_vm9 = vmor %vm6069_vm7, %vm6066_vm4  ;;  %v6075_v53 = vmov 0  ;;  %v6087_v40 = vld [vmem:[#allocation100_spill] sm:$0xff] }
 0x260   : > { %6065 = vst [vmem:[#allocation5_spill] sm:$0xff] %v6064_v15  ;;  %860 = vmax.xlane.f32.xlu0 %v859_v35  ;;  %vm674_vm2 = vmor %vm6073_vm1, %vm6071_vm14  ;;  %v6074_v15 = vld [vmem:[#allocation129_spill] sm:$0xff] }
 0x263   : > { %v720_v41 = vpop.xlane.xlu0 %719 }
 0x264   : > { %vm753_vm12 = vcmp.eq.f32.partialorder %v3968_v52, %v720_v41  ;;  %vm754_vm15 = vcmp.eq.f32.partialorder %v6074_v15, %v720_v41  ;;  %v6082_v41 = vld [vmem:[#allocation131_spill] sm:$0xff] }
 0x265   : > { %v4447_v35 = vsel %vm753_vm12, -inf, %v3968_v52  ;;  %v4450_v26 = vsel %vm754_vm15, -inf, %v6074_v15  ;;  %vm4452_vm13 = vmor %vm673_vm9, %vm753_vm12  ;;  %vm6083_vm7 = vcmp.eq.f32.partialorder %v6081_v49, %v6082_v41  ;;  %v6084_v52 = vld [vmem:[#allocation28_spill] sm:$0xff]  ;;  %vm6088_vm9 = vcmp.eq.f32.partialorder %v6087_v40, %v6082_v41 }
 0x266   : > { %v6076_v53 = vsel %vm4452_vm13, 4294967295, %v6075_v53  ;;  %vm4456_vm4 = vmor %vm674_vm2, %vm754_vm15  ;;  %v862_v22 = vmax.f32 %v4447_v35, %v4450_v26  ;;  %vm6086_vm14 = vcmp.eq.f32.partialorder %v6084_v52, %v6085_v24  ;;  %v6092_v52 = vmov 0  ;;  %v6098_v41 = vld [vmem:[#allocation32_spill] sm:$0xff] }
 0x267   : > { %6077 = vst [vmem:[#allocation6_spill] sm:$0xff] %v6076_v53  ;;  %v6079_v23 = vsel %vm4456_vm4, 4294967295, %v6078_v23  ;;  %vm675_vm1 = vmor %vm6086_vm14, %vm6083_vm7  ;;  %v6089_v53 = vld [vmem:[#allocation29_spill] sm:$0xff]  ;;  %v6095_v40 = vmov 0 }
 0x268   : > { %6080 = vst [vmem:[#allocation48_spill] sm:$0xff] %v6079_v23  ;;  %863 = vmax.xlane.f32.xlu1 %v862_v22  ;;  %vm6090_vm15 = vcmp.eq.f32.partialorder %v6089_v53, %v6085_v24  ;;  %v6099_v24 = vld [vmem:[#allocation134_spill] sm:$0xff] }
 0x269   : > { %vm676_vm2 = vmor %vm6090_vm15, %vm6088_vm9  ;;  %vm6100_vm14 = vcmp.eq.f32.partialorder %v6098_v41, %v6099_v24  ;;  %v6104_v23 = vld [vmem:[#allocation102_spill] sm:$0xff]  ;;  %v6223_v41 = vld [vmem:[#allocation39_spill] sm:$0xff] }
 0x26b   : > { %v723_v15 = vpop.xlane.xlu1 %722 }
 0x26c   : > { %vm755_vm12 = vcmp.eq.f32.partialorder %v3992_v6, %v723_v15  ;;  %vm756_vm4 = vcmp.eq.f32.partialorder %v3998_v18, %v723_v15  ;;  %v6102_v15 = vld [vmem:[#allocation31_spill] sm:$0xff] }
 0x26d   : > { %v4477_v22 = vsel %vm755_vm12, -inf, %v3992_v6  ;;  %v4480_v49 = vsel %vm756_vm4, -inf, %v3998_v18  ;;  %vm4482_vm13 = vmor %vm675_vm1, %vm755_vm12  ;;  %v6101_v6 = vld [vmem:[#allocation33_spill] sm:$0xff]  ;;  %vm6105_vm1 = vcmp.eq.f32.partialorder %v6104_v23, %v6099_v24 }
 0x26e   : > { %6091 = vst [vmem:[#allocation7_spill] sm:$0xff] %v4480_v49  ;;  %v6093_v52 = vsel %vm4482_vm13, 4294967295, %v6092_v52  ;;  %vm4486_vm7 = vmor %vm676_vm2, %vm756_vm4  ;;  %v865_v53 = vmax.f32 %v4477_v22, %v4480_v49  ;;  %vm6103_vm9 = vcmp.eq.f32.partialorder %v6101_v6, %v6102_v15 }
 0x26f   : > { %6094 = vst [vmem:[#allocation8_spill] sm:$0xff] %v6093_v52  ;;  %v6096_v40 = vsel %vm4486_vm7, 4294967295, %v6095_v40  ;;  %vm677_vm15 = vmor %vm6103_vm9, %vm6100_vm14  ;;  %v6106_v52 = vld [vmem:[#allocation34_spill] sm:$0xff] }
 0x270   : > { %6097 = vst [vmem:[#allocation50_spill] sm:$0xff] %v6096_v40  ;;  %866 = vmax.xlane.f32.xlu2 %v865_v53  ;;  %vm6107_vm4 = vcmp.eq.f32.partialorder %v6106_v52, %v6102_v15  ;;  %v6215_v52 = vmov 0 }
 0x271   : > { %vm4504_vm2 = vmor %vm6107_vm4, %vm6105_vm1 }
 0x273   : > { %v726_v18 = vpop.xlane.xlu2 %725 }
 0x274   : > { %v825_v49 = vpop.xlane.xlu0 %824  ;;  %vm757_vm12 = vcmp.eq.f32.partialorder %v4020_v30, %v726_v18  ;;  %vm758_vm7 = vcmp.eq.f32.partialorder %v4026_v2, %v726_v18 }
 0x275   : > { %vm871_vm13 = vcmp.eq.f32.partialorder %v4037_v44, %v825_v49  ;;  %vm872_vm14 = vcmp.eq.f32.partialorder %v4040_v5, %v825_v49  ;;  %v4513_v53 = vsel %vm757_vm12, -inf, %v4020_v30  ;;  %v4516_v23 = vsel %vm758_vm7, -inf, %v4026_v2  ;;  %vm4518_vm9 = vmor %vm677_vm15, %vm757_vm12 }
 0x276   : > { %vm4524_vm1 = vmor %vm4044_vm8, %vm871_vm13  ;;  %v4529_v24 = vsel %vm871_vm13, -inf, %v4037_v44  ;;  %v4532_v49 = vsel %vm872_vm14, -inf, %v4040_v5  ;;  %v868_v2 = vmax.f32 %v4513_v53, %v4516_v23  ;;  %v6224_v44 = vld [vmem:[#allocation40_spill] sm:$0xff] }
 0x277   : > { %vm4538_vm15 = vmor %vm4050_vm10, %vm872_vm14  ;;  %v967_v57 = vmax.f32 %v4529_v24, %v4532_v49 }
 0x278   : > { %vm4546_vm8 = vmor %vm4504_vm2, %vm758_vm7  ;;  %869 = vmax.xlane.f32.xlu0 %v868_v2 }
 0x279   : > { %968 = vmax.xlane.f32.xlu1 %v967_v57 }
 0x27b   : > { %v828_v5 = vpop.xlane.xlu1 %827 }
 0x27c   : > { %vm873_vm13 = vcmp.eq.f32.partialorder %v4071_v33, %v828_v5  ;;  %vm874_vm4 = vcmp.eq.f32.partialorder %v4074_v8, %v828_v5  ;;  %v6130_v5 = vmov 0 }
 0x27d   : > { %vm4554_vm10 = vmor %vm4076_vm3, %vm873_vm13  ;;  %v4559_v6 = vsel %vm873_vm13, -inf, %v4071_v33  ;;  %v4562_v40 = vsel %vm874_vm4, -inf, %v4074_v8  ;;  %vm6126_vm13 = vnez %v5940_v16 }
 0x27e   : > { %vm4566_vm7 = vmor %vm4080_vm11, %vm874_vm4  ;;  %v970_v18 = vmax.f32 %v4559_v6, %v4562_v40 }
 0x280   : > { %971 = vmax.xlane.f32.xlu2 %v970_v18 }
 0x283   : > { %v831_v3 = vpop.xlane.xlu2 %830 }
 0x284   : > { %vm875_vm3 = vcmp.eq.f32.partialorder %v4101_v38, %v831_v3  ;;  %vm876_vm2 = vcmp.eq.f32.partialorder %v4104_v34, %v831_v3  ;;  %v6136_v3 = vmov 0 }
 0x285   : > { %vm4576_vm12 = vmor %vm4106_vm6, %vm875_vm3  ;;  %v4581_v8 = vsel %vm875_vm3, -inf, %v4101_v38  ;;  %v4584_v43 = vsel %vm876_vm2, -inf, %v4104_v34  ;;  %v6127_v38 = vmov 0 }
 0x286   : > { %vm4588_vm11 = vmor %vm4112_vm5, %vm876_vm2  ;;  %v973_v57 = vmax.f32 %v4581_v8, %v4584_v43  ;;  %vm6129_vm5 = vnez %v5942_v48 }
 0x288   : > { %974 = vmax.xlane.f32.xlu0 %v973_v57 }
 0x28d   : > { %v834_v54 = vpop.xlane.xlu0 %833 }
 0x28e   : > { %vm877_vm6 = vcmp.eq.f32.partialorder %v4135_v55, %v834_v54  ;;  %vm878_vm14 = vcmp.eq.f32.partialorder %v4138_v61, %v834_v54 }
 0x28f   : > { %vm4598_vm4 = vmor %vm6126_vm13, %vm877_vm6  ;;  %v4603_v34 = vsel %vm877_vm6, -inf, %v4135_v55  ;;  %v4606_v42 = vsel %vm878_vm14, -inf, %v4138_v61  ;;  %vm6132_vm6 = vnez %v5951_v56  ;;  %v6133_v55 = vmov 0 }
 0x290   : > { %v6128_v38 = vsel %vm4598_vm4, 4294967295, %v6127_v38  ;;  %vm4610_vm3 = vmor %vm6129_vm5, %vm878_vm14  ;;  %v976_v18 = vmax.f32 %v4603_v34, %v4606_v42  ;;  %vm6135_vm14 = vnez %v5953_v28 }
 0x291   : > { %v6131_v5 = vsel %vm4610_vm3, 4294967295, %v6130_v5 }
 0x292   : > { %977 = vmax.xlane.f32.xlu1 %v976_v18  ;;  %v6141_v18 = vmov 0 }
 0x295   : > { %v837_v16 = vpop.xlane.xlu1 %836 }
 0x296   : > { %vm879_vm2 = vcmp.eq.f32.partialorder %v4165_v7, %v837_v16  ;;  %vm880_vm13 = vcmp.eq.f32.partialorder %v4168_v60, %v837_v16 }
 0x297   : > { %vm4620_vm4 = vmor %vm6132_vm6, %vm879_vm2  ;;  %v4625_v61 = vsel %vm879_vm2, -inf, %v4165_v7  ;;  %v4628_v48 = vsel %vm880_vm13, -inf, %v4168_v60  ;;  %v6138_v7 = vmov 0 }
 0x298   : > { %v6134_v55 = vsel %vm4620_vm4, 4294967295, %v6133_v55  ;;  %vm4632_vm5 = vmor %vm6135_vm14, %vm880_vm13  ;;  %v979_v57 = vmax.f32 %v4625_v61, %v4628_v48  ;;  %vm6140_vm14 = vnez %v5975_v46  ;;  %v6150_v46 = vmov 0 }
 0x299   : > { %v6137_v3 = vsel %vm4632_vm5, 4294967295, %v6136_v3 }
 0x29a   : > { %980 = vmax.xlane.f32.xlu2 %v979_v57 }
 0x2a3   : > { %v840_v56 = vpop.xlane.xlu2 %839  ;;  %v843_v54 = vpop.xlane.xlu0 %842 }
 0x2a4   : > { %vm881_vm6 = vcmp.eq.f32.partialorder %v4215_v9, %v840_v56  ;;  %vm882_vm2 = vcmp.eq.f32.partialorder %v4218_v12, %v840_v56  ;;  %vm883_vm4 = vcmp.eq.f32.partialorder %v4231_v17, %v843_v54  ;;  %vm884_vm3 = vcmp.eq.f32.partialorder %v4234_v51, %v843_v54 }
 0x2a5   : > { %vm4644_vm13 = vmor %vm4220_vm0, %vm881_vm6  ;;  %v4649_v60 = vsel %vm881_vm6, -inf, %v4215_v9  ;;  %v4652_v28 = vsel %vm882_vm2, -inf, %v4218_v12  ;;  %v4661_v16 = vsel %vm883_vm4, -inf, %v4231_v17  ;;  %v4664_v13 = vsel %vm884_vm3, -inf, %v4234_v51  ;;  %v6258_v9 = vld [vmem:[#allocation66_spill] sm:$0xff] }
 0x2a6   : > { %v6139_v7 = vsel %vm4644_vm13, 4294967295, %v6138_v7  ;;  %vm4656_vm5 = vmor %vm6140_vm14, %vm883_vm4  ;;  %v982_v57 = vmax.f32 %v4649_v60, %v4652_v28  ;;  %vm6143_vm0 = vnez %v5977_v58  ;;  %v985_v12 = vmax.f32 %v4661_v16, %v4664_v13 }
 0x2a7   : > { %v6142_v18 = vsel %vm4656_vm5, 4294967295, %v6141_v18  ;;  %vm4670_vm6 = vmor %vm6143_vm0, %vm884_vm3  ;;  %vm6146_vm14 = vnez %v5973_v0  ;;  %v6147_v17 = vmov 0  ;;  %vm6149_vm3 = vnez %v5989_v14 }
 0x2a8   : > { %vm4678_vm5 = vmor %vm6146_vm14, %vm882_vm2  ;;  %983 = vmax.xlane.f32.xlu0 %v982_v57  ;;  %986 = vmax.xlane.f32.xlu1 %v985_v12  ;;  %vm6152_vm2 = vnez %v5991_v45  ;;  %v6153_v56 = vmov 0  ;;  %v6159_v57 = vmov 0 }
 0x2a9   : > { %v6148_v17 = vsel %vm4678_vm5, 4294967295, %v6147_v17 }
 0x2ac   : > { %v846_v51 = vpop.xlane.xlu1 %845 }
 0x2ad   : > { %vm885_vm4 = vcmp.eq.f32.partialorder %v4267_v4, %v846_v51  ;;  %vm886_vm13 = vcmp.eq.f32.partialorder %v4270_v62, %v846_v51  ;;  %v6165_v51 = vmov 0 }
 0x2ae   : > { %vm4686_vm0 = vmor %vm6149_vm3, %vm885_vm4  ;;  %v4691_v58 = vsel %vm885_vm4, -inf, %v4267_v4  ;;  %v4694_v0 = vsel %vm886_vm13, -inf, %v4270_v62  ;;  %vm6155_vm4 = vnez %v6003_v19  ;;  %v6156_v4 = vmov 0 }
 0x2af   : > { %v6151_v46 = vsel %vm4686_vm0, 4294967295, %v6150_v46  ;;  %vm4698_vm14 = vmor %vm6152_vm2, %vm886_vm13  ;;  %v988_v54 = vmax.f32 %v4691_v58, %v4694_v0  ;;  %vm6158_vm13 = vnez %v6005_v63 }
 0x2b0   : > { %v6154_v56 = vsel %vm4698_vm14, 4294967295, %v6153_v56 }
 0x2b1   : > { %989 = vmax.xlane.f32.xlu2 %v988_v54 }
 0x2b3   : > { %v849_v14 = vpop.xlane.xlu2 %848 }
 0x2b4   : > { %vm887_vm3 = vcmp.eq.f32.partialorder %v4297_v27, %v849_v14  ;;  %vm888_vm0 = vcmp.eq.f32.partialorder %v4300_v31, %v849_v14  ;;  %v6171_v14 = vmov 0 }
 0x2b5   : > { %vm4708_vm5 = vmor %vm6155_vm4, %vm887_vm3  ;;  %v4713_v62 = vsel %vm887_vm3, -inf, %v4297_v27  ;;  %v4716_v45 = vsel %vm888_vm0, -inf, %v4300_v31  ;;  %vm6161_vm3 = vnez %v6017_v39  ;;  %v6162_v27 = vmov 0 }
 0x2b6   : > { %v6157_v4 = vsel %vm4708_vm5, 4294967295, %v6156_v4  ;;  %vm4720_vm2 = vmor %vm6158_vm13, %vm888_vm0  ;;  %v991_v12 = vmax.f32 %v4713_v62, %v4716_v45  ;;  %vm6164_vm0 = vnez %v6019_v32 }
 0x2b7   : > { %v6160_v57 = vsel %vm4720_vm2, 4294967295, %v6159_v57 }
 0x2b8   : > { %992 = vmax.xlane.f32.xlu0 %v991_v12 }
 0x2bb   : > { %v852_v19 = vpop.xlane.xlu0 %851 }
 0x2bc   : > { %vm889_vm4 = vcmp.eq.f32.partialorder %v4327_v36, %v852_v19  ;;  %vm890_vm5 = vcmp.eq.f32.partialorder %v4330_v1, %v852_v19  ;;  %v6176_v19 = vld [vmem:[#allocation4_spill] sm:$0xff] }
 0x2bd   : > { %vm4730_vm14 = vmor %vm6161_vm3, %vm889_vm4  ;;  %v4735_v31 = vsel %vm889_vm4, -inf, %v4327_v36  ;;  %v4738_v63 = vsel %vm890_vm5, -inf, %v4330_v1  ;;  %vm6167_vm4 = vnez %v6031_v25  ;;  %v6168_v36 = vmov 0 }
 0x2be   : > { %v6163_v27 = vsel %vm4730_vm14, 4294967295, %v6162_v27  ;;  %vm4742_vm13 = vmor %vm6164_vm0, %vm890_vm5  ;;  %v994_v54 = vmax.f32 %v4735_v31, %v4738_v63  ;;  %vm6170_vm5 = vnez %v6033_v20 }
 0x2bf   : > { %v6166_v51 = vsel %vm4742_vm13, 4294967295, %v6165_v51 }
 0x2c0   : > { %995 = vmax.xlane.f32.xlu1 %v994_v54  ;;  %v6178_v54 = vmov 0 }
 0x2c3   : > { %v855_v39 = vpop.xlane.xlu1 %854 }
 0x2c4   : > { %vm891_vm3 = vcmp.eq.f32.partialorder %v4357_v29, %v855_v39  ;;  %vm892_vm14 = vcmp.eq.f32.partialorder %v4360_v50, %v855_v39 }
 0x2c5   : > { %vm4752_vm2 = vmor %vm6167_vm4, %vm891_vm3  ;;  %v4757_v1 = vsel %vm891_vm3, -inf, %v4357_v29  ;;  %v4760_v32 = vsel %vm892_vm14, -inf, %v4360_v50  ;;  %vm6173_vm3 = vnez %v6045_v11  ;;  %v6174_v29 = vmov 0 }
 0x2c6   : > { %v6169_v36 = vsel %vm4752_vm2, 4294967295, %v6168_v36  ;;  %vm4764_vm0 = vmor %vm6170_vm5, %vm892_vm14  ;;  %v997_v12 = vmax.f32 %v4757_v1, %v4760_v32  ;;  %vm6177_vm14 = vnez %v6176_v19  ;;  %v6186_v19 = vld [vmem:[#allocation5_spill] sm:$0xff] }
 0x2c7   : > { %v6172_v14 = vsel %vm4764_vm0, 4294967295, %v6171_v14 }
 0x2c8   : > { %998 = vmax.xlane.f32.xlu2 %v997_v12 }
 0x2cb   : > { %v858_v25 = vpop.xlane.xlu2 %857 }
 0x2cc   : > { %vm893_vm4 = vcmp.eq.f32.partialorder %v4387_v37, %v858_v25  ;;  %vm894_vm2 = vcmp.eq.f32.partialorder %v4390_v47, %v858_v25 }
 0x2cd   : > { %vm4774_vm13 = vmor %vm6173_vm3, %vm893_vm4  ;;  %v4779_v50 = vsel %vm893_vm4, -inf, %v4387_v37  ;;  %v4782_v20 = vsel %vm894_vm2, -inf, %v4390_v47  ;;  %v6180_v37 = vld [vmem:[#allocation37_spill] sm:$0xff]  ;;  %v6182_v47 = vmov 0 }
 0x2ce   : > { %v6175_v29 = vsel %vm4774_vm13, 4294967295, %v6174_v29  ;;  %vm4786_vm5 = vmor %vm6177_vm14, %vm894_vm2  ;;  %v1000_v39 = vmax.f32 %v4779_v50, %v4782_v20  ;;  %vm6181_vm4 = vnez %v6180_v37  ;;  %vm6187_vm2 = vnez %v6186_v19 }
 0x2cf   : > { %v6179_v54 = vsel %vm4786_vm5, 4294967295, %v6178_v54 }
 0x2d0   : > { %1001 = vmax.xlane.f32.xlu0 %v1000_v39  ;;  %v6188_v39 = vmov 0 }
 0x2d3   : > { %v861_v11 = vpop.xlane.xlu0 %860 }
 0x2d4   : > { %vm895_vm3 = vcmp.eq.f32.partialorder %v4417_v59, %v861_v11  ;;  %vm896_vm13 = vcmp.eq.f32.partialorder %v4420_v10, %v861_v11 }
 0x2d5   : > { %vm4796_vm0 = vmor %vm6181_vm4, %vm895_vm3  ;;  %v4801_v12 = vsel %vm895_vm3, -inf, %v4417_v59  ;;  %v4804_v25 = vsel %vm896_vm13, -inf, %v4420_v10  ;;  %v6191_v59 = vld [vmem:[#allocation6_spill] sm:$0xff]  ;;  %v6193_v10 = vmov 0 }
 0x2d6   : > { %v6183_v47 = vsel %vm4796_vm0, 4294967295, %v6182_v47  ;;  %6185 = vst [vmem:[#allocation59_spill] sm:$0xff] %v4804_v25  ;;  %vm4808_vm14 = vmor %vm6187_vm2, %vm896_vm13  ;;  %v1003_v11 = vmax.f32 %v4801_v12, %v4804_v25  ;;  %vm6192_vm3 = vnez %v6191_v59  ;;  %v6207_v25 = vld [vmem:[#allocation50_spill] sm:$0xff] }
 0x2d7   : > { %6184 = vst [vmem:[#allocation9_spill] sm:$0xff] %v6183_v47  ;;  %v6189_v39 = vsel %vm4808_vm14, 4294967295, %v6188_v39  ;;  %v6197_v47 = vld [vmem:[#allocation48_spill] sm:$0xff] }
 0x2d8   : > { %6190 = vst [vmem:[#allocation10_spill] sm:$0xff] %v6189_v39  ;;  %1004 = vmax.xlane.f32.xlu1 %v1003_v11  ;;  %vm6198_vm13 = vnez %v6197_v47  ;;  %v6199_v11 = vmov 0 }
 0x2db   : > { %v864_v37 = vpop.xlane.xlu1 %863 }
 0x2dc   : > { %vm897_vm4 = vcmp.eq.f32.partialorder %v4447_v35, %v864_v37  ;;  %vm898_vm0 = vcmp.eq.f32.partialorder %v4450_v26, %v864_v37 }
 0x2dd   : > { %vm4818_vm5 = vmor %vm6192_vm3, %vm897_vm4  ;;  %v4823_v19 = vsel %vm897_vm4, -inf, %v4447_v35  ;;  %v4826_v39 = vsel %vm898_vm0, -inf, %v4450_v26  ;;  %v6203_v35 = vld [vmem:[#allocation8_spill] sm:$0xff]  ;;  %v6205_v26 = vmov 0 }
 0x2de   : > { %v6194_v10 = vsel %vm4818_vm5, 4294967295, %v6193_v10  ;;  %6196 = vst [vmem:[#allocation108_spill] sm:$0xff] %v4826_v39  ;;  %vm4830_vm2 = vmor %vm6198_vm13, %vm898_vm0  ;;  %v1006_v37 = vmax.f32 %v4823_v19, %v4826_v39  ;;  %vm6204_vm4 = vnez %v6203_v35  ;;  %vm6208_vm0 = vnez %v6207_v25 }
 0x2df   : > { %6195 = vst [vmem:[#allocation107_spill] sm:$0xff] %v6194_v10  ;;  %v6200_v11 = vsel %vm4830_vm2, 4294967295, %v6199_v11  ;;  %v6202_v10 = vld [vmem:[#allocation7_spill] sm:$0xff] }
 0x2e0   : > { %6201 = vst [vmem:[#allocation11_spill] sm:$0xff] %v6200_v11  ;;  %1007 = vmax.xlane.f32.xlu2 %v1006_v37  ;;  %v6209_v37 = vmov 0 }
 0x2e3   : > { %v867_v59 = vpop.xlane.xlu2 %866 }
 0x2e4   : > { %vm899_vm3 = vcmp.eq.f32.partialorder %v4477_v22, %v867_v59  ;;  %vm900_vm5 = vcmp.eq.f32.partialorder %v6202_v10, %v867_v59 }
 0x2e5   : > { %vm4840_vm14 = vmor %vm6204_vm4, %vm899_vm3  ;;  %v4845_v47 = vsel %vm899_vm3, -inf, %v4477_v22  ;;  %v4848_v11 = vsel %vm900_vm5, -inf, %v6202_v10  ;;  %v6211_v22 = vmov 0 }
 0x2e6   : > { %v6206_v26 = vsel %vm4840_vm14, 4294967295, %v6205_v26  ;;  %vm4852_vm13 = vmor %vm6208_vm0, %vm900_vm5  ;;  %v1009_v59 = vmax.f32 %v4845_v47, %v4848_v11 }
 0x2e7   : > { %v6210_v37 = vsel %vm4852_vm13, 4294967295, %v6209_v37 }
 0x2e8   : > { %1010 = vmax.xlane.f32.xlu0 %v1009_v59  ;;  %v2661_v59 = vmov 0.0  }
 0x2eb   : > { %v870_v35 = vpop.xlane.xlu0 %869 }
 0x2ec   : > { %v969_v39 = vpop.xlane.xlu1 %968  ;;  %vm901_vm4 = vcmp.eq.f32.partialorder %v4513_v53, %v870_v35  ;;  %vm902_vm3 = vcmp.eq.f32.partialorder %v4516_v23, %v870_v35 }
 0x2ed   : > { %vm1015_vm14 = vcmp.eq.f32.partialorder %v4529_v24, %v969_v39  ;;  %vm1016_vm2 = vcmp.eq.f32.partialorder %v4532_v49, %v969_v39  ;;  %vm4864_vm5 = vmor %vm4518_vm9, %vm901_vm4  ;;  %v4869_v25 = vsel %vm901_vm4, -inf, %v4513_v53  ;;  %v4872_v10 = vsel %vm902_vm3, -inf, %v4516_v23  ;;  %v6218_v53 = vld [vmem:[#allocation41_spill] sm:$0xff]  ;;  %v6221_v23 = vld [vmem:[#allocation44_spill] sm:$0xff] }
 0x2ee   : > { %v6212_v22 = vsel %vm4864_vm5, 4294967295, %v6211_v22  ;;  %6214 = vst [vmem:[#allocation67_spill] sm:$0xff] %v4872_v10  ;;  %vm1047_vm0 = vmor %vm4524_vm1, %vm1015_vm14  ;;  %v1012_v24 = vmax.f32 %v4869_v25, %v4872_v10  ;;  %v6219_v49 = vld [vmem:[#allocation45_spill] sm:$0xff] }
 0x2ef   : > { %6213 = vst [vmem:[#allocation63_spill] sm:$0xff] %v6212_v22  ;;  %vm1048_vm13 = vmor %vm4538_vm15, %vm1016_vm2  ;;  %vm6220_vm4 = vcmp.ne.s32.totalorder %v6218_v53, %v6219_v49  ;;  %vm6222_vm1 = vcmp.ne.s32.totalorder %v6221_v23, %v6219_v49  ;;  %v6225_v49 = vld [vmem:[#allocation49_spill] sm:$0xff] }
 0x2f0   : > { %vm4882_vm9 = vmor %vm4546_vm8, %vm902_vm3  ;;  %1013 = vmax.xlane.f32.xlu1 %v1012_v24  ;;  %vm6226_vm3 = vcmp.ne.s32.totalorder %v6218_v53, %v6225_v49 }
 0x2f1   : > { %v6216_v52 = vsel %vm4882_vm9, 4294967295, %v6215_v52  ;;  %vm1462_vm5 = vmand %vm1047_vm0, %vm6220_vm4  ;;  %vm6227_vm0 = vcmp.ne.s32.totalorder %v6221_v23, %v6225_v49 }
 0x2f2   : > { %6217 = vst [vmem:[#allocation12_spill] sm:$0xff] %v6216_v52  ;;  %vm1463_vm14 = vmand %vm1048_vm13, %vm6222_vm1  ;;  %v1670_v39 = vsel %vm1462_vm5, %v6223_v41, 0.0  ;;  %v2458_v30 = vsel %vm1462_vm5, 1.0, %v2661_v59 }
 0x2f3   : > { %v972_v35 = vpop.xlane.xlu2 %971  ;;  %v1671_v22 = vsel %vm1463_vm14, %v6224_v44, 0.0  ;;  %v2459_v10 = vsel %vm1463_vm14, 1.0, %v2661_v59  ;;  %v6233_v44 = vld [vmem:[#allocation51_spill] sm:$0xff] }
 0x2f4   : > { %vm1017_vm15 = vcmp.eq.f32.partialorder %v4559_v6, %v972_v35  ;;  %vm1018_vm8 = vcmp.eq.f32.partialorder %v4562_v40, %v972_v35  ;;  %v1702_v24 = vadd.f32 %v1671_v22, %v1670_v39  ;;  %v1814_v52 = vadd.f32 %v2459_v10, %v2458_v30  ;;  %v6228_v6 = vld [vmem:[#allocation46_spill] sm:$0xff]  ;;  %v6229_v22 = vld [vmem:[#allocation47_spill] sm:$0xff]  ;;  %v6230_v35 = vld [vmem:[#allocation53_spill] sm:$0xff] }
 0x2f5   : > { %vm1049_vm2 = vmor %vm4554_vm10, %vm1017_vm15  ;;  %vm6231_vm15 = vcmp.ne.s32.totalorder %v6218_v53, %v6230_v35 }
 0x2f6   : > { %vm1050_vm13 = vmor %vm4566_vm7, %vm1018_vm8 }
 0x2f7   : > { %vm1464_vm5 = vmand %vm1049_vm2, %vm6226_vm3  ;;  %vm6232_vm2 = vcmp.ne.s32.totalorder %v6221_v23, %v6230_v35  ;;  %vm6235_vm3 = vnez %v6128_v38 }
 0x2f8   : > { %1703 = vadd.xlane.f32.xlu1 %v1702_v24  ;;  %vm1465_vm4 = vmand %vm1050_vm13, %vm6227_vm0  ;;  %v1672_v41 = vsel %vm1464_vm5, %v6228_v6, 0.0  ;;  %v2460_v40 = vsel %vm1464_vm5, 1.0, %v2661_v59  ;;  %vm6236_vm0 = vnez %v6131_v5 }
 0x2f9   : > { %v1673_v10 = vsel %vm1465_vm4, %v6229_v22, 0.0  ;;  %v2461_v21 = vsel %vm1465_vm4, 1.0, %v2661_v59 }
 0x2fa   : > { %v1705_v39 = vadd.f32 %v1673_v10, %v1672_v41  ;;  %v1817_v15 = vadd.f32 %v2461_v21, %v2460_v40  ;;  %v6240_v40 = vld [vmem:[#allocation54_spill] sm:$0xff]  ;;  %v6241_v10 = vld [vmem:[#allocation55_spill] sm:$0xff] }
 0x2fb   : > { %v975_v30 = vpop.xlane.xlu0 %974 }
 0x2fc   : > { %1706 = vadd.xlane.f32.xlu2 %v1705_v39  ;;  %vm1019_vm10 = vcmp.eq.f32.partialorder %v4581_v8, %v975_v30  ;;  %vm1020_vm7 = vcmp.eq.f32.partialorder %v4584_v43, %v975_v30  ;;  %v6234_v43 = vld [vmem:[#allocation52_spill] sm:$0xff] }
 0x2fd   : > { %vm1051_vm1 = vmor %vm4576_vm12, %vm1019_vm10  ;;  %v6247_v30 = vld [vmem:[#allocation56_spill] sm:$0xff] }
 0x2fe   : > { %vm1052_vm14 = vmor %vm4588_vm11, %vm1020_vm7 }
 0x2ff   : > { %vm1466_vm8 = vmand %vm1051_vm1, %vm6231_vm15 }
 0x300   : > { %1815 = vadd.xlane.f32.xlu1 %v1814_v52  ;;  %vm1467_vm13 = vmand %vm1052_vm14, %vm6232_vm2  ;;  %v1674_v24 = vsel %vm1466_vm8, %v6233_v44, 0.0  ;;  %v2462_v8 = vsel %vm1466_vm8, 1.0, %v2661_v59  ;;  %v6237_v52 = vld [vmem:[#allocation58_spill] sm:$0xff]  ;;  %vm6242_vm2 = vnez %v6134_v55  ;;  %v6248_v44 = vld [vmem:[#allocation57_spill] sm:$0xff] }
 0x301   : > { %v1675_v49 = vsel %vm1467_vm13, %v6234_v43, 0.0  ;;  %v2463_v33 = vsel %vm1467_vm13, 1.0, %v2661_v59  ;;  %vm6238_vm10 = vcmp.ne.s32.totalorder %v6218_v53, %v6237_v52  ;;  %vm6239_vm1 = vcmp.ne.s32.totalorder %v6221_v23, %v6237_v52 }
 0x302   : > { %v1708_v6 = vadd.f32 %v1675_v49, %v1674_v24  ;;  %v1820_v2 = vadd.f32 %v2463_v33, %v2462_v8  ;;  %v6260_v33 = vld [vmem:[#allocation61_spill] sm:$0xff] }
 0x304   : > { %1709 = vadd.xlane.f32.xlu0 %v1708_v6  ;;  %1818 = vadd.xlane.f32.xlu2 %v1817_v15  ;;  %v6244_v15 = vld [vmem:[#allocation60_spill] sm:$0xff] }
 0x305   : > { %v978_v41 = vpop.xlane.xlu1 %977 }
 0x306   : > { %vm1021_vm12 = vcmp.eq.f32.partialorder %v4603_v34, %v978_v41  ;;  %vm1022_vm11 = vcmp.eq.f32.partialorder %v4606_v42, %v978_v41 }
 0x307   : > { %vm1053_vm5 = vmor %vm6235_vm3, %vm1021_vm12  ;;  %vm6243_vm12 = vnez %v6137_v3  ;;  %vm6245_vm3 = vcmp.ne.s32.totalorder %v6218_v53, %v6244_v15 }
 0x308   : > { %vm1054_vm4 = vmor %vm6236_vm0, %vm1022_vm11  ;;  %vm6246_vm0 = vcmp.ne.s32.totalorder %v6221_v23, %v6244_v15 }
 0x309   : > { %vm1468_vm7 = vmand %vm1053_vm5, %vm6238_vm10 }
 0x30a   : > { %vm1469_vm14 = vmand %vm1054_vm4, %vm6239_vm1  ;;  %v1676_v22 = vsel %vm1468_vm7, %v6240_v40, 0.0  ;;  %v2464_v34 = vsel %vm1468_vm7, 1.0, %v2661_v59  ;;  %v6261_v40 = vld [vmem:[#allocation62_spill] sm:$0xff] }
 0x30b   : > { %v1677_v42 = vsel %vm1469_vm14, %v6241_v10, 0.0  ;;  %v2465_v38 = vsel %vm1469_vm14, 1.0, %v2661_v59 }
 0x30c   : > { %1821 = vadd.xlane.f32.xlu0 %v1820_v2  ;;  %v1711_v21 = vadd.f32 %v1677_v42, %v1676_v22  ;;  %v1823_v5 = vadd.f32 %v2465_v38, %v2464_v34  ;;  %v6264_v38 = vld [vmem:[#allocation74_spill] sm:$0xff] }
 0x30d   : > { %v981_v39 = vpop.xlane.xlu2 %980 }
 0x30e   : > { %1712 = vadd.xlane.f32.xlu1 %v1711_v21  ;;  %vm1023_vm15 = vcmp.eq.f32.partialorder %v4625_v61, %v981_v39  ;;  %vm1024_vm8 = vcmp.eq.f32.partialorder %v4628_v48, %v981_v39 }
 0x30f   : > { %vm1055_vm13 = vmor %vm6242_vm2, %vm1023_vm15  ;;  %vm6249_vm15 = vnez %v6139_v7  ;;  %vm6250_vm2 = vnez %v6142_v18 }
 0x310   : > { %vm1056_vm11 = vmor %vm6243_vm12, %vm1024_vm8 }
 0x311   : > { %vm1470_vm5 = vmand %vm1055_vm13, %vm6245_vm3 }
 0x312   : > { %vm1471_vm4 = vmand %vm1056_vm11, %vm6246_vm0  ;;  %v1678_v35 = vsel %vm1470_vm5, %v6247_v30, 0.0  ;;  %v2466_v61 = vsel %vm1470_vm5, 1.0, %v2661_v59  ;;  %vm6251_vm11 = vnez %v6148_v17 }
 0x313   : > { %v1679_v48 = vsel %vm1471_vm4, %v6248_v44, 0.0  ;;  %v2467_v55 = vsel %vm1471_vm4, 1.0, %v2661_v59  ;;  %v6275_v44 = vld [vmem:[#allocation76_spill] sm:$0xff] }
 0x314   : > { %v1714_v24 = vadd.f32 %v1679_v48, %v1678_v35  ;;  %v1826_v8 = vadd.f32 %v2467_v55, %v2466_v61  ;;  %v6271_v35 = vld [vmem:[#allocation79_spill] sm:$0xff] }
 0x315   : > { %v6274_v61 = vld [vmem:[#allocation75_spill] sm:$0xff] }
 0x316   : > { %1824 = vadd.xlane.f32.xlu1 %v1823_v5  ;;  %1715 = vadd.xlane.f32.xlu2 %v1714_v24  ;;  %v6268_v5 = vld [vmem:[#allocation71_spill] sm:$0xff] }
 0x31b   : > { %v984_v3 = vpop.xlane.xlu0 %983  ;;  %v987_v43 = vpop.xlane.xlu1 %986 }
 0x31c   : > { %vm1025_vm10 = vcmp.eq.f32.partialorder %v4649_v60, %v984_v3  ;;  %vm1027_vm7 = vcmp.eq.f32.partialorder %v4661_v16, %v987_v43  ;;  %vm1028_vm1 = vcmp.eq.f32.partialorder %v4664_v13, %v987_v43  ;;  %vm1026_vm14 = vcmp.eq.f32.partialorder %v4652_v28, %v984_v3  ;;  %v6252_v60 = vld [vmem:[#allocation69_spill] sm:$0xff]  ;;  %v6256_v13 = vld [vmem:[#allocation64_spill] sm:$0xff] }
 0x31d   : > { %vm1057_vm8 = vmor %vm6249_vm15, %vm1025_vm10  ;;  %vm6253_vm5 = vcmp.ne.s32.totalorder %v6218_v53, %v6252_v60  ;;  %vm6254_vm4 = vcmp.ne.s32.totalorder %v6221_v23, %v6252_v60  ;;  %v6255_v28 = vld [vmem:[#allocation65_spill] sm:$0xff] }
 0x31e   : > { %vm1059_vm13 = vmor %vm6250_vm2, %vm1027_vm7  ;;  %1827 = vadd.xlane.f32.xlu2 %v1826_v8  ;;  %vm6259_vm7 = vcmp.ne.s32.totalorder %v6221_v23, %v6256_v13  ;;  %vm6263_vm2 = vnez %v6154_v56  ;;  %v6278_v8 = vld [vmem:[#allocation84_spill] sm:$0xff] }
 0x31f   : > { %vm1060_vm12 = vmor %vm4670_vm6, %vm1028_vm1  ;;  %vm6257_vm6 = vcmp.ne.s32.totalorder %v6218_v53, %v6256_v13 }
 0x320   : > { %vm1058_vm3 = vmor %vm6251_vm11, %vm1026_vm14 }
 0x321   : > { %vm1474_vm0 = vmand %vm1059_vm13, %vm6253_vm5 }
 0x322   : > { %vm1475_vm9 = vmand %vm1060_vm12, %vm6254_vm4  ;;  %v2470_v7 = vsel %vm1474_vm0, 1.0, %v2661_v59  ;;  %v1682_v18 = vsel %vm1474_vm0, %v6255_v28, 0.0  ;;  %vm6265_vm12 = vcmp.ne.s32.totalorder %v6218_v53, %v6264_v38 }
 0x323   : > { %v2471_v16 = vsel %vm1475_vm9, 1.0, %v2661_v59  ;;  %vm1472_vm10 = vmand %vm1057_vm8, %vm6257_vm6  ;;  %v1683_v17 = vsel %vm1475_vm9, %v6258_v9, 0.0  ;;  %vm6262_vm9 = vnez %v6151_v46  ;;  %vm6269_vm6 = vnez %v6157_v4 }
 0x324   : > { %v1832_v49 = vadd.f32 %v2471_v16, %v2470_v7  ;;  %vm1473_vm1 = vmand %vm1058_vm3, %vm6259_vm7  ;;  %v1680_v6 = vsel %vm1472_vm10, %v6260_v33, 0.0  ;;  %v990_v2 = vpop.xlane.xlu2 %989  ;;  %v1720_v41 = vadd.f32 %v1683_v17, %v1682_v18  ;;  %v2468_v52 = vsel %vm1472_vm10, 1.0, %v2661_v59  ;;  %v6285_v18 = vld [vmem:[#allocation89_spill] sm:$0xff]  ;;  %v6292_v33 = vld [vmem:[#allocation94_spill] sm:$0xff] }
 0x325   : > { %v1681_v22 = vsel %vm1473_vm1, %v6261_v40, 0.0  ;;  %vm1029_vm14 = vcmp.eq.f32.partialorder %v4691_v58, %v990_v2  ;;  %vm1030_vm15 = vcmp.eq.f32.partialorder %v4694_v0, %v990_v2  ;;  %v2469_v34 = vsel %vm1473_vm1, 1.0, %v2661_v59  ;;  %v6267_v0 = vld [vmem:[#allocation70_spill] sm:$0xff] }
 0x326   : > { %1833 = vadd.xlane.f32.xlu1 %v1832_v49  ;;  %v1717_v10 = vadd.f32 %v1681_v22, %v1680_v6  ;;  %vm1061_vm8 = vmor %vm6262_vm9, %vm1029_vm14  ;;  %1721 = vadd.xlane.f32.xlu2 %v1720_v41  ;;  %v1829_v42 = vadd.f32 %v2469_v34, %v2468_v52  ;;  %vm6266_vm3 = vcmp.ne.s32.totalorder %v6221_v23, %v6264_v38  ;;  %v6295_v2 = vld [vmem:[#allocation90_spill] sm:$0xff]  ;;  %v6296_v41 = vld [vmem:[#allocation91_spill] sm:$0xff] }
 0x327   : > { %vm1062_vm13 = vmor %vm6263_vm2, %vm1030_vm15  ;;  %vm6270_vm7 = vnez %v6160_v57  ;;  %vm6272_vm14 = vcmp.ne.s32.totalorder %v6218_v53, %v6271_v35  ;;  %vm6273_vm9 = vcmp.ne.s32.totalorder %v6221_v23, %v6271_v35  ;;  %v6297_v22 = vld [vmem:[#allocation59_spill] sm:$0xff]  ;;  %v6298_v34 = vld [vmem:[#allocation9_spill] sm:$0xff] }
 0x328   : > { %1718 = vadd.xlane.f32.xlu0 %v1717_v10  ;;  %vm1476_vm11 = vmand %vm1061_vm8, %vm6265_vm12  ;;  %vm6276_vm12 = vnez %v6163_v27  ;;  %v6282_v27 = vld [vmem:[#allocation81_spill] sm:$0xff]  ;;  %v6300_v10 = vld [vmem:[#allocation10_spill] sm:$0xff] }
 0x329   : > { %vm1477_vm5 = vmand %vm1062_vm13, %vm6266_vm3  ;;  %v2472_v58 = vsel %vm1476_vm11, 1.0, %v2661_v59  ;;  %v1684_v21 = vsel %vm1476_vm11, %v6267_v0, 0.0  ;;  %vm6277_vm3 = vnez %v6166_v51  ;;  %v6310_v35 = vld [vmem:[#allocation11_spill] sm:$0xff] }
 0x32a   : > { %v2473_v46 = vsel %vm1477_vm5, 1.0, %v2661_v59  ;;  %v1685_v39 = vsel %vm1477_vm5, %v6268_v5, 0.0 }
 0x32b   : > { %v993_v15 = vpop.xlane.xlu0 %992  ;;  %v1835_v56 = vadd.f32 %v2473_v46, %v2472_v58  ;;  %v1723_v30 = vadd.f32 %v1685_v39, %v1684_v21  ;;  %v6305_v58 = vld [vmem:[#allocation95_spill] sm:$0xff] }
 0x32c   : > { %vm1031_vm0 = vcmp.eq.f32.partialorder %v4713_v62, %v993_v15  ;;  %vm1032_vm4 = vcmp.eq.f32.partialorder %v4716_v45, %v993_v15  ;;  %v6306_v21 = vld [vmem:[#allocation23_spill] sm:$0xff] }
 0x32d   : > { %vm1063_vm10 = vmor %vm6269_vm6, %vm1031_vm0  ;;  %vm6279_vm0 = vcmp.ne.s32.totalorder %v6218_v53, %v6278_v8  ;;  %vm6280_vm6 = vcmp.ne.s32.totalorder %v6221_v23, %v6278_v8  ;;  %v6319_v8 = vld [vmem:[#allocation35_spill] sm:$0xff] }
 0x32e   : > { %vm1064_vm1 = vmor %vm6270_vm7, %vm1032_vm4  ;;  %1836 = vadd.xlane.f32.xlu2 %v1835_v56  ;;  %v6307_v56 = vld [vmem:[#allocation108_spill] sm:$0xff] }
 0x32f   : > { %vm1478_vm15 = vmand %vm1063_vm10, %vm6272_vm14  ;;  %vm6283_vm14 = vnez %v6169_v36  ;;  %v6289_v36 = vld [vmem:[#allocation86_spill] sm:$0xff] }
 0x330   : > { %1830 = vadd.xlane.f32.xlu0 %v1829_v42  ;;  %vm1479_vm8 = vmand %vm1064_vm1, %vm6273_vm9  ;;  %v1686_v62 = vsel %vm1478_vm15, %v6274_v61, 0.0  ;;  %v2474_v45 = vsel %vm1478_vm15, 1.0, %v2661_v59  ;;  %vm6284_vm9 = vnez %v6172_v14  ;;  %v6302_v42 = vld [vmem:[#allocation98_spill] sm:$0xff]  ;;  %v6312_v61 = vld [vmem:[#allocation101_spill] sm:$0xff] }
 0x331   : > { %v1687_v4 = vsel %vm1479_vm8, %v6275_v44, 0.0  ;;  %v2475_v48 = vsel %vm1479_vm8, 1.0, %v2661_v59 }
 0x332   : > { %v1726_v57 = vadd.f32 %v1687_v4, %v1686_v62  ;;  %v1838_v55 = vadd.f32 %v2475_v48, %v2474_v45  ;;  %v6315_v45 = vld [vmem:[#allocation26_spill] sm:$0xff]  ;;  %v6316_v4 = vld [vmem:[#allocation27_spill] sm:$0xff] }
 0x333   : > { %v996_v24 = vpop.xlane.xlu1 %995 }
 0x334   : > { %1727 = vadd.xlane.f32.xlu1 %v1726_v57  ;;  %vm1033_vm2 = vcmp.eq.f32.partialorder %v4735_v31, %v996_v24  ;;  %vm1034_vm13 = vcmp.eq.f32.partialorder %v4738_v63, %v996_v24  ;;  %v6281_v31 = vld [vmem:[#allocation80_spill] sm:$0xff] }
 0x335   : > { %vm1065_vm11 = vmor %vm6276_vm12, %vm1033_vm2  ;;  %vm6286_vm2 = vcmp.ne.s32.totalorder %v6218_v53, %v6285_v18  ;;  %vm6287_vm12 = vcmp.ne.s32.totalorder %v6221_v23, %v6285_v18  ;;  %v6329_v18 = vld [vmem:[#allocation103_spill] sm:$0xff] }
 0x336   : > { %vm1066_vm5 = vmor %vm6277_vm3, %vm1034_vm13 }
 0x337   : > { %vm1480_vm4 = vmand %vm1065_vm11, %vm6279_vm0  ;;  %vm6290_vm0 = vnez %v6175_v29 }
 0x338   : > { %1724 = vadd.xlane.f32.xlu0 %v1723_v30  ;;  %vm1481_vm10 = vmand %vm1066_vm5, %vm6280_vm6  ;;  %v2476_v3 = vsel %vm1480_vm4, 1.0, %v2661_v59  ;;  %v1688_v43 = vsel %vm1480_vm4, %v6281_v31, 0.0  ;;  %vm6291_vm6 = vnez %v6179_v54  ;;  %v6308_v30 = vld [vmem:[#allocation107_spill] sm:$0xff]  ;;  %v6322_v31 = vld [vmem:[#allocation38_spill] sm:$0xff] }
 0x339   : > { %v2477_v63 = vsel %vm1481_vm10, 1.0, %v2661_v59  ;;  %v1689_v60 = vsel %vm1481_vm10, %v6282_v27, 0.0 }
 0x33a   : > { %v1841_v7 = vadd.f32 %v2477_v63, %v2476_v3  ;;  %v5040_v51 = vadd.f32 %v1689_v60, %v1688_v43  ;;  %v6323_v43 = vld [vmem:[#allocation36_spill] sm:$0xff]  ;;  %v6324_v60 = vld [vmem:[#allocation67_spill] sm:$0xff] }
 0x33b   : > { %v999_v28 = vpop.xlane.xlu2 %998 }
 0x33c   : > { %1842 = vadd.xlane.f32.xlu1 %v1841_v7  ;;  %vm1035_vm7 = vcmp.eq.f32.partialorder %v4757_v1, %v999_v28  ;;  %vm1036_vm1 = vcmp.eq.f32.partialorder %v4760_v32, %v999_v28  ;;  %v6288_v1 = vld [vmem:[#allocation85_spill] sm:$0xff]  ;;  %v6325_v7 = vld [vmem:[#allocation63_spill] sm:$0xff]  ;;  %v6327_v28 = vld [vmem:[#allocation12_spill] sm:$0xff] }
 0x33d   : > { %vm1067_vm15 = vmor %vm6283_vm14, %vm1035_vm7  ;;  %vm6293_vm7 = vcmp.ne.s32.totalorder %v6218_v53, %v6292_v33  ;;  %vm6294_vm14 = vcmp.ne.s32.totalorder %v6221_v23, %v6292_v33  ;;  %v6335_v33 = vld [vmem:[#allocation105_spill] sm:$0xff] }
 0x33e   : > { %vm1068_vm8 = vmor %vm6284_vm9, %vm1036_vm1 }
 0x33f   : > { %vm1482_vm13 = vmand %vm1067_vm15, %vm6286_vm2  ;;  %vm6299_vm2 = vnez %v6298_v34 }
 0x340   : > { %1839 = vadd.xlane.f32.xlu0 %v1838_v55  ;;  %vm1483_vm11 = vmand %vm1068_vm8, %vm6287_vm12  ;;  %v2478_v16 = vsel %vm1482_vm13, 1.0, %v2661_v59  ;;  %v1690_v13 = vsel %vm1482_vm13, %v6288_v1, 0.0  ;;  %vm6301_vm12 = vnez %v6300_v10  ;;  %v6333_v1 = vld [vmem:[#allocation104_spill] sm:$0xff] }
 0x341   : > { %v2479_v32 = vsel %vm1483_vm11, 1.0, %v2661_v59  ;;  %v1691_v9 = vsel %vm1483_vm11, %v6289_v36, 0.0  ;;  %2589 = vlog2.f32 %v6333_v1 }
 0x342   : > { %v1844_v17 = vadd.f32 %v2479_v32, %v2478_v16  ;;  %v5058_v14 = vadd.f32 %v1691_v9, %v1690_v13  ;;  %v6332_v16 = vld [vmem:[#allocation43_spill] sm:$0xff]  ;;  %v6334_v32 = vld [vmem:[#allocation42_spill] sm:$0xff]  ;;  %2591 = vlog2.f32 %v6335_v33 }
 0x343   : > { %v1002_v49 = vpop.xlane.xlu0 %1001 }
 0x344   : > { %1845 = vadd.xlane.f32.xlu2 %v1844_v17  ;;  %vm1037_vm3 = vcmp.eq.f32.partialorder %v4779_v50, %v1002_v49  ;;  %vm1038_vm5 = vcmp.eq.f32.partialorder %v4782_v20, %v1002_v49 }
 0x345   : > { %vm1069_vm4 = vmor %vm6290_vm0, %vm1037_vm3  ;;  %vm6303_vm3 = vcmp.ne.s32.totalorder %v6218_v53, %v6302_v42  ;;  %vm6304_vm0 = vcmp.ne.s32.totalorder %v6221_v23, %v6302_v42 }
 0x346   : > { %vm1070_vm10 = vmor %vm6291_vm6, %vm1038_vm5 }
 0x347   : > { %vm1484_vm1 = vmand %vm1069_vm4, %vm6293_vm7  ;;  %vm6309_vm7 = vnez %v6308_v30 }
 0x348   : > { %vm1485_vm15 = vmand %vm1070_vm10, %vm6294_vm14  ;;  %v2480_v6 = vsel %vm1484_vm1, 1.0, %v2661_v59  ;;  %v1692_v50 = vsel %vm1484_vm1, %v6295_v2, 0.0  ;;  %vm6311_vm14 = vnez %v6310_v35 }
 0x349   : > { %v2481_v20 = vsel %vm1485_vm15, 1.0, %v2661_v59  ;;  %v1693_v29 = vsel %vm1485_vm15, %v6296_v41, 0.0 }
 0x34a   : > { %v1847_v52 = vadd.f32 %v2481_v20, %v2480_v6  ;;  %v5076_v40 = vadd.f32 %v1693_v29, %v1692_v50 }
 0x34b   : > { %v1005_v54 = vpop.xlane.xlu1 %1004 }
 0x34c   : > { %1848 = vadd.xlane.f32.xlu0 %v1847_v52  ;;  %vm1039_vm9 = vcmp.eq.f32.partialorder %v4801_v12, %v1005_v54  ;;  %vm1040_vm8 = vcmp.eq.f32.partialorder %v6297_v22, %v1005_v54 }
 0x34d   : > { %vm1071_vm13 = vmor %vm6299_vm2, %vm1039_vm9  ;;  %vm6313_vm9 = vcmp.ne.s32.totalorder %v6218_v53, %v6312_v61  ;;  %vm6314_vm2 = vcmp.ne.s32.totalorder %v6221_v23, %v6312_v61 }
 0x34e   : > { %vm1072_vm11 = vmor %vm6301_vm12, %vm1040_vm8 }
 0x34f   : > { %vm1486_vm5 = vmand %vm1071_vm13, %vm6303_vm3  ;;  %vm6317_vm3 = vnez %v6206_v26 }
 0x350   : > { %vm1487_vm4 = vmand %vm1072_vm11, %vm6304_vm0  ;;  %v2482_v38 = vsel %vm1486_vm5, 1.0, %v2661_v59  ;;  %v1694_v12 = vsel %vm1486_vm5, %v6305_v58, 0.0  ;;  %vm6318_vm0 = vnez %v6210_v37 }
 0x351   : > { %v2483_v0 = vsel %vm1487_vm4, 1.0, %v2661_v59  ;;  %v1695_v46 = vsel %vm1487_vm4, %v6306_v21, 0.0 }
 0x352   : > { %v1850_v5 = vadd.f32 %v2483_v0, %v2482_v38  ;;  %v1738_v39 = vadd.f32 %v1695_v46, %v1694_v12  ;;  %v6336_v0 = vld [vmem:[#allocation106_spill] sm:$0xff] }
 0x353   : > { %v1008_v15 = vpop.xlane.xlu2 %1007 }
 0x354   : > { %1851 = vadd.xlane.f32.xlu1 %v1850_v5  ;;  %vm1041_vm6 = vcmp.eq.f32.partialorder %v4823_v19, %v1008_v15  ;;  %vm1042_vm10 = vcmp.eq.f32.partialorder %v6307_v56, %v1008_v15 }
 0x355   : > { %vm1073_vm1 = vmor %vm6309_vm7, %vm1041_vm6  ;;  %vm6320_vm6 = vcmp.ne.s32.totalorder %v6218_v53, %v6319_v8  ;;  %vm6321_vm7 = vcmp.ne.s32.totalorder %v6221_v23, %v6319_v8 }
 0x356   : > { %vm1074_vm15 = vmor %vm6311_vm14, %vm1042_vm10 }
 0x357   : > { %vm1488_vm8 = vmand %vm1073_vm1, %vm6313_vm9  ;;  %vm6326_vm9 = vnez %v6325_v7 }
 0x358   : > { %vm1489_vm13 = vmand %vm1074_vm15, %vm6314_vm2  ;;  %v2484_v62 = vsel %vm1488_vm8, 1.0, %v2661_v59  ;;  %v1696_v19 = vsel %vm1488_vm8, %v6315_v45, 0.0  ;;  %vm6328_vm2 = vnez %v6327_v28 }
 0x359   : > { %v2485_v44 = vsel %vm1489_vm13, 1.0, %v2661_v59  ;;  %v1697_v48 = vsel %vm1489_vm13, %v6316_v4, 0.0 }
 0x35a   : > { %v1853_v57 = vadd.f32 %v2485_v44, %v2484_v62  ;;  %v1741_v55 = vadd.f32 %v1697_v48, %v1696_v19 }
 0x35b   : > { %v1011_v24 = vpop.xlane.xlu0 %1010 }
 0x35c   : > { %1854 = vadd.xlane.f32.xlu2 %v1853_v57  ;;  %vm1043_vm12 = vcmp.eq.f32.partialorder %v4845_v47, %v1011_v24  ;;  %vm1044_vm11 = vcmp.eq.f32.partialorder %v4848_v11, %v1011_v24 }
 0x35d   : > { %vm1075_vm5 = vmor %vm6317_vm3, %vm1043_vm12  ;;  %vm6330_vm12 = vcmp.ne.s32.totalorder %v6218_v53, %v6329_v18  ;;  %vm6331_vm3 = vcmp.ne.s32.totalorder %v6221_v23, %v6329_v18  ;;  %v2590_v23 = vpop.eup %2589 }
 0x35e   : > { %vm1076_vm4 = vmor %vm6318_vm0, %vm1044_vm11  ;;  %v1639_v2 = vmul.f32 0.6931472, %v2590_v23  ;;  %v2592_v50 = vpop.eup %2591 }
 0x35f   : > { %vm1490_vm10 = vmand %vm1075_vm5, %vm6320_vm6  ;;  %v1641_v29 = vmul.f32 0.6931472, %v2592_v50  ;;  %v6338_v50 = vld [vmem:[#allocation112_spill] sm:$0xff] }
 0x360   : > { %vm1491_vm1 = vmand %vm1076_vm4, %vm6321_vm7  ;;  %v2486_v3 = vsel %vm1490_vm10, 1.0, %v2661_v59  ;;  %v1698_v47 = vsel %vm1490_vm10, %v6322_v31, 0.0 }
 0x361   : > { %v2487_v11 = vsel %vm1491_vm1, 1.0, %v2661_v59  ;;  %v1699_v26 = vsel %vm1491_vm1, %v6323_v43, 0.0 }
 0x362   : > { %v1856_v63 = vadd.f32 %v2487_v11, %v2486_v3  ;;  %v1744_v27 = vadd.f32 %v1699_v26, %v1698_v47  ;;  %v6337_v26 = vld [vmem:[#allocation109_spill] sm:$0xff] }
 0x363   : > { %v1014_v37 = vpop.xlane.xlu1 %1013 }
 0x364   : > { %1857 = vadd.xlane.f32.xlu0 %v1856_v63  ;;  %1730 = vadd.xlane.f32.xlu2 %v5040_v51  ;;  %vm1045_vm14 = vcmp.eq.f32.partialorder %v4869_v25, %v1014_v37  ;;  %vm1046_vm15 = vcmp.eq.f32.partialorder %v6324_v60, %v1014_v37  ;;  %v2199_v63 = vadd.s32 4294967288, %v6218_v53 }
 0x365   : > { %vm1077_vm8 = vmor %vm6326_vm9, %vm1045_vm14 }
 0x366   : > { %vm1078_vm13 = vmor %vm6328_vm2, %vm1046_vm15 }
 0x367   : > { %vm1492_vm11 = vmand %vm1077_vm8, %vm6330_vm12 }
 0x368   : > { %vm1493_vm5 = vmand %vm1078_vm13, %vm6331_vm3  ;;  %v2488_v51 = vsel %vm1492_vm11, 1.0, %v2661_v59  ;;  %v1700_v25 = vsel %vm1492_vm11, %v6332_v16, 0.0  ;;  %vm2201_vm11 = vcmask 130112  }
 0x369   : > { %v2489_v13 = vsel %vm1493_vm5, 1.0, %v2661_v59  ;;  %v1701_v36 = vsel %vm1493_vm5, %v6334_v32, 0.0 }
 0x36a   : > { %v1859_v9 = vadd.f32 %v2489_v13, %v2488_v51  ;;  %v1747_v17 = vadd.f32 %v1701_v36, %v1700_v25 }
 0x36b   : > { %v1704_v49 = vpop.xlane.xlu1 %1703 }
 0x36c   : > { %1860 = vadd.xlane.f32.xlu1 %v1859_v9  ;;  %1733 = vadd.xlane.f32.xlu0 %v5058_v14 }
 0x36d   : > { %1739 = vadd.xlane.f32.xlu2 %v1738_v39 }
 0x36f   : > { %v5146_v6 = vpop.xlane.xlu2 %1706 }
 0x373   : > { %v1816_v20 = vpop.xlane.xlu1 %1815 }
 0x374   : > { %1736 = vadd.xlane.f32.xlu1 %v5076_v40  ;;  %1742 = vadd.xlane.f32.xlu0 %v1741_v55  ;;  %vm1862_vm0 = vcmp.eq.f32.partialorder %v1816_v20, 0.0  ;;  %v1894_v59 = vmul.f32 %v1816_v20, %v1639_v2 }
 0x375   : > { %1748 = vadd.xlane.f32.xlu2 %v1747_v17  ;;  %v1878_v41 = vsel %vm1862_vm0, 1.0, %v1816_v20 }
 0x376   : > { %v1910_v52 = vsub.f32 %v1704_v49, %v1894_v59  ;;  %2593 = vrcp.f32 %v1878_v41  ;;  %v1935_v21 = vand.u32 2147483647, %v1878_v41  ;;  %v1937_v46 = vand.u32 2147483648, %v1878_v41 }
 0x377   : > { %v5149_v14 = vpop.xlane.xlu0 %1709  ;;  %v1819_v54 = vpop.xlane.xlu2 %1818  ;;  %vm1931_vm7 = vweird.f32 %v1878_v41  ;;  %v2203_v59 = vadd.s32 4294967280, %v6218_v53 }
 0x378   : > { %vm1863_vm4 = vcmp.eq.f32.partialorder %v1819_v54, 0.0  ;;  %v1895_v22 = vmul.f32 %v1819_v54, %v1641_v29  ;;  %vm1936_vm14 = vcmp.eq.f32.partialorder %v1935_v21, 8.507059e+37  ;;  %v1938_v61 = vor.u32 1.1754944e-38, %v1937_v46 }
 0x379   : > { %v1879_v34 = vsel %vm1863_vm4, 1.0, %v1819_v54 }
 0x37a   : > { %v1911_v10 = vsub.f32 %v5146_v6, %v1895_v22  ;;  %2595 = vrcp.f32 %v1879_v34  ;;  %v1952_v62 = vand.u32 2147483648, %v1879_v34  ;;  %v1950_v44 = vand.u32 2147483647, %v1879_v34 }
 0x37b   : > { %2597 = vlog2.f32 %v6336_v0  ;;  %vm1946_vm9 = vweird.f32 %v1879_v34 }
 0x37c   : > { %v2594_v42 = vpop.eup %2593  ;;  %1745 = vadd.xlane.f32.xlu1 %v1744_v27  ;;  %v1953_v8 = vor.u32 1.1754944e-38, %v1952_v62  ;;  %vm1951_vm2 = vcmp.eq.f32.partialorder %v1950_v44, 8.507059e+37  ;;  %v2207_v44 = vadd.s32 4294967272, %v6218_v53 }
 0x37d   : > { %v1927_v40 = vmul.f32 %v2594_v42, %v1878_v41  ;;  %vm1932_vm10 = vweird.f32 %v2594_v42 }
 0x37e   : > { %vm1933_vm1 = vmor %vm1931_vm7, %vm1932_vm10 }
 0x37f   : > { %v1928_v38 = vsub.f32 1.0, %v1927_v40  ;;  %v1822_v58 = vpop.xlane.xlu0 %1821 }
 0x380   : > { %v2596_v12 = vpop.eup %2595  ;;  %vm1864_vm6 = vcmp.eq.f32.partialorder %v1822_v58, 0.0 }
 0x381   : > { %v1929_v5 = vmul.f32 %v2594_v42, %v1928_v38  ;;  %v1942_v39 = vmul.f32 %v2596_v12, %v1879_v34  ;;  %v1880_v15 = vsel %vm1864_vm6, 1.0, %v1822_v58  ;;  %v5153_v56 = vpop.xlane.xlu1 %1712  ;;  %vm1947_vm15 = vweird.f32 %v2596_v12  ;;  %v2598_v4 = vpop.eup %2597 }
 0x382   : > { %2599 = vrcp.f32 %v1880_v15  ;;  %vm1948_vm8 = vmor %vm1946_vm9, %vm1947_vm15  ;;  %v1643_v3 = vmul.f32 0.6931472, %v2598_v4  ;;  %v1967_v51 = vand.u32 2147483648, %v1880_v15  ;;  %v1965_v1 = vand.u32 2147483647, %v1880_v15 }
 0x383   : > { %v1930_v30 = vadd.f32 %v2594_v42, %v1929_v5  ;;  %v1943_v35 = vsub.f32 1.0, %v1942_v39  ;;  %2601 = vlog2.f32 %v6337_v26  ;;  %vm1961_vm3 = vweird.f32 %v1880_v15 }
 0x384   : > { %v1896_v18 = vmul.f32 %v1822_v58, %v1643_v3  ;;  %v1968_v17 = vor.u32 1.1754944e-38, %v1967_v51  ;;  %vm1966_vm0 = vcmp.eq.f32.partialorder %v1965_v1, 8.507059e+37  ;;  %vm2205_vm6 = vcmask 195712  }
 0x385   : > { %v1934_v45 = vsel %vm1933_vm1, %v2594_v42, %v1930_v30  ;;  %v1944_v19 = vmul.f32 %v2596_v12, %v1943_v35 }
 0x386   : > { %v1939_v48 = vsel %vm1936_vm14, %v1938_v61, %v1934_v45  ;;  %v1912_v33 = vsub.f32 %v5149_v14, %v1896_v18 }
 0x387   : > { %v1940_v57 = vmul.f32 %v1939_v48, %v1910_v52  ;;  %v1945_v55 = vadd.f32 %v2596_v12, %v1944_v19 }
 0x388   : > { %v2600_v24 = vpop.eup %2599 }
 0x389   : > { %v1949_v31 = vsel %vm1948_vm8, %v2596_v12, %v1945_v55  ;;  %v1957_v47 = vmul.f32 %v2600_v24, %v1880_v15  ;;  %v1825_v11 = vpop.xlane.xlu1 %1824  ;;  %v5155_v43 = vpop.xlane.xlu2 %1715  ;;  %v2166_v37 = vmul.f32 -1.0, %v1940_v57  ;;  %vm1962_vm12 = vweird.f32 %v2600_v24  ;;  %v6339_v57 = vld [vmem:[#allocation118_spill] sm:$0xff] }
 0x38a   : > { %v1954_v27 = vsel %vm1951_vm2, %v1953_v8, %v1949_v31  ;;  %vm1865_vm13 = vcmp.eq.f32.partialorder %v1825_v11, 0.0  ;;  %v2602_v9 = vpop.eup %2601  ;;  %vm1963_vm5 = vmor %vm1961_vm3, %vm1962_vm12  ;;  %vm2209_vm8 = vcmask 261312   ;;  %v6340_v31 = vld [vmem:[#allocation115_spill] sm:$0xff] }
 0x38b   : > { %v1955_v60 = vmul.f32 %v1954_v27, %v1911_v10  ;;  %v1958_v7 = vsub.f32 1.0, %v1957_v47  ;;  %v1881_v28 = vsel %vm1865_vm13, 1.0, %v1825_v11  ;;  %v2198_v13 = vperm.slane %v2166_v37, %v6218_v53  ;;  %v6341_v27 = vld [vmem:[#allocation121_spill] sm:$0xff] }
 0x38c   : > { %2603 = vrcp.f32 %v1881_v28  ;;  %v1645_v54 = vmul.f32 0.6931472, %v2602_v9  ;;  %v1982_v14 = vand.u32 2147483648, %v1881_v28  ;;  %v1980_v38 = vand.u32 2147483647, %v1881_v28 }
 0x38d   : > { %v2167_v16 = vmul.f32 -1.0, %v1955_v60  ;;  %v1959_v25 = vmul.f32 %v2600_v24, %v1958_v7  ;;  %2605 = vlog2.f32 %v6338_v50  ;;  %vm1976_vm7 = vweird.f32 %v1881_v28 }
 0x38e   : > { %v1897_v10 = vmul.f32 %v1825_v11, %v1645_v54  ;;  %v1983_v15 = vor.u32 1.1754944e-38, %v1982_v14  ;;  %vm1981_vm15 = vcmp.eq.f32.partialorder %v1980_v38, 8.507059e+37 }
 0x38f   : > { %v2200_v32 = vperm.slane %v2167_v16, %v2199_v63  ;;  %v1960_v36 = vadd.f32 %v2600_v24, %v1959_v25  ;;  %v2211_v25 = vadd.s32 4294967264, %v6218_v53 }
 0x390   : > { %v1913_v39 = vsub.f32 %v5153_v56, %v1897_v10 }
 0x391   : > { %v2202_v49 = vsel %vm2201_vm11, %v2200_v32, %v2198_v13  ;;  %v1964_v23 = vsel %vm1963_vm5, %v2600_v24, %v1960_v36  ;;  %v1828_v6 = vpop.xlane.xlu2 %1827  ;;  %vm2213_vm5 = vcmask 326912  }
 0x392   : > { %v2604_v2 = vpop.eup %2603  ;;  %v1969_v20 = vsel %vm1966_vm0, %v1968_v17, %v1964_v23  ;;  %vm1866_vm4 = vcmp.eq.f32.partialorder %v1828_v6, 0.0 }
 0x393   : > { %v1970_v41 = vmul.f32 %v1969_v20, %v1912_v33  ;;  %v1972_v29 = vmul.f32 %v2604_v2, %v1881_v28  ;;  %v1882_v52 = vsel %vm1866_vm4, 1.0, %v1828_v6  ;;  %vm1977_vm10 = vweird.f32 %v2604_v2  ;;  %v2606_v58 = vpop.eup %2605 }
 0x394   : > { %2607 = vrcp.f32 %v1882_v52  ;;  %vm1978_vm1 = vmor %vm1976_vm7, %vm1977_vm10  ;;  %v1647_v45 = vmul.f32 0.6931472, %v2606_v58  ;;  %v1997_v55 = vand.u32 2147483648, %v1882_v52  ;;  %v1995_v3 = vand.u32 2147483647, %v1882_v52 }
 0x395   : > { %v2168_v22 = vmul.f32 -1.0, %v1970_v41  ;;  %v1973_v34 = vsub.f32 1.0, %v1972_v29  ;;  %vm1991_vm2 = vweird.f32 %v1882_v52 }
 0x396   : > { %v1898_v56 = vmul.f32 %v1828_v6, %v1647_v45  ;;  %v1998_v60 = vor.u32 1.1754944e-38, %v1997_v55  ;;  %vm1996_vm11 = vcmp.eq.f32.partialorder %v1995_v3, 8.507059e+37 }
 0x397   : > { %v2204_v42 = vperm.slane %v2168_v22, %v2203_v59  ;;  %v1974_v40 = vmul.f32 %v2604_v2, %v1973_v34 }
 0x398   : > { %v1914_v37 = vsub.f32 %v5155_v43, %v1898_v56 }
 0x399   : > { %v2206_v12 = vsel %vm2205_vm6, %v2204_v42, %v2202_v49  ;;  %v1975_v0 = vadd.f32 %v2604_v2, %v1974_v40  ;;  %v1834_v21 = vpop.xlane.xlu1 %1833  ;;  %v5163_v46 = vpop.xlane.xlu2 %1721  ;;  %v6342_v42 = vld [vmem:[#allocation124_spill] sm:$0xff] }
 0x39a   : > { %v2608_v5 = vpop.eup %2607  ;;  %vm1868_vm14 = vcmp.eq.f32.partialorder %v1834_v21, 0.0 }
 0x39b   : > { %v1979_v30 = vsel %vm1978_vm1, %v2604_v2, %v1975_v0  ;;  %v1987_v35 = vmul.f32 %v2608_v5, %v1882_v52  ;;  %v5166_v61 = vsel %vm1868_vm14, 1.0, %v1834_v21  ;;  %v5168_v62 = vpop.xlane.xlu0 %1718  ;;  %vm1992_vm9 = vweird.f32 %v2608_v5 }
 0x39c   : > { %v1984_v19 = vsel %vm1981_vm15, %v1983_v15, %v1979_v30  ;;  %2609 = vrcp.f32 %v5166_v61  ;;  %vm1993_vm13 = vmor %vm1991_vm2, %vm1992_vm9  ;;  %v2027_v20 = vand.u32 2147483648, %v5166_v61  ;;  %vm2021_vm4 = vweird.f32 %v5166_v61 }
 0x39d   : > { %v1985_v4 = vmul.f32 %v1984_v19, %v1913_v39  ;;  %v1988_v48 = vsub.f32 1.0, %v1987_v35  ;;  %2611 = vlog2.f32 %v6339_v57  ;;  %v2025_v34 = vand.u32 2147483647, %v5166_v61 }
 0x39e   : > { %2613 = vlog2.f32 %v6340_v31  ;;  %v2028_v0 = vor.u32 1.1754944e-38, %v2027_v20 }
 0x39f   : > { %v2169_v24 = vmul.f32 -1.0, %v1985_v4  ;;  %v1989_v8 = vmul.f32 %v2608_v5, %v1988_v48  ;;  %2615 = vlog2.f32 %v6341_v27  ;;  %vm2026_vm10 = vcmp.eq.f32.partialorder %v2025_v34, 8.507059e+37 }
 0x3a1   : > { %v2208_v47 = vperm.slane %v2169_v24, %v2207_v44  ;;  %v1990_v11 = vadd.f32 %v2608_v5, %v1989_v8  ;;  %v1837_v26 = vpop.xlane.xlu2 %1836 }
 0x3a2   : > { %v2610_v63 = vpop.eup %2609  ;;  %vm1869_vm12 = vcmp.eq.f32.partialorder %v1837_v26, 0.0 }
 0x3a3   : > { %v2210_v7 = vsel %vm2209_vm8, %v2208_v47, %v2206_v12  ;;  %v1994_v28 = vsel %vm1993_vm13, %v2608_v5, %v1990_v11  ;;  %v2017_v18 = vmul.f32 %v2610_v63, %v5166_v61  ;;  %v1831_v51 = vpop.xlane.xlu0 %1830  ;;  %v2612_v16 = vpop.eup %2611  ;;  %v1885_v13 = vsel %vm1869_vm12, 1.0, %v1837_v26 }
 0x3a4   : > { %v1999_v1 = vsel %vm1996_vm11, %v1998_v60, %v1994_v28  ;;  %vm1867_vm3 = vcmp.eq.f32.partialorder %v1831_v51, 0.0  ;;  %2617 = vrcp.f32 %v1885_v13  ;;  %v2614_v43 = vpop.eup %2613  ;;  %v1651_v17 = vmul.f32 0.6931472, %v2612_v16 }
 0x3a5   : > { %v2000_v32 = vmul.f32 %v1999_v1, %v1914_v37  ;;  %v2018_v36 = vsub.f32 1.0, %v2017_v18  ;;  %v5178_v9 = vsel %vm1867_vm3, 1.0, %v1831_v51  ;;  %v2616_v23 = vpop.eup %2615  ;;  %vm2022_vm0 = vweird.f32 %v2610_v63 }
 0x3a6   : > { %2619 = vrcp.f32 %v5178_v9  ;;  %v1900_v2 = vmul.f32 %v1834_v21, %v1651_v17  ;;  %v1649_v22 = vmul.f32 0.6931472, %v2614_v43  ;;  %v1653_v14 = vmul.f32 0.6931472, %v2616_v23  ;;  %vm5189_vm6 = vmor %vm2021_vm4, %vm2022_vm0 }
 0x3a7   : > { %v2170_v49 = vmul.f32 -1.0, %v2000_v32  ;;  %v2019_v33 = vmul.f32 %v2610_v63, %v2018_v36  ;;  %v5182_v59 = vpop.xlane.xlu1 %1727  ;;  %2621 = vlog2.f32 %v6342_v42  ;;  %v2012_v15 = vand.u32 2147483648, %v5178_v9 }
 0x3a8   : > { %v1916_v38 = vsub.f32 %v5163_v46, %v1900_v2  ;;  %v1899_v21 = vmul.f32 %v1831_v51, %v1649_v22  ;;  %v2040_v30 = vand.u32 2147483647, %v1885_v13  ;;  %v2042_v35 = vand.u32 2147483648, %v1885_v13  ;;  %v6345_v22 = vld [vmem:[#allocation128_spill] sm:$0xff] }
 0x3a9   : > { %v2212_v6 = vperm.slane %v2170_v49, %v2211_v25  ;;  %v2020_v50 = vadd.f32 %v2610_v63, %v2019_v33  ;;  %v1901_v61 = vmul.f32 %v1837_v26, %v1653_v14  ;;  %v2010_v46 = vand.u32 2147483647, %v5178_v9  ;;  %v6346_v14 = vld [vmem:[#allocation130_spill] sm:$0xff] }
 0x3aa   : > { %v2618_v41 = vpop.eup %2617  ;;  %v1915_v4 = vsub.f32 %v5168_v62, %v1899_v21  ;;  %vm2006_vm14 = vweird.f32 %v5178_v9  ;;  %vm2036_vm15 = vweird.f32 %v1885_v13  ;;  %v2013_v55 = vor.u32 1.1754944e-38, %v2012_v15  ;;  %v6348_v21 = vld [vmem:[#allocation133_spill] sm:$0xff] }
 0x3ab   : > { %v5184_v29 = vsel %vm2213_vm5, %v2212_v6, %v2210_v7  ;;  %v1725_v52 = vpop.xlane.xlu0 %1724  ;;  %v2032_v10 = vmul.f32 %v2618_v41, %v1885_v13  ;;  %v2024_v12 = vsel %vm5189_vm6, %v2610_v63, %v2020_v50  ;;  %vm2037_vm7 = vweird.f32 %v2618_v41 }
 0x3ac   : > { %v2620_v54 = vpop.eup %2619  ;;  %v2029_v19 = vsel %vm2026_vm10, %v2028_v0, %v2024_v12  ;;  %vm2038_vm9 = vmor %vm2036_vm15, %vm2037_vm7  ;;  %vm2041_vm8 = vcmp.eq.f32.partialorder %v2040_v30, 8.507059e+37  ;;  %v2043_v24 = vor.u32 1.1754944e-38, %v2042_v35  ;;  %v1917_v31 = vsub.f32 %v1725_v52, %v1901_v61  ;;  %v6349_v35 = vld [vmem:[#allocation2_spill] sm:$0xff] }
 0x3ad   : > { %v2002_v58 = vmul.f32 %v2620_v54, %v5178_v9  ;;  %v2033_v5 = vsub.f32 1.0, %v2032_v10  ;;  %vm2007_vm1 = vweird.f32 %v2620_v54  ;;  %v2622_v57 = vpop.eup %2621  ;;  %v2030_v3 = vmul.f32 %v2029_v19, %v1916_v38 }
 0x3ae   : > { %vm2008_vm2 = vmor %vm2006_vm14, %vm2007_vm1  ;;  %vm2011_vm12 = vcmp.eq.f32.partialorder %v2010_v46, 8.507059e+37  ;;  %v2215_v60 = vadd.s32 4294967256, %v6218_v53  ;;  %v2223_v28 = vadd.s32 4294967240, %v6218_v53  ;;  %v2219_v18 = vadd.s32 4294967248, %v6218_v53 }
 0x3af   : > { %v2003_v39 = vsub.f32 1.0, %v2002_v58  ;;  %v2034_v45 = vmul.f32 %v2618_v41, %v2033_v5  ;;  %v5201_v11 = vpop.xlane.xlu1 %1842  ;;  %v2172_v51 = vmul.f32 -1.0, %v2030_v3  ;;  %vm2217_vm3 = vcmask 392512   ;;  %v6347_v58 = vld [vmem:[#allocation132_spill] sm:$0xff] }
 0x3b0   : > { %vm1871_vm11 = vcmp.eq.f32.partialorder %v5201_v11, 0.0  ;;  %vm2221_vm5 = vcmask 458112   ;;  %vm2225_vm0 = vcmask 523712   ;;  %v1655_v23 = vmul.f32 0.6931472, %v2622_v57 }
 0x3b1   : > { %v2004_v44 = vmul.f32 %v2620_v54, %v2003_v39  ;;  %v2035_v48 = vadd.f32 %v2618_v41, %v2034_v45  ;;  %v5208_v1 = vsel %vm1871_vm11, 1.0, %v5201_v11  ;;  %v2220_v43 = vperm.slane %v2172_v51, %v2219_v18  ;;  %v6350_v45 = vld [vmem:[#allocation30_spill] sm:$0xff] }
 0x3b2   : > { %v2227_v5 = vadd.s32 4294967232, %v6218_v53  ;;  %v2070_v18 = vand.u32 2147483647, %v5208_v1  ;;  %v2072_v51 = vand.u32 2147483648, %v5208_v1 }
 0x3b3   : > { %v2005_v56 = vadd.f32 %v2620_v54, %v2004_v44  ;;  %v1840_v8 = vpop.xlane.xlu0 %1839  ;;  %v2039_v47 = vsel %vm2038_vm9, %v2618_v41, %v2035_v48  ;;  %vm2229_vm9 = vcmask 589312  }
 0x3b4   : > { %vm1870_vm13 = vcmp.eq.f32.partialorder %v1840_v8, 0.0  ;;  %v2044_v62 = vsel %vm2041_vm8, %v2043_v24, %v2039_v47  ;;  %v1902_v41 = vmul.f32 %v1840_v8, %v1655_v23  ;;  %vm5287_vm11 = vcmp.eq.f32.partialorder %v2070_v18, 8.507059e+37 }
 0x3b5   : > { %v2009_v26 = vsel %vm2008_vm2, %v2620_v54, %v2005_v56  ;;  %v1886_v63 = vsel %vm1870_vm13, 1.0, %v1840_v8  ;;  %v2045_v37 = vmul.f32 %v2044_v62, %v1917_v31  ;;  %v6351_v56 = vld [vmem:[#allocation3_spill] sm:$0xff]  ;;  %vm2066_vm13 = vweird.f32 %v5208_v1 }
 0x3b6   : > { %v2014_v27 = vsel %vm2011_vm12, %v2013_v55, %v2009_v26  ;;  %2623 = vrcp.f32 %v1886_v63  ;;  %v2057_v50 = vand.u32 2147483648, %v1886_v63  ;;  %v2055_v54 = vand.u32 2147483647, %v1886_v63 }
 0x3b7   : > { %v2015_v7 = vmul.f32 %v2014_v27, %v1915_v4  ;;  %v2173_v16 = vmul.f32 -1.0, %v2045_v37  ;;  %v5210_v13 = vpop.xlane.xlu2 %1845  ;;  %2625 = vrcp.f32 %v5208_v1  ;;  %vm2051_vm10 = vweird.f32 %v1886_v63 }
 0x3b8   : > { %vm1872_vm4 = vcmp.eq.f32.partialorder %v5210_v13, 0.0  ;;  %2627 = vlog2.f32 %v6345_v22  ;;  %v2058_v42 = vor.u32 1.1754944e-38, %v2057_v50  ;;  %v1918_v40 = vsub.f32 %v5182_v59, %v1902_v41 }
 0x3b9   : > { %v2171_v25 = vmul.f32 -1.0, %v2015_v7  ;;  %v2224_v36 = vperm.slane %v2173_v16, %v2223_v28  ;;  %v5216_v20 = vsel %vm1872_vm4, 1.0, %v5210_v13  ;;  %vm2056_vm1 = vcmp.eq.f32.partialorder %v2055_v54, 8.507059e+37 }
 0x3ba   : > { %2629 = vrcp.f32 %v5216_v20  ;;  %v2239_v22 = vadd.s32 4294967208, %v6218_v53 }
 0x3bb   : > { %v2216_v32 = vperm.slane %v2171_v25, %v2215_v60  ;;  %2631 = vlog2.f32 %v6346_v14 }
 0x3bc   : > { %v2624_v9 = vpop.eup %2623  ;;  %2633 = vlog2.f32 %v6347_v58 }
 0x3bd   : > { %v2218_v17 = vsel %vm2217_vm3, %v2216_v32, %v5184_v29  ;;  %v2047_v49 = vmul.f32 %v2624_v9, %v1886_v63  ;;  %vm2052_vm6 = vweird.f32 %v2624_v9  ;;  %v5221_v34 = vpop.eup %2625  ;;  %2635 = vlog2.f32 %v6348_v21 }
 0x3be   : > { %v2222_v33 = vsel %vm2221_vm5, %v2220_v43, %v2218_v17  ;;  %vm2053_vm7 = vmor %vm2051_vm10, %vm2052_vm6  ;;  %v2062_v12 = vmul.f32 %v5221_v34, %v5208_v1  ;;  %v2628_v30 = vpop.eup %2627  ;;  %2637 = vlog2.f32 %v6349_v35  ;;  %vm2067_vm2 = vweird.f32 %v5221_v34 }
 0x3bf   : > { %v2226_v6 = vsel %vm2225_vm0, %v2224_v36, %v2222_v33  ;;  %v2048_v2 = vsub.f32 1.0, %v2047_v49  ;;  %v5219_v29 = vpop.xlane.xlu0 %1848  ;;  %2639 = vlog2.f32 %v6350_v45  ;;  %v1657_v63 = vmul.f32 0.6931472, %v2628_v30  ;;  %vm5283_vm12 = vmor %vm2066_vm13, %vm2067_vm2 }
 0x3c0   : > { %vm1873_vm14 = vcmp.eq.f32.partialorder %v5219_v29, 0.0  ;;  %v5239_v61 = vpop.eup %2629  ;;  %v2063_v4 = vsub.f32 1.0, %v2062_v12  ;;  %v2085_v32 = vand.u32 2147483647, %v5216_v20  ;;  %v2087_v17 = vand.u32 2147483648, %v5216_v20 }
 0x3c1   : > { %v2049_v52 = vmul.f32 %v2624_v9, %v2048_v2  ;;  %v5236_v59 = vsel %vm1873_vm14, 1.0, %v5219_v29  ;;  %v2632_v46 = vpop.eup %2631  ;;  %v2077_v55 = vmul.f32 %v5239_v61, %v5216_v20  ;;  %v1903_v2 = vmul.f32 %v5201_v11, %v1657_v63 }
 0x3c2   : > { %v2634_v57 = vpop.eup %2633  ;;  %v2064_v31 = vmul.f32 %v5221_v34, %v2063_v4  ;;  %v1659_v27 = vmul.f32 0.6931472, %v2632_v46  ;;  %vm2081_vm3 = vweird.f32 %v5216_v20  ;;  %vm5296_vm5 = vcmp.eq.f32.partialorder %v2085_v32, 8.507059e+37 }
 0x3c3   : > { %v2050_v10 = vadd.f32 %v2624_v9, %v2049_v52  ;;  %v2636_v24 = vpop.eup %2635  ;;  %v2078_v37 = vsub.f32 1.0, %v2077_v55  ;;  %v1661_v7 = vmul.f32 0.6931472, %v2634_v57  ;;  %v2073_v52 = vor.u32 1.1754944e-38, %v2072_v51 }
 0x3c4   : > { %v2638_v3 = vpop.eup %2637  ;;  %v2065_v25 = vadd.f32 %v5221_v34, %v2064_v31  ;;  %v1663_v36 = vmul.f32 0.6931472, %v2636_v24  ;;  %v1904_v1 = vmul.f32 %v5210_v13, %v1659_v27  ;;  %vm2082_vm0 = vweird.f32 %v5239_v61 }
 0x3c5   : > { %v2054_v38 = vsel %vm2053_vm7, %v2624_v9, %v2050_v10  ;;  %v2640_v47 = vpop.eup %2639  ;;  %v5269_v9 = vmul.f32 0.6931472, %v2638_v3  ;;  %v2079_v23 = vmul.f32 %v5239_v61, %v2078_v37  ;;  %v2100_v35 = vand.u32 2147483647, %v5236_v59  ;;  %vm5325_vm10 = vmor %vm2081_vm3, %vm2082_vm0 }
 0x3c6   : > { %v2059_v0 = vsel %vm2056_vm1, %v2058_v42, %v2054_v38  ;;  %v5274_v49 = vmul.f32 0.6931472, %v2640_v47  ;;  %v2069_v54 = vsel %vm5283_vm12, %v5221_v34, %v2065_v25  ;;  %v2088_v42 = vor.u32 1.1754944e-38, %v2087_v17 }
 0x3c7   : > { %v2060_v39 = vmul.f32 %v2059_v0, %v1918_v40  ;;  %v5232_v15 = vpop.xlane.xlu1 %1851  ;;  %v2102_v40 = vand.u32 2147483648, %v5236_v59  ;;  %v2080_v58 = vadd.f32 %v5239_v61, %v2079_v23  ;;  %v2074_v21 = vsel %vm5287_vm11, %v2073_v52, %v2069_v54 }
 0x3c8   : > { %vm1874_vm15 = vcmp.eq.f32.partialorder %v5232_v15, 0.0  ;;  %vm2233_vm6 = vcmask 654912   ;;  %vm2096_vm7 = vweird.f32 %v5236_v59  ;;  %v1906_v20 = vmul.f32 %v5232_v15, %v1663_v36 }
 0x3c9   : > { %v2174_v19 = vmul.f32 -1.0, %v2060_v39  ;;  %v5243_v44 = vsel %vm1874_vm15, 1.0, %v5232_v15  ;;  %v2231_v39 = vadd.s32 4294967224, %v6218_v53  ;;  %v2084_v4 = vsel %vm5325_vm10, %v5239_v61, %v2080_v58 }
 0x3ca   : > { %2641 = vrcp.f32 %v5243_v44  ;;  %v2103_v57 = vor.u32 1.1754944e-38, %v2102_v40  ;;  %v2115_v55 = vand.u32 2147483647, %v5243_v44  ;;  %v2117_v24 = vand.u32 2147483648, %v5243_v44 }
 0x3cb   : > { %v2228_v48 = vperm.slane %v2174_v19, %v2227_v5  ;;  %2643 = vrcp.f32 %v5236_v59  ;;  %v5316_v5 = vmul.f32 %v5219_v29, %v1661_v7  ;;  %vm2237_vm1 = vcmask 720512  }
 0x3cc   : > { %2645 = vlog2.f32 %v6351_v56  ;;  %v2235_v56 = vadd.s32 4294967216, %v6218_v53  ;;  %vm2111_vm14 = vweird.f32 %v5243_v44  ;;  %vm5340_vm15 = vcmp.eq.f32.partialorder %v2100_v35, 8.507059e+37 }
 0x3cd   : > { %v5250_v8 = vsel %vm2229_vm9, %v2228_v48, %v2226_v6  ;;  %v2089_v15 = vsel %vm5296_vm5, %v2088_v42, %v2084_v4  ;;  %vm5363_vm13 = vcmp.eq.f32.partialorder %v2115_v55, 8.507059e+37  ;;  %vm2241_vm0 = vcmask 786112  }
 0x3ce   : > { %v2251_v17 = vadd.s32 4294967184, %v6218_v53 }
 0x3cf   : > { %v5253_v26 = vpop.xlane.xlu2 %1854 }
 0x3d0   : > { %v5255_v62 = vpop.eup %2641  ;;  %vm1875_vm8 = vcmp.eq.f32.partialorder %v5253_v26, 0.0 }
 0x3d1   : > { %v5258_v60 = vpop.eup %2643  ;;  %v5261_v28 = vsel %vm1875_vm8, 1.0, %v5253_v26  ;;  %v2107_v43 = vmul.f32 %v5255_v62, %v5243_v44  ;;  %vm2112_vm9 = vweird.f32 %v5255_v62 }
 0x3d2   : > { %v2646_v16 = vpop.eup %2645  ;;  %2647 = vrcp.f32 %v5261_v28  ;;  %v2092_v33 = vmul.f32 %v5258_v60, %v5236_v59  ;;  %vm2097_vm8 = vweird.f32 %v5258_v60  ;;  %vm5370_vm12 = vmor %vm2111_vm14, %vm2112_vm9  ;;  %v2132_v41 = vand.u32 2147483648, %v5261_v28 }
 0x3d3   : > { %v5280_v6 = vmul.f32 0.6931472, %v2646_v16  ;;  %v2108_v11 = vsub.f32 1.0, %v2107_v43  ;;  %v2118_v43 = vor.u32 1.1754944e-38, %v2117_v24  ;;  %vm5383_vm3 = vmor %vm2096_vm7, %vm2097_vm8  ;;  %vm2126_vm5 = vweird.f32 %v5261_v28 }
 0x3d4   : > { %v2093_v34 = vsub.f32 1.0, %v2092_v33  ;;  %v1907_v59 = vmul.f32 %v5253_v26, %v5269_v9  ;;  %v2247_v9 = vadd.s32 4294967192, %v6218_v53  ;;  %v2133_v58 = vor.u32 1.1754944e-38, %v2132_v41 }
 0x3d5   : > { %v2109_v29 = vmul.f32 %v5255_v62, %v2108_v11 }
 0x3d6   : > { %v2094_v48 = vmul.f32 %v5258_v60, %v2093_v34 }
 0x3d7   : > { %v5300_v10 = vpop.xlane.xlu0 %1857  ;;  %v1731_v14 = vpop.xlane.xlu2 %1730  ;;  %v2110_v27 = vadd.f32 %v5255_v62, %v2109_v29 }
 0x3d8   : > { %v5304_v38 = vpop.eup %2647  ;;  %vm1876_vm4 = vcmp.eq.f32.partialorder %v5300_v10, 0.0  ;;  %v1919_v13 = vsub.f32 %v1731_v14, %v1903_v2  ;;  %v2095_v16 = vadd.f32 %v5258_v60, %v2094_v48 }
 0x3d9   : > { %v2122_v12 = vmul.f32 %v5304_v38, %v5261_v28  ;;  %v5311_v0 = vsel %vm1876_vm4, 1.0, %v5300_v10  ;;  %vm2127_vm11 = vweird.f32 %v5304_v38  ;;  %v2114_v2 = vsel %vm5370_vm12, %v5255_v62, %v2110_v27 }
 0x3da   : > { %2649 = vrcp.f32 %v5311_v0  ;;  %v2075_v30 = vmul.f32 %v2074_v21, %v1919_v13  ;;  %v2099_v54 = vsel %vm5383_vm3, %v5258_v60, %v2095_v16  ;;  %v2130_v62 = vand.u32 2147483647, %v5261_v28  ;;  %vm5397_vm4 = vmor %vm2126_vm5, %vm2127_vm11 }
 0x3db   : > { %v2123_v45 = vsub.f32 1.0, %v2122_v12  ;;  %v2119_v60 = vsel %vm5363_vm13, %v2118_v43, %v2114_v2  ;;  %v2104_v26 = vsel %vm5340_vm15, %v2103_v57, %v2099_v54  ;;  %v2147_v19 = vand.u32 2147483648, %v5311_v0 }
 0x3dc   : > { %v2175_v46 = vmul.f32 -1.0, %v2075_v30  ;;  %vm2131_vm10 = vcmp.eq.f32.partialorder %v2130_v62, 8.507059e+37  ;;  %vm2141_vm14 = vweird.f32 %v5311_v0  ;;  %vm2253_vm11 = vcmask 982912  }
 0x3dd   : > { %v2124_v61 = vmul.f32 %v5304_v38, %v2123_v45  ;;  %v2145_v45 = vand.u32 2147483647, %v5311_v0  ;;  %vm2257_vm3 = vcmask 1048512  }
 0x3de   : > { %v2232_v3 = vperm.slane %v2175_v46, %v2231_v39 }
 0x3df   : > { %v5345_v47 = vpop.xlane.xlu1 %1860  ;;  %v1734_v63 = vpop.xlane.xlu0 %1733  ;;  %v2125_v33 = vadd.f32 %v5304_v38, %v2124_v61  ;;  %vm5426_vm8 = vcmp.eq.f32.partialorder %v2145_v45, 8.507059e+37 }
 0x3e0   : > { %v5352_v37 = vpop.eup %2649  ;;  %v2234_v7 = vsel %vm2233_vm6, %v2232_v3, %v5250_v8  ;;  %vm1877_vm2 = vcmp.eq.f32.partialorder %v5345_v47, 0.0  ;;  %v1920_v18 = vsub.f32 %v1734_v63, %v1904_v1  ;;  %v1740_v51 = vpop.xlane.xlu2 %1739  ;;  %v2243_v1 = vadd.s32 4294967200, %v6218_v53 }
 0x3e1   : > { %v2137_v25 = vmul.f32 %v5352_v37, %v5311_v0  ;;  %v5361_v32 = vsel %vm1877_vm2, 1.0, %v5345_v47  ;;  %v1922_v50 = vsub.f32 %v1740_v51, %v1906_v20  ;;  %vm2245_vm6 = vcmask 851712  }
 0x3e2   : > { %2651 = vrcp.f32 %v5361_v32  ;;  %v2090_v8 = vmul.f32 %v2089_v15, %v1920_v18  ;;  %v2129_v28 = vsel %vm5397_vm4, %v5304_v38, %v2125_v33  ;;  %vm2142_vm7 = vweird.f32 %v5352_v37 }
 0x3e3   : > { %v2138_v23 = vsub.f32 1.0, %v2137_v25  ;;  %v2120_v40 = vmul.f32 %v2119_v60, %v1922_v50  ;;  %v2134_v35 = vsel %vm2131_vm10, %v2133_v58, %v2129_v28  ;;  %v2162_v55 = vand.u32 2147483648, %v5361_v32  ;;  %vm5422_vm9 = vmor %vm2141_vm14, %vm2142_vm7 }
 0x3e4   : > { %v2176_v52 = vmul.f32 -1.0, %v2090_v8  ;;  %v1908_v3 = vmul.f32 %v5300_v10, %v5274_v49  ;;  %v1909_v15 = vmul.f32 %v5345_v47, %v5280_v6  ;;  %vm2156_vm2 = vweird.f32 %v5361_v32 }
 0x3e5   : > { %v2139_v42 = vmul.f32 %v5352_v37, %v2138_v23  ;;  %v2178_v57 = vmul.f32 -1.0, %v2120_v40  ;;  %v2163_v6 = vor.u32 1.1754944e-38, %v2162_v55  ;;  %v2255_v23 = vadd.s32 4294967176, %v6218_v53 }
 0x3e6   : > { %v2236_v14 = vperm.slane %v2176_v52, %v2235_v56 }
 0x3e7   : > { %v1737_v34 = vpop.xlane.xlu1 %1736  ;;  %v1743_v13 = vpop.xlane.xlu0 %1742  ;;  %v2140_v4 = vadd.f32 %v5352_v37, %v2139_v42  ;;  %v2244_v18 = vperm.slane %v2178_v57, %v2243_v1 }
 0x3e8   : > { %v2652_v12 = vpop.eup %2651  ;;  %v2238_v21 = vsel %vm2237_vm1, %v2236_v14, %v2234_v7  ;;  %v1921_v39 = vsub.f32 %v1737_v34, %v5316_v5  ;;  %v1923_v30 = vsub.f32 %v1743_v13, %v1907_v59  ;;  %vm2249_vm1 = vcmask 917312   ;;  %v1749_v27 = vpop.xlane.xlu2 %1748 }
 0x3e9   : > { %v2152_v38 = vmul.f32 %v2652_v12, %v5361_v32  ;;  %v2160_v5 = vand.u32 2147483647, %v5361_v32  ;;  %vm2157_vm15 = vweird.f32 %v2652_v12  ;;  %v2144_v0 = vsel %vm5422_vm9, %v5352_v37, %v2140_v4 }
 0x3ea   : > { %v2105_v29 = vmul.f32 %v2104_v26, %v1921_v39  ;;  %v2135_v46 = vmul.f32 %v2134_v35, %v1923_v30  ;;  %v2148_v7 = vor.u32 1.1754944e-38, %v2147_v19  ;;  %vm2158_vm12 = vmor %vm2156_vm2, %vm2157_vm15  ;;  %v1925_v36 = vsub.f32 %v1749_v27, %v1909_v15 }
 0x3eb   : > { %v2153_v48 = vsub.f32 1.0, %v2152_v38  ;;  %vm2161_vm13 = vcmp.eq.f32.partialorder %v2160_v5, 8.507059e+37 }
 0x3ec   : > { %v2177_v56 = vmul.f32 -1.0, %v2105_v29  ;;  %v2179_v20 = vmul.f32 -1.0, %v2135_v46  ;;  %v2149_v43 = vsel %vm5426_vm8, %v2148_v7, %v2144_v0 }
 0x3ed   : > { %v2154_v24 = vmul.f32 %v2652_v12, %v2153_v48 }
 0x3ee   : > { %v2240_v63 = vperm.slane %v2177_v56, %v2239_v22  ;;  %v2248_v16 = vperm.slane %v2179_v20, %v2247_v9 }
 0x3ef   : > { %v2155_v49 = vadd.f32 %v2652_v12, %v2154_v24  ;;  %v1746_v10 = vpop.xlane.xlu1 %1745 }
 0x3f0   : > { %v2242_v51 = vsel %vm2241_vm0, %v2240_v63, %v2238_v21  ;;  %v1924_v47 = vsub.f32 %v1746_v10, %v1908_v3 }
 0x3f1   : > { %v2246_v25 = vsel %vm2245_vm6, %v2244_v18, %v2242_v51  ;;  %v2159_v37 = vsel %vm2158_vm12, %v2652_v12, %v2155_v49 }
 0x3f2   : > { %v2250_v32 = vsel %vm2249_vm1, %v2248_v16, %v2246_v25  ;;  %v2164_v8 = vsel %vm2161_vm13, %v2163_v6, %v2159_v37  ;;  %v2150_v33 = vmul.f32 %v2149_v43, %v1924_v47 }
 0x3f3   : > { %v2165_v2 = vmul.f32 %v2164_v8, %v1925_v36 }
 0x3f4   : > { %v2180_v50 = vmul.f32 -1.0, %v2150_v33 }
 0x3f5   : > { %v2181_v44 = vmul.f32 -1.0, %v2165_v2 }
 0x3f6   : > { %v2252_v41 = vperm.slane %v2180_v50, %v2251_v17 }
 0x3f7   : > { %v2256_v52 = vperm.slane %v2181_v44, %v2255_v23 }
 0x3f8   : > { %v2254_v54 = vsel %vm2253_vm11, %v2252_v41, %v2250_v32 }
 0x3f9   : > { %v2258_v62 = vsel %vm2257_vm3, %v2256_v52, %v2254_v54 }
 0x3fa   : > { %2260 = vst [vmem:[%s217_s10] sm:$0x1] %v2258_v62 }
 0x3fb PF: > { %s14_s15 = sadd.s32 1, %s2659_s15  }
 0x3fc   : > { %p11_p5 = scmp.ge.s32.totalorder %s14_s15, 4  }
 0x3fe   :  { %13 = sbr.rel (!%p11_p5) target bundleno = 1 (0x1), region = 69 }

</bundles_post_ra>
